<compile_context>
chip_gen: v7x
topology: tpu7x:2x2x1
jax: 0.10.0
libtpu: 0.0.40
codegen_flags: <defaults>
</compile_context>

<pallas_src>
import jax
import jax.numpy as jnp
import numpy as np
from jax.experimental import pallas as pl
from jax.experimental.pallas import tpu as pltpu

# Shapes implied by the module: fc = Linear(32*123, classes) forces input length
# 2000 (conv k=5 valid -> 1996, pool4 -> 499, conv -> 495, pool4 -> 123).
L_IN = 2000
C1, C2 = 32, 32
K = 5
POOL = 4
L1 = L_IN - K + 1        # 1996
P1 = L1 // POOL          # 499
L2 = P1 - K + 1          # 495
P2 = L2 // POOL          # 123
DROP_P = 0.1

BT = 4                   # batch elements packed per grid step (4 * 32 = 128 lanes)
LANES = BT * C1          # 128

# conv1/pool1 chunking: 128 conv rows (= 32 pooled rows) per chunk.
CR1, CP1 = 128, 32
N1_FULL = 15                           # 15 * 128 = 1920 conv rows
T1_CONV = L1 - N1_FULL * CR1           # 76
T1_POOL = T1_CONV // POOL              # 19   (15*32 + 19 = 499 = P1)

# conv2/pool2 chunking (only the P2*4 = 492 rows that survive the floor pool).
CR2, CP2 = 128, 32
N2_FULL = 3                            # 3 * 128 = 384 conv rows
T2_CONV = P2 * POOL - N2_FULL * CR2    # 108
T2_POOL = T2_CONV // POOL              # 27   (3*32 + 27 = 123 = P2)


def _feature_kernel(x_ref, m_ref, w1_ref, b1_ref, w2_ref, b2_ref, feat_ref, p1_ref):
    # ---- conv1 (+bias, ReLU) with fused 4:1 max-pool, chunked over time ----
    def conv1_pool_chunk(start, nconv, npool, out_start):
        acc = jnp.zeros((nconv, LANES), jnp.float32)
        for k in range(K):
            xk = (x_ref[0, pl.ds(start + k, nconv), :]
                  * m_ref[0, pl.ds(start + k, nconv), :])            # (nconv, BT)
            acc = acc + jnp.dot(xk, w1_ref[k],                       # (BT, 128)
                                preferred_element_type=jnp.float32)
        h = jnp.maximum(acc + b1_ref[...], 0.0)
        p1_ref[pl.ds(out_start, npool), :] = jnp.max(
            h.reshape(npool, POOL, LANES), axis=1)

    @pl.loop(0, N1_FULL)
    def _(i):
        conv1_pool_chunk(pl.multiple_of(i * CR1, CR1), CR1, CP1, i * CP1)

    conv1_pool_chunk(N1_FULL * CR1, T1_CONV, T1_POOL, N1_FULL * CP1)

    # ---- conv2 (+bias, ReLU) with fused 4:1 max-pool, chunked over time ----
    def conv2_pool_chunk(start, nconv, npool, out_start):
        acc = jnp.zeros((nconv, LANES), jnp.float32)
        for k in range(K):
            acc = acc + jnp.dot(p1_ref[pl.ds(start + k, nconv), :],  # (nconv, 128)
                                w2_ref[k],                           # (128, 128)
                                preferred_element_type=jnp.float32)
        h = jnp.maximum(acc + b2_ref[...], 0.0)
        feat_ref[0, pl.ds(out_start, npool), :] = jnp.max(
            h.reshape(npool, POOL, LANES), axis=1)

    @pl.loop(0, N2_FULL)
    def _(i):
        conv2_pool_chunk(pl.multiple_of(i * CR2, CR2), CR2, CP2, i * CP2)

    conv2_pool_chunk(N2_FULL * CR2, T2_CONV, T2_POOL, N2_FULL * CP2)


def awfnet_forward(x, mask, params, classes):
    """x: (B, 1, L_IN) like PyTorch NCW; mask: (B, L_IN) scaled keep-mask."""
    B = x.shape[0]
    B_pad = ((B + BT - 1) // BT) * BT
    nB = B_pad // BT

    x2 = x.reshape(B, L_IN).astype(jnp.float32)
    m2 = mask.astype(jnp.float32)
    if B_pad != B:
        x2 = jnp.pad(x2, ((0, B_pad - B), (0, 0)))
        m2 = jnp.pad(m2, ((0, B_pad - B), (0, 0)))
    # Time-major per grid step: (nB, L_IN, BT); the 4-batch group lives in lanes.
    xT = x2.reshape(nB, BT, L_IN).transpose(0, 2, 1)
    mT = m2.reshape(nB, BT, L_IN).transpose(0, 2, 1)

    eye = jnp.eye(BT, dtype=jnp.float32)
    # conv1 weight per tap, block-diagonal over the 4 batch groups: (K, BT, 128)
    w1t = jnp.transpose(params["conv1_w"][:, 0, :], (1, 0))            # (K, C1)
    W1 = jnp.stack([jnp.kron(eye, w1t[k:k + 1, :]) for k in range(K)], axis=0)
    b1 = jnp.tile(params["conv1_b"], BT).reshape(1, LANES)
    # conv2 weight per tap, block-diagonal over batch groups: (K, 128, 128)
    W2 = jnp.stack([jnp.kron(eye, params["conv2_w"][:, :, k].T) for k in range(K)],
                   axis=0)
    b2 = jnp.tile(params["conv2_b"], BT).reshape(1, LANES)

    feat = pl.pallas_call(
        _feature_kernel,
        out_shape=jax.ShapeDtypeStruct((nB, P2, LANES), jnp.float32),
        grid_spec=pltpu.PrefetchScalarGridSpec(
            num_scalar_prefetch=0,
            grid=(nB,),
            in_specs=[
                pl.BlockSpec((1, L_IN, BT), lambda g: (g, 0, 0)),      # x (time, batch)
                pl.BlockSpec((1, L_IN, BT), lambda g: (g, 0, 0)),      # dropout mask
                pl.BlockSpec((K, BT, LANES), lambda g: (0, 0, 0)),     # W1 (resident)
                pl.BlockSpec((1, LANES), lambda g: (0, 0)),            # b1
                pl.BlockSpec((K, LANES, LANES), lambda g: (0, 0, 0)),  # W2 (resident)
                pl.BlockSpec((1, LANES), lambda g: (0, 0)),            # b2
            ],
            out_specs=pl.BlockSpec((1, P2, LANES), lambda g: (g, 0, 0)),
            scratch_shapes=[pltpu.VMEM((512, LANES), jnp.float32)],    # pooled conv1
        ),
        compiler_params=pltpu.CompilerParams(
            dimension_semantics=("parallel",)),
    )(xT, mT, W1, b1, W2, b2)

    # fc in plain XLA (tiny): permute fc_w to match torch's channel-major flatten
    # (index c*123 + t) against the kernel's (t, c)-ordered features.
    w_r = params["fc_w"].reshape(classes, C2, P2)                      # [j, c, t]
    feat4 = feat.reshape(nB, P2, BT, C2)                               # [n, t, g, c]
    logits = jnp.einsum("ntgc,jct->ngj", feat4, w_r,
                        precision=jax.lax.Precision.HIGHEST).reshape(B_pad, classes)
    return logits[:B] + params["fc_b"][None, :]


def awfnet_reference(x, mask, params):
    """Pure-JAX reference replicating the PyTorch forward (same dropout mask)."""
    B = x.shape[0]
    xd = x[:, 0, :] * mask                                             # (B, L)
    patches1 = jnp.stack([xd[:, k:k + L1] for k in range(K)], axis=-1)
    out1 = jnp.einsum("btk,ck->bct", patches1, params["conv1_w"][:, 0, :]) \
        + params["conv1_b"][None, :, None]
    h1 = jnp.maximum(out1, 0.0)
    p1 = h1.reshape(B, C1, P1, POOL).max(axis=-1)
    patches2 = jnp.stack([p1[:, :, k:k + L2] for k in range(K)], axis=-1)
    out2 = jnp.einsum("bitk,oik->bot", patches2, params["conv2_w"]) \
        + params["conv2_b"][None, :, None]
    h2 = jnp.maximum(out2, 0.0)
    p2 = h2[:, :, :P2 * POOL].reshape(B, C2, P2, POOL).max(axis=-1)
    flat = p2.reshape(B, C2 * P2)
    return flat @ params["fc_w"].T + params["fc_b"][None, :]


if __name__ == "__main__":
    B, classes = 2, 10
    key = jax.random.PRNGKey(0)
    ks = jax.random.split(key, 8)

    params = {
        "conv1_w": 0.1 * jax.random.normal(ks[0], (C1, 1, K), jnp.float32),
        "conv1_b": 0.05 * jax.random.normal(ks[1], (C1,), jnp.float32),
        "conv2_w": 0.1 * jax.random.normal(ks[2], (C2, C1, K), jnp.float32),
        "conv2_b": 0.05 * jax.random.normal(ks[3], (C2,), jnp.float32),
        "fc_w": 0.05 * jax.random.normal(ks[4], (classes, C2 * P2), jnp.float32),
        "fc_b": 0.05 * jax.random.normal(ks[5], (classes,), jnp.float32),
    }

    x = jax.random.normal(ks[6], (B, 1, L_IN), jnp.float32)
    # F.dropout(p=0.1) default training=True -> Bernoulli keep mask, 1/(1-p) scale.
    keep = jax.random.bernoulli(ks[7], 1.0 - DROP_P, (B, L_IN))
    mask = keep.astype(jnp.float32) / (1.0 - DROP_P)

    logits = awfnet_forward(x, mask, params, classes)
    jax.block_until_ready(logits)

    ref = awfnet_reference(x, mask, params)
    assert logits.shape == (B, classes)
    if not np.allclose(np.asarray(logits), np.asarray(ref), rtol=2e-2, atol=5e-2):
        raise AssertionError("Pallas output does not match JAX reference")
    print("KERNEL_OK")
</pallas_src>

<mosaic_0001>
module attributes {stable_mosaic.version = 11 : i64} {
  func.func @_feature_kernel(%arg0: i32, %arg1: memref<1x2000x4xf32, #tpu.memory_space<vmem>>, %arg2: memref<1x2000x4xf32, #tpu.memory_space<vmem>>, %arg3: memref<5x4x128xf32, #tpu.memory_space<vmem>>, %arg4: memref<1x128xf32, #tpu.memory_space<vmem>>, %arg5: memref<5x128x128xf32, #tpu.memory_space<vmem>>, %arg6: memref<1x128xf32, #tpu.memory_space<vmem>>, %arg7: memref<1x123x128xf32, #tpu.memory_space<vmem>>, %arg8: memref<512x128xf32, #tpu.memory_space<vmem>>) attributes {dimension_semantics = [#tpu.dimension_semantics<parallel>], iteration_bounds = array<i64: 1>, scalar_prefetch = 0 : i64, scratch_operands = 1 : i64, tpu.core_type = #tpu.core_type<tc>, window_params = [{transform_indices = @transform_0, window_bounds = array<i64: 1, 2000, 4>}, {transform_indices = @transform_1, window_bounds = array<i64: 1, 2000, 4>}, {pipeline_mode = #tpu.pipeline_mode<synchronous>, transform_indices = @transform_2, window_bounds = array<i64: 5, 4, 128>}, {pipeline_mode = #tpu.pipeline_mode<synchronous>, transform_indices = @transform_3, window_bounds = array<i64: 1, 128>}, {pipeline_mode = #tpu.pipeline_mode<synchronous>, transform_indices = @transform_4, window_bounds = array<i64: 5, 128, 128>}, {pipeline_mode = #tpu.pipeline_mode<synchronous>, transform_indices = @transform_5, window_bounds = array<i64: 1, 128>}, {transform_indices = @transform_6, window_bounds = array<i64: 1, 123, 128>}]} {
    %c0_i32 = arith.constant 0 : i32
    %c15_i32 = arith.constant 15 : i32
    %0 = arith.addi %c0_i32, %c15_i32 : i32
    %c1_i32 = arith.constant 1 : i32
    scf.for %arg9 = %c0_i32 to %0 step %c1_i32  : i32 {
      %c1_i32_81 = arith.constant 1 : i32
      %92 = arith.muli %arg9, %c1_i32_81 : i32
      %c0_i32_82 = arith.constant 0 : i32
      %93 = arith.addi %c0_i32_82, %92 : i32
      %c128_i32 = arith.constant 128 : i32
      %94 = arith.muli %93, %c128_i32 : i32
      %95 = tpu.assume_multiple %94, 128 : i32
      %c32_i32 = arith.constant 32 : i32
      %96 = arith.muli %93, %c32_i32 : i32
      %cst_83 = arith.constant 0.000000e+00 : f32
      %97 = vector.broadcast %cst_83 : f32 to vector<128x128xf32>
      %c0_i32_84 = arith.constant 0 : i32
      %98 = arith.addi %95, %c0_i32_84 : i32
      %c0_85 = arith.constant 0 : index
      %99 = arith.index_cast %98 : i32 to index
      %c0_86 = arith.constant 0 : index
      %100 = vector.load %arg1[%c0_85, %99, %c0_86] : memref<1x2000x4xf32, #tpu.memory_space<vmem>>, vector<1x128x4xf32>
      %101 = vector.shape_cast %100 : vector<1x128x4xf32> to vector<128x4xf32>
      %c0_i32_87 = arith.constant 0 : i32
      %102 = arith.addi %95, %c0_i32_87 : i32
      %c0_88 = arith.constant 0 : index
      %103 = arith.index_cast %102 : i32 to index
      %c0_89 = arith.constant 0 : index
      %104 = vector.load %arg2[%c0_88, %103, %c0_89] : memref<1x2000x4xf32, #tpu.memory_space<vmem>>, vector<1x128x4xf32>
      %105 = vector.shape_cast %104 : vector<1x128x4xf32> to vector<128x4xf32>
      %106 = arith.mulf %101, %105 : vector<128x4xf32>
      %c0_90 = arith.constant 0 : index
      %c0_91 = arith.constant 0 : index
      %c0_92 = arith.constant 0 : index
      %107 = vector.load %arg3[%c0_90, %c0_91, %c0_92] : memref<5x4x128xf32, #tpu.memory_space<vmem>>, vector<1x4x128xf32>
      %108 = vector.shape_cast %107 : vector<1x4x128xf32> to vector<4x128xf32>
      %cst_93 = arith.constant dense<0.000000e+00> : vector<128x128xf32>
      %109 = tpu.matmul %106, %108, %cst_93 {dimension_numbers = #tpu.dot_dimension_numbers<[1], [0], [0], [1], [0, 0, 1, 1], [], []>} : vector<128x4xf32>, vector<4x128xf32>, vector<128x128xf32> -> vector<128x128xf32>
      %110 = arith.addf %97, %109 : vector<128x128xf32>
      %c1_i32_94 = arith.constant 1 : i32
      %111 = arith.addi %95, %c1_i32_94 : i32
      %c0_95 = arith.constant 0 : index
      %112 = arith.index_cast %111 : i32 to index
      %c0_96 = arith.constant 0 : index
      %113 = vector.load %arg1[%c0_95, %112, %c0_96] : memref<1x2000x4xf32, #tpu.memory_space<vmem>>, vector<1x128x4xf32>
      %114 = vector.shape_cast %113 : vector<1x128x4xf32> to vector<128x4xf32>
      %c1_i32_97 = arith.constant 1 : i32
      %115 = arith.addi %95, %c1_i32_97 : i32
      %c0_98 = arith.constant 0 : index
      %116 = arith.index_cast %115 : i32 to index
      %c0_99 = arith.constant 0 : index
      %117 = vector.load %arg2[%c0_98, %116, %c0_99] : memref<1x2000x4xf32, #tpu.memory_space<vmem>>, vector<1x128x4xf32>
      %118 = vector.shape_cast %117 : vector<1x128x4xf32> to vector<128x4xf32>
      %119 = arith.mulf %114, %118 : vector<128x4xf32>
      %c1_100 = arith.constant 1 : index
      %c0_101 = arith.constant 0 : index
      %c0_102 = arith.constant 0 : index
      %120 = vector.load %arg3[%c1_100, %c0_101, %c0_102] : memref<5x4x128xf32, #tpu.memory_space<vmem>>, vector<1x4x128xf32>
      %121 = vector.shape_cast %120 : vector<1x4x128xf32> to vector<4x128xf32>
      %cst_103 = arith.constant dense<0.000000e+00> : vector<128x128xf32>
      %122 = tpu.matmul %119, %121, %cst_103 {dimension_numbers = #tpu.dot_dimension_numbers<[1], [0], [0], [1], [0, 0, 1, 1], [], []>} : vector<128x4xf32>, vector<4x128xf32>, vector<128x128xf32> -> vector<128x128xf32>
      %123 = arith.addf %110, %122 : vector<128x128xf32>
      %c2_i32 = arith.constant 2 : i32
      %124 = arith.addi %95, %c2_i32 : i32
      %c0_104 = arith.constant 0 : index
      %125 = arith.index_cast %124 : i32 to index
      %c0_105 = arith.constant 0 : index
      %126 = vector.load %arg1[%c0_104, %125, %c0_105] : memref<1x2000x4xf32, #tpu.memory_space<vmem>>, vector<1x128x4xf32>
      %127 = vector.shape_cast %126 : vector<1x128x4xf32> to vector<128x4xf32>
      %c2_i32_106 = arith.constant 2 : i32
      %128 = arith.addi %95, %c2_i32_106 : i32
      %c0_107 = arith.constant 0 : index
      %129 = arith.index_cast %128 : i32 to index
      %c0_108 = arith.constant 0 : index
      %130 = vector.load %arg2[%c0_107, %129, %c0_108] : memref<1x2000x4xf32, #tpu.memory_space<vmem>>, vector<1x128x4xf32>
      %131 = vector.shape_cast %130 : vector<1x128x4xf32> to vector<128x4xf32>
      %132 = arith.mulf %127, %131 : vector<128x4xf32>
      %c2_109 = arith.constant 2 : index
      %c0_110 = arith.constant 0 : index
      %c0_111 = arith.constant 0 : index
      %133 = vector.load %arg3[%c2_109, %c0_110, %c0_111] : memref<5x4x128xf32, #tpu.memory_space<vmem>>, vector<1x4x128xf32>
      %134 = vector.shape_cast %133 : vector<1x4x128xf32> to vector<4x128xf32>
      %cst_112 = arith.constant dense<0.000000e+00> : vector<128x128xf32>
      %135 = tpu.matmul %132, %134, %cst_112 {dimension_numbers = #tpu.dot_dimension_numbers<[1], [0], [0], [1], [0, 0, 1, 1], [], []>} : vector<128x4xf32>, vector<4x128xf32>, vector<128x128xf32> -> vector<128x128xf32>
      %136 = arith.addf %123, %135 : vector<128x128xf32>
      %c3_i32_113 = arith.constant 3 : i32
      %137 = arith.addi %95, %c3_i32_113 : i32
      %c0_114 = arith.constant 0 : index
      %138 = arith.index_cast %137 : i32 to index
      %c0_115 = arith.constant 0 : index
      %139 = vector.load %arg1[%c0_114, %138, %c0_115] : memref<1x2000x4xf32, #tpu.memory_space<vmem>>, vector<1x128x4xf32>
      %140 = vector.shape_cast %139 : vector<1x128x4xf32> to vector<128x4xf32>
      %c3_i32_116 = arith.constant 3 : i32
      %141 = arith.addi %95, %c3_i32_116 : i32
      %c0_117 = arith.constant 0 : index
      %142 = arith.index_cast %141 : i32 to index
      %c0_118 = arith.constant 0 : index
      %143 = vector.load %arg2[%c0_117, %142, %c0_118] : memref<1x2000x4xf32, #tpu.memory_space<vmem>>, vector<1x128x4xf32>
      %144 = vector.shape_cast %143 : vector<1x128x4xf32> to vector<128x4xf32>
      %145 = arith.mulf %140, %144 : vector<128x4xf32>
      %c3_119 = arith.constant 3 : index
      %c0_120 = arith.constant 0 : index
      %c0_121 = arith.constant 0 : index
      %146 = vector.load %arg3[%c3_119, %c0_120, %c0_121] : memref<5x4x128xf32, #tpu.memory_space<vmem>>, vector<1x4x128xf32>
      %147 = vector.shape_cast %146 : vector<1x4x128xf32> to vector<4x128xf32>
      %cst_122 = arith.constant dense<0.000000e+00> : vector<128x128xf32>
      %148 = tpu.matmul %145, %147, %cst_122 {dimension_numbers = #tpu.dot_dimension_numbers<[1], [0], [0], [1], [0, 0, 1, 1], [], []>} : vector<128x4xf32>, vector<4x128xf32>, vector<128x128xf32> -> vector<128x128xf32>
      %149 = arith.addf %136, %148 : vector<128x128xf32>
      %c4_i32 = arith.constant 4 : i32
      %150 = arith.addi %95, %c4_i32 : i32
      %c0_123 = arith.constant 0 : index
      %151 = arith.index_cast %150 : i32 to index
      %c0_124 = arith.constant 0 : index
      %152 = vector.load %arg1[%c0_123, %151, %c0_124] : memref<1x2000x4xf32, #tpu.memory_space<vmem>>, vector<1x128x4xf32>
      %153 = vector.shape_cast %152 : vector<1x128x4xf32> to vector<128x4xf32>
      %c4_i32_125 = arith.constant 4 : i32
      %154 = arith.addi %95, %c4_i32_125 : i32
      %c0_126 = arith.constant 0 : index
      %155 = arith.index_cast %154 : i32 to index
      %c0_127 = arith.constant 0 : index
      %156 = vector.load %arg2[%c0_126, %155, %c0_127] : memref<1x2000x4xf32, #tpu.memory_space<vmem>>, vector<1x128x4xf32>
      %157 = vector.shape_cast %156 : vector<1x128x4xf32> to vector<128x4xf32>
      %158 = arith.mulf %153, %157 : vector<128x4xf32>
      %c4_128 = arith.constant 4 : index
      %c0_129 = arith.constant 0 : index
      %c0_130 = arith.constant 0 : index
      %159 = vector.load %arg3[%c4_128, %c0_129, %c0_130] : memref<5x4x128xf32, #tpu.memory_space<vmem>>, vector<1x4x128xf32>
      %160 = vector.shape_cast %159 : vector<1x4x128xf32> to vector<4x128xf32>
      %cst_131 = arith.constant dense<0.000000e+00> : vector<128x128xf32>
      %161 = tpu.matmul %158, %160, %cst_131 {dimension_numbers = #tpu.dot_dimension_numbers<[1], [0], [0], [1], [0, 0, 1, 1], [], []>} : vector<128x4xf32>, vector<4x128xf32>, vector<128x128xf32> -> vector<128x128xf32>
      %162 = arith.addf %149, %161 : vector<128x128xf32>
      %c0_132 = arith.constant 0 : index
      %c0_133 = arith.constant 0 : index
      %163 = vector.load %arg4[%c0_132, %c0_133] : memref<1x128xf32, #tpu.memory_space<vmem>>, vector<1x128xf32>
      %164 = vector.broadcast %163 : vector<1x128xf32> to vector<128x128xf32>
      %165 = arith.addf %162, %164 : vector<128x128xf32>
      %cst_134 = arith.constant 0.000000e+00 : f32
      %166 = vector.broadcast %cst_134 : f32 to vector<128x128xf32>
      %167 = arith.maximumf %165, %166 : vector<128x128xf32>
      %168 = vector.shape_cast %167 : vector<128x128xf32> to vector<32x4x128xf32>
      %cst_135 = arith.constant dense<0xFF800000> : vector<32x128xf32>
      %169 = vector.multi_reduction <maximumf>, %168, %cst_135 [1] : vector<32x4x128xf32> to vector<32x128xf32>
      %170 = arith.index_cast %96 : i32 to index
      %c0_136 = arith.constant 0 : index
      %171 = vector.load %arg8[%170, %c0_136] : memref<512x128xf32, #tpu.memory_space<vmem>>, vector<32x128xf32>
      tpu.vector_store %arg8[%170, %c0_136], %169 {strides = array<i32>} : memref<512x128xf32, #tpu.memory_space<vmem>>, vector<32x128xf32>,
    }
    %c15_i32_0 = arith.constant 15 : i32
    %cst = arith.constant 0.000000e+00 : f32
    %1 = vector.broadcast %cst : f32 to vector<76x128xf32>
    %c0 = arith.constant 0 : index
    %c1920 = arith.constant 1920 : index
    %c0_1 = arith.constant 0 : index
    %2 = vector.load %arg1[%c0, %c1920, %c0_1] : memref<1x2000x4xf32, #tpu.memory_space<vmem>>, vector<1x76x4xf32>
    %3 = vector.shape_cast %2 : vector<1x76x4xf32> to vector<76x4xf32>
    %c0_2 = arith.constant 0 : index
    %c1920_3 = arith.constant 1920 : index
    %c0_4 = arith.constant 0 : index
    %4 = vector.load %arg2[%c0_2, %c1920_3, %c0_4] : memref<1x2000x4xf32, #tpu.memory_space<vmem>>, vector<1x76x4xf32>
    %5 = vector.shape_cast %4 : vector<1x76x4xf32> to vector<76x4xf32>
    %6 = arith.mulf %3, %5 : vector<76x4xf32>
    %c0_5 = arith.constant 0 : index
    %c0_6 = arith.constant 0 : index
    %c0_7 = arith.constant 0 : index
    %7 = vector.load %arg3[%c0_5, %c0_6, %c0_7] : memref<5x4x128xf32, #tpu.memory_space<vmem>>, vector<1x4x128xf32>
    %8 = vector.shape_cast %7 : vector<1x4x128xf32> to vector<4x128xf32>
    %cst_8 = arith.constant dense<0.000000e+00> : vector<76x128xf32>
    %9 = tpu.matmul %6, %8, %cst_8 {dimension_numbers = #tpu.dot_dimension_numbers<[1], [0], [0], [1], [0, 0, 1, 1], [], []>} : vector<76x4xf32>, vector<4x128xf32>, vector<76x128xf32> -> vector<76x128xf32>
    %10 = arith.addf %1, %9 : vector<76x128xf32>
    %c0_9 = arith.constant 0 : index
    %c1921 = arith.constant 1921 : index
    %c0_10 = arith.constant 0 : index
    %11 = vector.load %arg1[%c0_9, %c1921, %c0_10] : memref<1x2000x4xf32, #tpu.memory_space<vmem>>, vector<1x76x4xf32>
    %12 = vector.shape_cast %11 : vector<1x76x4xf32> to vector<76x4xf32>
    %c0_11 = arith.constant 0 : index
    %c1921_12 = arith.constant 1921 : index
    %c0_13 = arith.constant 0 : index
    %13 = vector.load %arg2[%c0_11, %c1921_12, %c0_13] : memref<1x2000x4xf32, #tpu.memory_space<vmem>>, vector<1x76x4xf32>
    %14 = vector.shape_cast %13 : vector<1x76x4xf32> to vector<76x4xf32>
    %15 = arith.mulf %12, %14 : vector<76x4xf32>
    %c1 = arith.constant 1 : index
    %c0_14 = arith.constant 0 : index
    %c0_15 = arith.constant 0 : index
    %16 = vector.load %arg3[%c1, %c0_14, %c0_15] : memref<5x4x128xf32, #tpu.memory_space<vmem>>, vector<1x4x128xf32>
    %17 = vector.shape_cast %16 : vector<1x4x128xf32> to vector<4x128xf32>
    %cst_16 = arith.constant dense<0.000000e+00> : vector<76x128xf32>
    %18 = tpu.matmul %15, %17, %cst_16 {dimension_numbers = #tpu.dot_dimension_numbers<[1], [0], [0], [1], [0, 0, 1, 1], [], []>} : vector<76x4xf32>, vector<4x128xf32>, vector<76x128xf32> -> vector<76x128xf32>
    %19 = arith.addf %10, %18 : vector<76x128xf32>
    %c0_17 = arith.constant 0 : index
    %c1922 = arith.constant 1922 : index
    %c0_18 = arith.constant 0 : index
    %20 = vector.load %arg1[%c0_17, %c1922, %c0_18] : memref<1x2000x4xf32, #tpu.memory_space<vmem>>, vector<1x76x4xf32>
    %21 = vector.shape_cast %20 : vector<1x76x4xf32> to vector<76x4xf32>
    %c0_19 = arith.constant 0 : index
    %c1922_20 = arith.constant 1922 : index
    %c0_21 = arith.constant 0 : index
    %22 = vector.load %arg2[%c0_19, %c1922_20, %c0_21] : memref<1x2000x4xf32, #tpu.memory_space<vmem>>, vector<1x76x4xf32>
    %23 = vector.shape_cast %22 : vector<1x76x4xf32> to vector<76x4xf32>
    %24 = arith.mulf %21, %23 : vector<76x4xf32>
    %c2 = arith.constant 2 : index
    %c0_22 = arith.constant 0 : index
    %c0_23 = arith.constant 0 : index
    %25 = vector.load %arg3[%c2, %c0_22, %c0_23] : memref<5x4x128xf32, #tpu.memory_space<vmem>>, vector<1x4x128xf32>
    %26 = vector.shape_cast %25 : vector<1x4x128xf32> to vector<4x128xf32>
    %cst_24 = arith.constant dense<0.000000e+00> : vector<76x128xf32>
    %27 = tpu.matmul %24, %26, %cst_24 {dimension_numbers = #tpu.dot_dimension_numbers<[1], [0], [0], [1], [0, 0, 1, 1], [], []>} : vector<76x4xf32>, vector<4x128xf32>, vector<76x128xf32> -> vector<76x128xf32>
    %28 = arith.addf %19, %27 : vector<76x128xf32>
    %c0_25 = arith.constant 0 : index
    %c1923 = arith.constant 1923 : index
    %c0_26 = arith.constant 0 : index
    %29 = vector.load %arg1[%c0_25, %c1923, %c0_26] : memref<1x2000x4xf32, #tpu.memory_space<vmem>>, vector<1x76x4xf32>
    %30 = vector.shape_cast %29 : vector<1x76x4xf32> to vector<76x4xf32>
    %c0_27 = arith.constant 0 : index
    %c1923_28 = arith.constant 1923 : index
    %c0_29 = arith.constant 0 : index
    %31 = vector.load %arg2[%c0_27, %c1923_28, %c0_29] : memref<1x2000x4xf32, #tpu.memory_space<vmem>>, vector<1x76x4xf32>
    %32 = vector.shape_cast %31 : vector<1x76x4xf32> to vector<76x4xf32>
    %33 = arith.mulf %30, %32 : vector<76x4xf32>
    %c3 = arith.constant 3 : index
    %c0_30 = arith.constant 0 : index
    %c0_31 = arith.constant 0 : index
    %34 = vector.load %arg3[%c3, %c0_30, %c0_31] : memref<5x4x128xf32, #tpu.memory_space<vmem>>, vector<1x4x128xf32>
    %35 = vector.shape_cast %34 : vector<1x4x128xf32> to vector<4x128xf32>
    %cst_32 = arith.constant dense<0.000000e+00> : vector<76x128xf32>
    %36 = tpu.matmul %33, %35, %cst_32 {dimension_numbers = #tpu.dot_dimension_numbers<[1], [0], [0], [1], [0, 0, 1, 1], [], []>} : vector<76x4xf32>, vector<4x128xf32>, vector<76x128xf32> -> vector<76x128xf32>
    %37 = arith.addf %28, %36 : vector<76x128xf32>
    %c0_33 = arith.constant 0 : index
    %c1924 = arith.constant 1924 : index
    %c0_34 = arith.constant 0 : index
    %38 = vector.load %arg1[%c0_33, %c1924, %c0_34] : memref<1x2000x4xf32, #tpu.memory_space<vmem>>, vector<1x76x4xf32>
    %39 = vector.shape_cast %38 : vector<1x76x4xf32> to vector<76x4xf32>
    %c0_35 = arith.constant 0 : index
    %c1924_36 = arith.constant 1924 : index
    %c0_37 = arith.constant 0 : index
    %40 = vector.load %arg2[%c0_35, %c1924_36, %c0_37] : memref<1x2000x4xf32, #tpu.memory_space<vmem>>, vector<1x76x4xf32>
    %41 = vector.shape_cast %40 : vector<1x76x4xf32> to vector<76x4xf32>
    %42 = arith.mulf %39, %41 : vector<76x4xf32>
    %c4 = arith.constant 4 : index
    %c0_38 = arith.constant 0 : index
    %c0_39 = arith.constant 0 : index
    %43 = vector.load %arg3[%c4, %c0_38, %c0_39] : memref<5x4x128xf32, #tpu.memory_space<vmem>>, vector<1x4x128xf32>
    %44 = vector.shape_cast %43 : vector<1x4x128xf32> to vector<4x128xf32>
    %cst_40 = arith.constant dense<0.000000e+00> : vector<76x128xf32>
    %45 = tpu.matmul %42, %44, %cst_40 {dimension_numbers = #tpu.dot_dimension_numbers<[1], [0], [0], [1], [0, 0, 1, 1], [], []>} : vector<76x4xf32>, vector<4x128xf32>, vector<76x128xf32> -> vector<76x128xf32>
    %46 = arith.addf %37, %45 : vector<76x128xf32>
    %c0_41 = arith.constant 0 : index
    %c0_42 = arith.constant 0 : index
    %47 = vector.load %arg4[%c0_41, %c0_42] : memref<1x128xf32, #tpu.memory_space<vmem>>, vector<1x128xf32>
    %48 = vector.broadcast %47 : vector<1x128xf32> to vector<76x128xf32>
    %49 = arith.addf %46, %48 : vector<76x128xf32>
    %cst_43 = arith.constant 0.000000e+00 : f32
    %50 = vector.broadcast %cst_43 : f32 to vector<76x128xf32>
    %51 = arith.maximumf %49, %50 : vector<76x128xf32>
    %52 = vector.shape_cast %51 : vector<76x128xf32> to vector<19x4x128xf32>
    %cst_44 = arith.constant dense<0xFF800000> : vector<19x128xf32>
    %53 = vector.multi_reduction <maximumf>, %52, %cst_44 [1] : vector<19x4x128xf32> to vector<19x128xf32>
    %c480 = arith.constant 480 : index
    %c0_45 = arith.constant 0 : index
    %54 = vector.load %arg8[%c480, %c0_45] : memref<512x128xf32, #tpu.memory_space<vmem>>, vector<19x128xf32>
    tpu.vector_store %arg8[%c480, %c0_45], %53 {strides = array<i32>} : memref<512x128xf32, #tpu.memory_space<vmem>>, vector<19x128xf32>,
    %c0_i32_46 = arith.constant 0 : i32
    %c3_i32 = arith.constant 3 : i32
    %55 = arith.addi %c0_i32_46, %c3_i32 : i32
    %c1_i32_47 = arith.constant 1 : i32
    scf.for %arg9 = %c0_i32_46 to %55 step %c1_i32_47  : i32 {
      %c1_i32_81 = arith.constant 1 : i32
      %92 = arith.muli %arg9, %c1_i32_81 : i32
      %c0_i32_82 = arith.constant 0 : i32
      %93 = arith.addi %c0_i32_82, %92 : i32
      %c128_i32 = arith.constant 128 : i32
      %94 = arith.muli %93, %c128_i32 : i32
      %95 = tpu.assume_multiple %94, 128 : i32
      %c32_i32 = arith.constant 32 : i32
      %96 = arith.muli %93, %c32_i32 : i32
      %cst_83 = arith.constant 0.000000e+00 : f32
      %97 = vector.broadcast %cst_83 : f32 to vector<128x128xf32>
      %c0_i32_84 = arith.constant 0 : i32
      %98 = arith.addi %95, %c0_i32_84 : i32
      %99 = arith.index_cast %98 : i32 to index
      %c0_85 = arith.constant 0 : index
      %100 = vector.load %arg8[%99, %c0_85] : memref<512x128xf32, #tpu.memory_space<vmem>>, vector<128x128xf32>
      %c0_86 = arith.constant 0 : index
      %c0_87 = arith.constant 0 : index
      %c0_88 = arith.constant 0 : index
      %101 = vector.load %arg5[%c0_86, %c0_87, %c0_88] : memref<5x128x128xf32, #tpu.memory_space<vmem>>, vector<1x128x128xf32>
      %102 = vector.shape_cast %101 : vector<1x128x128xf32> to vector<128x128xf32>
      %cst_89 = arith.constant dense<0.000000e+00> : vector<128x128xf32>
      %103 = tpu.matmul %100, %102, %cst_89 {dimension_numbers = #tpu.dot_dimension_numbers<[1], [0], [0], [1], [0, 0, 1, 1], [], []>} : vector<128x128xf32>, vector<128x128xf32>, vector<128x128xf32> -> vector<128x128xf32>
      %104 = arith.addf %97, %103 : vector<128x128xf32>
      %c1_i32_90 = arith.constant 1 : i32
      %105 = arith.addi %95, %c1_i32_90 : i32
      %106 = arith.index_cast %105 : i32 to index
      %c0_91 = arith.constant 0 : index
      %107 = vector.load %arg8[%106, %c0_91] : memref<512x128xf32, #tpu.memory_space<vmem>>, vector<128x128xf32>
      %c1_92 = arith.constant 1 : index
      %c0_93 = arith.constant 0 : index
      %c0_94 = arith.constant 0 : index
      %108 = vector.load %arg5[%c1_92, %c0_93, %c0_94] : memref<5x128x128xf32, #tpu.memory_space<vmem>>, vector<1x128x128xf32>
      %109 = vector.shape_cast %108 : vector<1x128x128xf32> to vector<128x128xf32>
      %cst_95 = arith.constant dense<0.000000e+00> : vector<128x128xf32>
      %110 = tpu.matmul %107, %109, %cst_95 {dimension_numbers = #tpu.dot_dimension_numbers<[1], [0], [0], [1], [0, 0, 1, 1], [], []>} : vector<128x128xf32>, vector<128x128xf32>, vector<128x128xf32> -> vector<128x128xf32>
      %111 = arith.addf %104, %110 : vector<128x128xf32>
      %c2_i32 = arith.constant 2 : i32
      %112 = arith.addi %95, %c2_i32 : i32
      %113 = arith.index_cast %112 : i32 to index
      %c0_96 = arith.constant 0 : index
      %114 = vector.load %arg8[%113, %c0_96] : memref<512x128xf32, #tpu.memory_space<vmem>>, vector<128x128xf32>
      %c2_97 = arith.constant 2 : index
      %c0_98 = arith.constant 0 : index
      %c0_99 = arith.constant 0 : index
      %115 = vector.load %arg5[%c2_97, %c0_98, %c0_99] : memref<5x128x128xf32, #tpu.memory_space<vmem>>, vector<1x128x128xf32>
      %116 = vector.shape_cast %115 : vector<1x128x128xf32> to vector<128x128xf32>
      %cst_100 = arith.constant dense<0.000000e+00> : vector<128x128xf32>
      %117 = tpu.matmul %114, %116, %cst_100 {dimension_numbers = #tpu.dot_dimension_numbers<[1], [0], [0], [1], [0, 0, 1, 1], [], []>} : vector<128x128xf32>, vector<128x128xf32>, vector<128x128xf32> -> vector<128x128xf32>
      %118 = arith.addf %111, %117 : vector<128x128xf32>
      %c3_i32_101 = arith.constant 3 : i32
      %119 = arith.addi %95, %c3_i32_101 : i32
      %120 = arith.index_cast %119 : i32 to index
      %c0_102 = arith.constant 0 : index
      %121 = vector.load %arg8[%120, %c0_102] : memref<512x128xf32, #tpu.memory_space<vmem>>, vector<128x128xf32>
      %c3_103 = arith.constant 3 : index
      %c0_104 = arith.constant 0 : index
      %c0_105 = arith.constant 0 : index
      %122 = vector.load %arg5[%c3_103, %c0_104, %c0_105] : memref<5x128x128xf32, #tpu.memory_space<vmem>>, vector<1x128x128xf32>
      %123 = vector.shape_cast %122 : vector<1x128x128xf32> to vector<128x128xf32>
      %cst_106 = arith.constant dense<0.000000e+00> : vector<128x128xf32>
      %124 = tpu.matmul %121, %123, %cst_106 {dimension_numbers = #tpu.dot_dimension_numbers<[1], [0], [0], [1], [0, 0, 1, 1], [], []>} : vector<128x128xf32>, vector<128x128xf32>, vector<128x128xf32> -> vector<128x128xf32>
      %125 = arith.addf %118, %124 : vector<128x128xf32>
      %c4_i32 = arith.constant 4 : i32
      %126 = arith.addi %95, %c4_i32 : i32
      %127 = arith.index_cast %126 : i32 to index
      %c0_107 = arith.constant 0 : index
      %128 = vector.load %arg8[%127, %c0_107] : memref<512x128xf32, #tpu.memory_space<vmem>>, vector<128x128xf32>
      %c4_108 = arith.constant 4 : index
      %c0_109 = arith.constant 0 : index
      %c0_110 = arith.constant 0 : index
      %129 = vector.load %arg5[%c4_108, %c0_109, %c0_110] : memref<5x128x128xf32, #tpu.memory_space<vmem>>, vector<1x128x128xf32>
      %130 = vector.shape_cast %129 : vector<1x128x128xf32> to vector<128x128xf32>
      %cst_111 = arith.constant dense<0.000000e+00> : vector<128x128xf32>
      %131 = tpu.matmul %128, %130, %cst_111 {dimension_numbers = #tpu.dot_dimension_numbers<[1], [0], [0], [1], [0, 0, 1, 1], [], []>} : vector<128x128xf32>, vector<128x128xf32>, vector<128x128xf32> -> vector<128x128xf32>
      %132 = arith.addf %125, %131 : vector<128x128xf32>
      %c0_112 = arith.constant 0 : index
      %c0_113 = arith.constant 0 : index
      %133 = vector.load %arg6[%c0_112, %c0_113] : memref<1x128xf32, #tpu.memory_space<vmem>>, vector<1x128xf32>
      %134 = vector.broadcast %133 : vector<1x128xf32> to vector<128x128xf32>
      %135 = arith.addf %132, %134 : vector<128x128xf32>
      %cst_114 = arith.constant 0.000000e+00 : f32
      %136 = vector.broadcast %cst_114 : f32 to vector<128x128xf32>
      %137 = arith.maximumf %135, %136 : vector<128x128xf32>
      %138 = vector.shape_cast %137 : vector<128x128xf32> to vector<32x4x128xf32>
      %cst_115 = arith.constant dense<0xFF800000> : vector<32x128xf32>
      %139 = vector.multi_reduction <maximumf>, %138, %cst_115 [1] : vector<32x4x128xf32> to vector<32x128xf32>
      %c0_116 = arith.constant 0 : index
      %140 = arith.index_cast %96 : i32 to index
      %c0_117 = arith.constant 0 : index
      %141 = vector.load %arg7[%c0_116, %140, %c0_117] : memref<1x123x128xf32, #tpu.memory_space<vmem>>, vector<1x32x128xf32>
      %142 = vector.shape_cast %141 : vector<1x32x128xf32> to vector<32x128xf32>
      %143 = vector.shape_cast %139 : vector<32x128xf32> to vector<1x32x128xf32>
      tpu.vector_store %arg7[%c0_116, %140, %c0_117], %143 {strides = array<i32>} : memref<1x123x128xf32, #tpu.memory_space<vmem>>, vector<1x32x128xf32>,
    }
    %c3_i32_48 = arith.constant 3 : i32
    %cst_49 = arith.constant 0.000000e+00 : f32
    %56 = vector.broadcast %cst_49 : f32 to vector<108x128xf32>
    %c384 = arith.constant 384 : index
    %c0_50 = arith.constant 0 : index
    %57 = vector.load %arg8[%c384, %c0_50] : memref<512x128xf32, #tpu.memory_space<vmem>>, vector<108x128xf32>
    %c0_51 = arith.constant 0 : index
    %c0_52 = arith.constant 0 : index
    %c0_53 = arith.constant 0 : index
    %58 = vector.load %arg5[%c0_51, %c0_52, %c0_53] : memref<5x128x128xf32, #tpu.memory_space<vmem>>, vector<1x128x128xf32>
    %59 = vector.shape_cast %58 : vector<1x128x128xf32> to vector<128x128xf32>
    %cst_54 = arith.constant dense<0.000000e+00> : vector<108x128xf32>
    %60 = tpu.matmul %57, %59, %cst_54 {dimension_numbers = #tpu.dot_dimension_numbers<[1], [0], [0], [1], [0, 0, 1, 1], [], []>} : vector<108x128xf32>, vector<128x128xf32>, vector<108x128xf32> -> vector<108x128xf32>
    %61 = arith.addf %56, %60 : vector<108x128xf32>
    %c385 = arith.constant 385 : index
    %c0_55 = arith.constant 0 : index
    %62 = vector.load %arg8[%c385, %c0_55] : memref<512x128xf32, #tpu.memory_space<vmem>>, vector<108x128xf32>
    %c1_56 = arith.constant 1 : index
    %c0_57 = arith.constant 0 : index
    %c0_58 = arith.constant 0 : index
    %63 = vector.load %arg5[%c1_56, %c0_57, %c0_58] : memref<5x128x128xf32, #tpu.memory_space<vmem>>, vector<1x128x128xf32>
    %64 = vector.shape_cast %63 : vector<1x128x128xf32> to vector<128x128xf32>
    %cst_59 = arith.constant dense<0.000000e+00> : vector<108x128xf32>
    %65 = tpu.matmul %62, %64, %cst_59 {dimension_numbers = #tpu.dot_dimension_numbers<[1], [0], [0], [1], [0, 0, 1, 1], [], []>} : vector<108x128xf32>, vector<128x128xf32>, vector<108x128xf32> -> vector<108x128xf32>
    %66 = arith.addf %61, %65 : vector<108x128xf32>
    %c386 = arith.constant 386 : index
    %c0_60 = arith.constant 0 : index
    %67 = vector.load %arg8[%c386, %c0_60] : memref<512x128xf32, #tpu.memory_space<vmem>>, vector<108x128xf32>
    %c2_61 = arith.constant 2 : index
    %c0_62 = arith.constant 0 : index
    %c0_63 = arith.constant 0 : index
    %68 = vector.load %arg5[%c2_61, %c0_62, %c0_63] : memref<5x128x128xf32, #tpu.memory_space<vmem>>, vector<1x128x128xf32>
    %69 = vector.shape_cast %68 : vector<1x128x128xf32> to vector<128x128xf32>
    %cst_64 = arith.constant dense<0.000000e+00> : vector<108x128xf32>
    %70 = tpu.matmul %67, %69, %cst_64 {dimension_numbers = #tpu.dot_dimension_numbers<[1], [0], [0], [1], [0, 0, 1, 1], [], []>} : vector<108x128xf32>, vector<128x128xf32>, vector<108x128xf32> -> vector<108x128xf32>
    %71 = arith.addf %66, %70 : vector<108x128xf32>
    %c387 = arith.constant 387 : index
    %c0_65 = arith.constant 0 : index
    %72 = vector.load %arg8[%c387, %c0_65] : memref<512x128xf32, #tpu.memory_space<vmem>>, vector<108x128xf32>
    %c3_66 = arith.constant 3 : index
    %c0_67 = arith.constant 0 : index
    %c0_68 = arith.constant 0 : index
    %73 = vector.load %arg5[%c3_66, %c0_67, %c0_68] : memref<5x128x128xf32, #tpu.memory_space<vmem>>, vector<1x128x128xf32>
    %74 = vector.shape_cast %73 : vector<1x128x128xf32> to vector<128x128xf32>
    %cst_69 = arith.constant dense<0.000000e+00> : vector<108x128xf32>
    %75 = tpu.matmul %72, %74, %cst_69 {dimension_numbers = #tpu.dot_dimension_numbers<[1], [0], [0], [1], [0, 0, 1, 1], [], []>} : vector<108x128xf32>, vector<128x128xf32>, vector<108x128xf32> -> vector<108x128xf32>
    %76 = arith.addf %71, %75 : vector<108x128xf32>
    %c388 = arith.constant 388 : index
    %c0_70 = arith.constant 0 : index
    %77 = vector.load %arg8[%c388, %c0_70] : memref<512x128xf32, #tpu.memory_space<vmem>>, vector<108x128xf32>
    %c4_71 = arith.constant 4 : index
    %c0_72 = arith.constant 0 : index
    %c0_73 = arith.constant 0 : index
    %78 = vector.load %arg5[%c4_71, %c0_72, %c0_73] : memref<5x128x128xf32, #tpu.memory_space<vmem>>, vector<1x128x128xf32>
    %79 = vector.shape_cast %78 : vector<1x128x128xf32> to vector<128x128xf32>
    %cst_74 = arith.constant dense<0.000000e+00> : vector<108x128xf32>
    %80 = tpu.matmul %77, %79, %cst_74 {dimension_numbers = #tpu.dot_dimension_numbers<[1], [0], [0], [1], [0, 0, 1, 1], [], []>} : vector<108x128xf32>, vector<128x128xf32>, vector<108x128xf32> -> vector<108x128xf32>
    %81 = arith.addf %76, %80 : vector<108x128xf32>
    %c0_75 = arith.constant 0 : index
    %c0_76 = arith.constant 0 : index
    %82 = vector.load %arg6[%c0_75, %c0_76] : memref<1x128xf32, #tpu.memory_space<vmem>>, vector<1x128xf32>
    %83 = vector.broadcast %82 : vector<1x128xf32> to vector<108x128xf32>
    %84 = arith.addf %81, %83 : vector<108x128xf32>
    %cst_77 = arith.constant 0.000000e+00 : f32
    %85 = vector.broadcast %cst_77 : f32 to vector<108x128xf32>
    %86 = arith.maximumf %84, %85 : vector<108x128xf32>
    %87 = vector.shape_cast %86 : vector<108x128xf32> to vector<27x4x128xf32>
    %cst_78 = arith.constant dense<0xFF800000> : vector<27x128xf32>
    %88 = vector.multi_reduction <maximumf>, %87, %cst_78 [1] : vector<27x4x128xf32> to vector<27x128xf32>
    %c0_79 = arith.constant 0 : index
    %c96 = arith.constant 96 : index
    %c0_80 = arith.constant 0 : index
    %89 = vector.load %arg7[%c0_79, %c96, %c0_80] : memref<1x123x128xf32, #tpu.memory_space<vmem>>, vector<1x27x128xf32>
    %90 = vector.shape_cast %89 : vector<1x27x128xf32> to vector<27x128xf32>
    %91 = vector.shape_cast %88 : vector<27x128xf32> to vector<1x27x128xf32>
    tpu.vector_store %arg7[%c0_79, %c96, %c0_80], %91 {strides = array<i32>} : memref<1x123x128xf32, #tpu.memory_space<vmem>>, vector<1x27x128xf32>,
    return
  }
  func.func @transform_0(%arg0: i32) -> (i32, i32, i32) {
    %c0_i32 = arith.constant 0 : i32
    %c0_i32_0 = arith.constant 0 : i32
    %c0_i32_1 = arith.constant 0 : i32
    return %arg0, %c0_i32, %c0_i32_0 : i32, i32, i32
  }
  func.func @transform_1(%arg0: i32) -> (i32, i32, i32) {
    %c0_i32 = arith.constant 0 : i32
    %c0_i32_0 = arith.constant 0 : i32
    %c0_i32_1 = arith.constant 0 : i32
    return %arg0, %c0_i32, %c0_i32_0 : i32, i32, i32
  }
  func.func @transform_2(%arg0: i32) -> (i32, i32, i32) {
    %c0_i32 = arith.constant 0 : i32
    %c0_i32_0 = arith.constant 0 : i32
    %c0_i32_1 = arith.constant 0 : i32
    %c0_i32_2 = arith.constant 0 : i32
    return %c0_i32, %c0_i32_0, %c0_i32_1 : i32, i32, i32
  }
  func.func @transform_3(%arg0: i32) -> (i32, i32) {
    %c0_i32 = arith.constant 0 : i32
    %c0_i32_0 = arith.constant 0 : i32
    %c0_i32_1 = arith.constant 0 : i32
    return %c0_i32, %c0_i32_0 : i32, i32
  }
  func.func @transform_4(%arg0: i32) -> (i32, i32, i32) {
    %c0_i32 = arith.constant 0 : i32
    %c0_i32_0 = arith.constant 0 : i32
    %c0_i32_1 = arith.constant 0 : i32
    %c0_i32_2 = arith.constant 0 : i32
    return %c0_i32, %c0_i32_0, %c0_i32_1 : i32, i32, i32
  }
  func.func @transform_5(%arg0: i32) -> (i32, i32) {
    %c0_i32 = arith.constant 0 : i32
    %c0_i32_0 = arith.constant 0 : i32
    %c0_i32_1 = arith.constant 0 : i32
    return %c0_i32, %c0_i32_0 : i32, i32
  }
  func.func @transform_6(%arg0: i32) -> (i32, i32, i32) {
    %c0_i32 = arith.constant 0 : i32
    %c0_i32_0 = arith.constant 0 : i32
    %c0_i32_1 = arith.constant 0 : i32
    return %arg0, %c0_i32, %c0_i32_0 : i32, i32, i32
  }
}

</mosaic_0001>

<bundles_post_ra>
// kernel: tpu_custom_call.1
= control target key start
LH: loop header
LB: loop body
LE: loop exit
PB: predicated region body
PF: predicated region fallthrough
CT: control target
= control target key end

     0   :  { %s7808_s21 = smov 0   ;;  %s9605_s0 = inlined_call_operand.vmem [shape: f32[1,2000,4], index: 0, kind: input, shape index: {}]   ;;  %s9606_s1 = inlined_call_operand.vmem [shape: f32[1,2000,4], index: 1, kind: input, shape index: {}]   ;;  %s9607_s2 = inlined_call_operand.vmem [shape: f32[5,4,128], index: 2, kind: input, shape index: {}]   ;;  %s9608_s3 = inlined_call_operand.vmem [shape: f32[1,128], index: 3, kind: input, shape index: {}]   ;;  %s9609_s4 = inlined_call_operand.vmem [shape: f32[5,128,128], index: 4, kind: input, shape index: {}]   ;;  %s9610_s5 = inlined_call_operand.vmem [shape: f32[1,128], index: 5, kind: input, shape index: {}]   ;;  %s9611_s6 = inlined_call_operand.vmem [shape: f32[1,123,128], index: 6, kind: output, shape index: {}]  }
   0x1 LB: > { %v5499_v0 = vld [vmem:[%s9607_s2 + $0x4] sm:$0xf]  ;;  %vm184_vm0 = vcmask 1043456   ;;  %v7819_v1 = vld [vmem:[%s9607_s2 + $0x8] sm:$0xf]  ;;  %s5463_s30 = sshll.u32 %s7767_s21, 7  ;;  %s7767_s21 = sphi %s7808_s21, %s28_s21  }
   0x2   : > { %6401 = vmatprep.subr.msk.mxu1 %vm184_vm0, %v5499_v0  ;;  %6453 = vmatprep.subr.msk.mxu0 %vm184_vm0, %v7819_v1  ;;  %v81_v2 = vld [vmem:[%s9607_s2] sm:$0xf]  ;;  %v5620_v3 = vld [vmem:[%s9607_s2 + $0xc] sm:$0xf]  ;;  %s7837_s9 = scalar_lea.vmem %s9605_s0, %s5463_s30  ;;  %s7842_s12 = scalar_lea.vmem %s9606_s1, %s5463_s30  ;;  %vm135_vm1 = vcmask 31744   ;;  %vm1667_vm2 = vcmask 1041409  }
   0x3   : > { %6402 = vmatpush3.msk.msra.mxu1 %vm184_vm0, %v5499_v0  ;;  %6454 = vmatpush3.msk.msra.mxu0 %vm184_vm0, %v7819_v1  ;;  %v5466_v4 = vld [vmem:[%s7837_s9 + $0x1] sm:$0xff]  ;;  %v5467_v9 = vld [vmem:[%s7837_s9 + $0x9] sm:$0xff]  ;;  %v5468_v15 = vld [vmem:[%s7837_s9 + $0x11] sm:$0xff]  ;;  %vm1669_vm3 = vcmask 1042434   ;;  %vm1671_vm4 = vcmask 1043459   ;;  %vm1673_vm5 = vcmask 1044484  }
   0x4   : > { %6427 = vmatprep.subr.msk.mxu1 %vm184_vm0, %v81_v2  ;;  %6479 = vmatprep.subr.msk.mxu0 %vm184_vm0, %v5620_v3  ;;  %v5483_v5 = vld [vmem:[%s7842_s12 + $0x1] sm:$0xff]  ;;  %v5484_v10 = vld [vmem:[%s7842_s12 + $0x9] sm:$0xff]  ;;  %v5485_v18 = vld [vmem:[%s7842_s12 + $0x11] sm:$0xff]  ;;  %vm1675_vm6 = vcmask 1045509   ;;  %vm1677_vm7 = vcmask 1046534   ;;  %vm1679_vm8 = vcmask 1047559  }
   0x5   : > { %v5535_v6 = vld [vmem:[%s7837_s9 + $0x2] sm:$0xff]  ;;  %v117_v7 = vmul.f32 %v5483_v5, %v5466_v4  ;;  %v118_v12 = vmul.f32 %v5484_v10, %v5467_v9  ;;  %v5536_v13 = vld [vmem:[%s7837_s9 + $0xa] sm:$0xff]  ;;  %v5537_v19 = vld [vmem:[%s7837_s9 + $0x12] sm:$0xff]  ;;  %v119_v21 = vmul.f32 %v5485_v18, %v5468_v15  ;;  %s5464_s17 = sshll.u32 %s7767_s21, 5  ;;  %s28_s21 = sadd.s32 1, %s7767_s21  }
   0x6   : > { %v5552_v8 = vld [vmem:[%s7842_s12 + $0x2] sm:$0xff]  ;;  %v5553_v14 = vld [vmem:[%s7842_s12 + $0xa] sm:$0xff]  ;;  %v5554_v20 = vld [vmem:[%s7842_s12 + $0x12] sm:$0xff]  ;;  %s8212_s18 = scalar_lea.vmem [#allocation2], %s5464_s17  ;;  %p25_p0 = scmp.ge.s32.totalorder %s28_s21, 15  }
   0x7   : > { %v564_v11 = vmul.f32 %v5552_v8, %v5535_v6  ;;  %v7858_v16 = vld [vmem:[%s9607_s2 + $0x10] sm:$0xf]  ;;  %6403 = vmatprep.mubr.msk.f32.mxu1 %vm135_vm1, %v117_v7  ;;  %v565_v17 = vmul.f32 %v5553_v14, %v5536_v13  ;;  %v566_v22 = vmul.f32 %v5554_v20, %v5537_v19  ;;  %v5469_v23 = vld [vmem:[%s7837_s9 + $0x19] sm:$0xff]  ;;  %v5470_v28 = vld [vmem:[%s7837_s9 + $0x21] sm:$0xff] }
   0x8   : > { %6404 = vmatmul.mubr.msk.f32.vlgmr.msra.gmra.mrb[0].mxu1 %vm135_vm1, %v118_v12  ;;  %v5486_v24 = vld [vmem:[%s7842_s12 + $0x19] sm:$0xff]  ;;  %v5487_v29 = vld [vmem:[%s7842_s12 + $0x21] sm:$0xff]  ;;  %v5471_v34 = vld [vmem:[%s7837_s9 + $0x29] sm:$0xff] }
   0x9   : > { %6455 = vmatprep.mubr.msk.f32.mxu0 %vm135_vm1, %v564_v11  ;;  %v5538_v25 = vld [vmem:[%s7837_s9 + $0x1a] sm:$0xff]  ;;  %6428 = vmatpush3.msk.msra.mxu1 %vm184_vm0, %v81_v2  ;;  %v120_v26 = vmul.f32 %v5486_v24, %v5469_v23  ;;  %v121_v31 = vmul.f32 %v5487_v29, %v5470_v28  ;;  %v5539_v32 = vld [vmem:[%s7837_s9 + $0x22] sm:$0xff]  ;;  %v5540_v37 = vld [vmem:[%s7837_s9 + $0x2a] sm:$0xff] }
   0xa   : > { %6456 = vmatmul.mubr.msk.f32.vlgmr.msra.gmra.mrb[0].mxu0 %vm135_vm1, %v565_v17  ;;  %v5555_v27 = vld [vmem:[%s7842_s12 + $0x1a] sm:$0xff]  ;;  %6406 = vmatprep.mubr.msk.f32.mxu1 %vm135_vm1, %v119_v21  ;;  %v5556_v33 = vld [vmem:[%s7842_s12 + $0x22] sm:$0xff]  ;;  %v5557_v38 = vld [vmem:[%s7842_s12 + $0x2a] sm:$0xff] }
   0xb   : > { %6480 = vmatpush3.msk.msra.mxu0 %vm184_vm0, %v5620_v3  ;;  %v567_v30 = vmul.f32 %v5555_v27, %v5538_v25  ;;  %6458 = vmatprep.mubr.msk.f32.mxu0 %vm135_vm1, %v566_v22  ;;  %v568_v35 = vmul.f32 %v5556_v33, %v5539_v32  ;;  %v5488_v36 = vld [vmem:[%s7842_s12 + $0x29] sm:$0xff]  ;;  %v5472_v40 = vld [vmem:[%s7837_s9 + $0x31] sm:$0xff]  ;;  %v569_v43 = vmul.f32 %v5557_v38, %v5540_v37  ;;  %v5473_v46 = vld [vmem:[%s7837_s9 + $0x39] sm:$0xff] }
   0xc   : > { %6505 = vmatprep.subr.msk.mxu0 %vm184_vm0, %v7858_v16  ;;  %6407 = vmatmul.mubr.msk.f32.gmra.mrb[2].mxu1 %vm135_vm1, %v120_v26  ;;  %v122_v39 = vmul.f32 %v5488_v36, %v5471_v34  ;;  %v5489_v41 = vld [vmem:[%s7842_s12 + $0x31] sm:$0xff]  ;;  %v5490_v47 = vld [vmem:[%s7842_s12 + $0x39] sm:$0xff]  ;;  %v5474_v51 = vld [vmem:[%s7837_s9 + $0x41] sm:$0xff] }
   0xd   : > { %v5541_v42 = vld [vmem:[%s7837_s9 + $0x32] sm:$0xff]  ;;  %7481 = vmatprep.subr.msk.mxu1 %vm184_vm0, %v7819_v1  ;;  %6409 = vmatprep.mubr.msk.f32.mxu1 %vm135_vm1, %v121_v31  ;;  %v123_v44 = vmul.f32 %v5489_v41, %v5472_v40  ;;  %v5542_v49 = vld [vmem:[%s7837_s9 + $0x3a] sm:$0xff]  ;;  %v5587_v53 = vld [vmem:[%s7837_s9 + $0x3] sm:$0xff]  ;;  %v124_v55 = vmul.f32 %v5490_v47, %v5473_v46 }
   0xe   : > { %6459 = vmatmul.mubr.msk.f32.gmra.mrb[2].mxu0 %vm135_vm1, %v567_v30  ;;  %v5558_v45 = vld [vmem:[%s7842_s12 + $0x32] sm:$0xff]  ;;  %v5559_v50 = vld [vmem:[%s7842_s12 + $0x3a] sm:$0xff]  ;;  %v5604_v54 = vld [vmem:[%s7842_s12 + $0x3] sm:$0xff] }
   0xf   : > { %6461 = vmatprep.mubr.msk.f32.mxu0 %vm135_vm1, %v568_v35  ;;  %v570_v48 = vmul.f32 %v5558_v45, %v5541_v42  ;;  %v5491_v52 = vld [vmem:[%s7842_s12 + $0x41] sm:$0xff]  ;;  %v571_v56 = vmul.f32 %v5559_v50, %v5542_v49  ;;  %v5475_v58 = vld [vmem:[%s7837_s9 + $0x49] sm:$0xff]  ;;  %v829_v61 = vmul.f32 %v5604_v54, %v5587_v53  ;;  %v5476_v63 = vld [vmem:[%s7837_s9 + $0x51] sm:$0xff] }
  0x10   : > { %6410 = vmatmul.mubr.msk.f32.gmra.mrb[4].mxu1 %vm135_vm1, %v122_v39  ;;  %v125_v57 = vmul.f32 %v5491_v52, %v5474_v51  ;;  %v5492_v59 = vld [vmem:[%s7842_s12 + $0x49] sm:$0xff]  ;;  %v5493_v0 = vld [vmem:[%s7842_s12 + $0x51] sm:$0xff]  ;;  %v5477_v7 = vld [vmem:[%s7837_s9 + $0x59] sm:$0xff] }
  0x11   : > { %6412 = vmatprep.mubr.msk.f32.mxu1 %vm135_vm1, %v123_v44  ;;  %v5588_v60 = vld [vmem:[%s7837_s9 + $0xb] sm:$0xff]  ;;  %v5589_v2 = vld [vmem:[%s7837_s9 + $0x13] sm:$0xff]  ;;  %v126_v4 = vmul.f32 %v5492_v59, %v5475_v58  ;;  %v127_v6 = vmul.f32 %v5493_v0, %v5476_v63  ;;  %v5590_v9 = vld [vmem:[%s7837_s9 + $0x1b] sm:$0xff] }
  0x12   : > { %6462 = vmatmul.mubr.msk.f32.gmra.mrb[4].mxu0 %vm135_vm1, %v569_v43  ;;  %v5605_v62 = vld [vmem:[%s7842_s12 + $0xb] sm:$0xff]  ;;  %v5606_v3 = vld [vmem:[%s7842_s12 + $0x13] sm:$0xff]  ;;  %v5607_v11 = vld [vmem:[%s7842_s12 + $0x1b] sm:$0xff] }
  0x13   : > { %6464 = vmatprep.mubr.msk.f32.mxu0 %vm135_vm1, %v570_v48  ;;  %v830_v5 = vmul.f32 %v5605_v62, %v5588_v60  ;;  %v5494_v8 = vld [vmem:[%s7842_s12 + $0x59] sm:$0xff]  ;;  %v831_v10 = vmul.f32 %v5606_v3, %v5589_v2  ;;  %v5478_v12 = vld [vmem:[%s7837_s9 + $0x61] sm:$0xff]  ;;  %v832_v18 = vmul.f32 %v5607_v11, %v5590_v9  ;;  %v5479_v20 = vld [vmem:[%s7837_s9 + $0x69] sm:$0xff] }
  0x14   : > { %6413 = vmatmul.mubr.msk.f32.gmra.mrb[6].mxu1 %vm135_vm1, %v124_v55  ;;  %v5495_v13 = vld [vmem:[%s7842_s12 + $0x61] sm:$0xff]  ;;  %v128_v17 = vmul.f32 %v5494_v8, %v5477_v7  ;;  %v5496_v21 = vld [vmem:[%s7842_s12 + $0x69] sm:$0xff]  ;;  %v5480_v25 = vld [vmem:[%s7837_s9 + $0x71] sm:$0xff] }
  0x15   : > { %6415 = vmatprep.mubr.msk.f32.mxu1 %vm135_vm1, %v125_v57  ;;  %v5591_v14 = vld [vmem:[%s7837_s9 + $0x23] sm:$0xff]  ;;  %v129_v19 = vmul.f32 %v5495_v13, %v5478_v12  ;;  %v5592_v22 = vld [vmem:[%s7837_s9 + $0x2b] sm:$0xff]  ;;  %v5593_v27 = vld [vmem:[%s7837_s9 + $0x33] sm:$0xff]  ;;  %v130_v29 = vmul.f32 %v5496_v21, %v5479_v20 }
  0x16   : > { %6465 = vmatmul.mubr.msk.f32.gmra.mrb[6].mxu0 %vm135_vm1, %v571_v56  ;;  %v5608_v15 = vld [vmem:[%s7842_s12 + $0x23] sm:$0xff]  ;;  %v5609_v24 = vld [vmem:[%s7842_s12 + $0x2b] sm:$0xff]  ;;  %v5610_v28 = vld [vmem:[%s7842_s12 + $0x33] sm:$0xff] }
  0x17   : > { %6481 = vmatprep.mubr.msk.f32.mxu0 %vm135_vm1, %v829_v61  ;;  %v833_v23 = vmul.f32 %v5608_v15, %v5591_v14  ;;  %v5497_v26 = vld [vmem:[%s7842_s12 + $0x71] sm:$0xff]  ;;  %v5481_v31 = vld [vmem:[%s7837_s9 + $0x79] sm:$0xff]  ;;  %v835_v34 = vmul.f32 %v5610_v28, %v5593_v27  ;;  %v5595_v38 = vld [vmem:[%s7837_s9 + $0x43] sm:$0xff] }
  0x18   : > { %6416 = vmatmul.mubr.msk.f32.gmra.mrb[8].mxu1 %vm135_vm1, %v126_v4  ;;  %v131_v30 = vmul.f32 %v5497_v26, %v5480_v25  ;;  %v5498_v32 = vld [vmem:[%s7842_s12 + $0x79] sm:$0xff]  ;;  %v5612_v39 = vld [vmem:[%s7842_s12 + $0x43] sm:$0xff]  ;;  %v5596_v46 = vld [vmem:[%s7837_s9 + $0x4b] sm:$0xff] }
  0x19   : > { %6418 = vmatprep.mubr.msk.f32.mxu1 %vm135_vm1, %v127_v6  ;;  %v5594_v33 = vld [vmem:[%s7837_s9 + $0x3b] sm:$0xff]  ;;  %v132_v40 = vmul.f32 %v5498_v32, %v5481_v31  ;;  %v33_v43 = vld [vmem:[%s7837_s9 + $0x8] sm:$0xff]  ;;  %v837_v45 = vmul.f32 %v5612_v39, %v5595_v38  ;;  %v34_v48 = vld [vmem:[%s7837_s9 + $0x10] sm:$0xff] }
  0x1a   : > { %6482 = vmatmul.mubr.msk.f32.vlgmr.msra.gmra.mrb[0].mxu0 %vm135_vm1, %v830_v5  ;;  %v5611_v35 = vld [vmem:[%s7842_s12 + $0x3b] sm:$0xff]  ;;  %v50_v44 = vld [vmem:[%s7842_s12 + $0x8] sm:$0xff]  ;;  %v51_v49 = vld [vmem:[%s7842_s12 + $0x10] sm:$0xff] }
  0x1b   : > { %6506 = vmatpush3.msk.msra.mxu0 %vm184_vm0, %v7858_v16  ;;  %6484 = vmatprep.mubr.msk.f32.mxu0 %vm135_vm1, %v831_v10  ;;  %v834_v16 = vmul.f32 %v5609_v24, %v5592_v22  ;;  %v32_v36 = vld [vmem:[%s7837_s9] sm:$0xff]  ;;  %v836_v41 = vmul.f32 %v5611_v35, %v5594_v33  ;;  %v5613_v47 = vld [vmem:[%s7842_s12 + $0x4b] sm:$0xff]  ;;  %v5597_v50 = vld [vmem:[%s7837_s9 + $0x53] sm:$0xff]  ;;  %v66_v52 = vmul.f32 %v50_v44, %v33_v43 }
  0x1c   : > { %6419 = vmatmul.mubr.msk.f32.gmra.mrb[10].mxu1 %vm135_vm1, %v128_v17  ;;  %v49_v37 = vld [vmem:[%s7842_s12] sm:$0xff]  ;;  %v5614_v51 = vld [vmem:[%s7842_s12 + $0x53] sm:$0xff]  ;;  %v838_v53 = vmul.f32 %v5613_v47, %v5596_v46  ;;  %v67_v57 = vmul.f32 %v51_v49, %v34_v48  ;;  %v37_v4 = vld [vmem:[%s7837_s9 + $0x28] sm:$0xff] }
  0x1d   : > { %6421 = vmatprep.mubr.msk.f32.mxu1 %vm135_vm1, %v129_v19  ;;  %v65_v42 = vmul.f32 %v49_v37, %v32_v36  ;;  %v35_v54 = vld [vmem:[%s7837_s9 + $0x18] sm:$0xff]  ;;  %v839_v58 = vmul.f32 %v5614_v51, %v5597_v50  ;;  %v36_v60 = vld [vmem:[%s7837_s9 + $0x20] sm:$0xff]  ;;  %v54_v5 = vld [vmem:[%s7842_s12 + $0x28] sm:$0xff] }
  0x1e   : > { %6485 = vmatmul.mubr.msk.f32.gmra.mrb[2].mxu0 %vm135_vm1, %v832_v18  ;;  %v52_v55 = vld [vmem:[%s7842_s12 + $0x18] sm:$0xff]  ;;  %v53_v61 = vld [vmem:[%s7842_s12 + $0x20] sm:$0xff]  ;;  %v5600_v6 = vld [vmem:[%s7837_s9 + $0x6b] sm:$0xff]  ;;  %v70_v12 = vmul.f32 %v54_v5, %v37_v4 }
  0x1f   : > { %6487 = vmatprep.mubr.msk.f32.mxu0 %vm135_vm1, %v833_v23  ;;  %v5598_v56 = vld [vmem:[%s7837_s9 + $0x5b] sm:$0xff]  ;;  %v5599_v62 = vld [vmem:[%s7837_s9 + $0x63] sm:$0xff]  ;;  %v68_v0 = vmul.f32 %v52_v55, %v35_v54  ;;  %v69_v3 = vmul.f32 %v53_v61, %v36_v60  ;;  %v5617_v8 = vld [vmem:[%s7842_s12 + $0x6b] sm:$0xff] }
  0x20   : > { %6422 = vmatmul.mubr.msk.f32.gmra.mrb[12].mxu1 %vm135_vm1, %v130_v29  ;;  %v5615_v59 = vld [vmem:[%s7842_s12 + $0x5b] sm:$0xff]  ;;  %v5616_v63 = vld [vmem:[%s7842_s12 + $0x63] sm:$0xff]  ;;  %v38_v9 = vld [vmem:[%s7837_s9 + $0x30] sm:$0xff]  ;;  %v842_v14 = vmul.f32 %v5617_v8, %v5600_v6 }
  0x21   : > { %6424 = vmatprep.mubr.msk.f32.mxu1 %vm135_vm1, %v131_v30  ;;  %v840_v2 = vmul.f32 %v5615_v59, %v5598_v56  ;;  %v841_v7 = vmul.f32 %v5616_v63, %v5599_v62  ;;  %v5601_v10 = vld [vmem:[%s7837_s9 + $0x73] sm:$0xff]  ;;  %v5602_v18 = vld [vmem:[%s7837_s9 + $0x7b] sm:$0xff]  ;;  %v5639_v23 = vld [vmem:[%s7837_s9 + $0x4] sm:$0xff] }
  0x22   : > { %6488 = vmatmul.mubr.msk.f32.gmra.mrb[4].mxu0 %vm135_vm1, %v834_v16  ;;  %v5618_v11 = vld [vmem:[%s7842_s12 + $0x73] sm:$0xff]  ;;  %v5619_v19 = vld [vmem:[%s7842_s12 + $0x7b] sm:$0xff]  ;;  %v5656_v24 = vld [vmem:[%s7842_s12 + $0x4] sm:$0xff] }
  0x23   : > { %6490 = vmatprep.mubr.msk.f32.mxu0 %vm135_vm1, %v835_v34  ;;  %v39_v13 = vld [vmem:[%s7837_s9 + $0x38] sm:$0xff]  ;;  %v843_v20 = vmul.f32 %v5618_v11, %v5601_v10  ;;  %v40_v21 = vld [vmem:[%s7837_s9 + $0x40] sm:$0xff]  ;;  %v41_v25 = vld [vmem:[%s7837_s9 + $0x48] sm:$0xff]  ;;  %v844_v34 = vmul.f32 %v5619_v19, %v5602_v18 }
  0x24   : > { %6425 = vmatmul.mubr.msk.f32.gmra.mrb[14].mxu1 %vm135_vm1, %v132_v40  ;;  %v56_v17 = vld [vmem:[%s7842_s12 + $0x38] sm:$0xff]  ;;  %v57_v22 = vld [vmem:[%s7842_s12 + $0x40] sm:$0xff]  ;;  %v58_v26 = vld [vmem:[%s7842_s12 + $0x48] sm:$0xff] }
  0x25   : > { %6429 = vmatprep.mubr.msk.f32.mxu1 %vm135_vm1, %v65_v42  ;;  %v72_v27 = vmul.f32 %v56_v17, %v39_v13  ;;  %v5640_v28 = vld [vmem:[%s7837_s9 + $0xc] sm:$0xff]  ;;  %v73_v35 = vmul.f32 %v57_v22, %v40_v21  ;;  %v5641_v36 = vld [vmem:[%s7837_s9 + $0x14] sm:$0xff]  ;;  %v1094_v42 = vmul.f32 %v5656_v24, %v5639_v23  ;;  %v74_v54 = vmul.f32 %v58_v26, %v41_v25  ;;  %v5642_v55 = vld [vmem:[%s7837_s9 + $0x1c] sm:$0xff] }
  0x26   : > { %6491 = vmatmul.mubr.msk.f32.gmra.mrb[6].mxu0 %vm135_vm1, %v836_v41  ;;  %v5657_v29 = vld [vmem:[%s7842_s12 + $0xc] sm:$0xff]  ;;  %v5658_v37 = vld [vmem:[%s7842_s12 + $0x14] sm:$0xff]  ;;  %v5659_v56 = vld [vmem:[%s7842_s12 + $0x1c] sm:$0xff] }
  0x27   : > { %6493 = vmatprep.mubr.msk.f32.mxu0 %vm135_vm1, %v837_v45  ;;  %v42_v16 = vld [vmem:[%s7837_s9 + $0x50] sm:$0xff]  ;;  %v5546_v47 = vld [vmem:[%s7837_s9 + $0x5a] sm:$0xff]  ;;  %v5547_v61 = vld [vmem:[%s7837_s9 + $0x62] sm:$0xff]  ;;  %v1097_v26 = vmul.f32 %v5659_v56, %v5642_v55 }
  0x28   : > { %6430 = vmatmul.mubr.msk.f32.vlgmr.msra.gmra.mrb[0].mxu1 %vm135_vm1, %v66_v52  ;;  %v59_v30 = vld [vmem:[%s7842_s12 + $0x50] sm:$0xff]  ;;  %v43_v48 = vld [vmem:[%s7837_s9 + $0x58] sm:$0xff]  ;;  %v5564_v62 = vld [vmem:[%s7842_s12 + $0x62] sm:$0xff] }
  0x29   : > { %7482 = vmatpush3.msk.msra.mxu1 %vm184_vm0, %v7819_v1  ;;  %6432 = vmatprep.mubr.msk.f32.mxu1 %vm135_vm1, %v67_v57  ;;  %v55_v1 = vld [vmem:[%s7842_s12 + $0x30] sm:$0xff]  ;;  %v60_v49 = vld [vmem:[%s7842_s12 + $0x58] sm:$0xff]  ;;  %v44_v57 = vld [vmem:[%s7837_s9 + $0x60] sm:$0xff]  ;;  %v8053_v5 = vmul.f32 %v5564_v62, %v5547_v61 }
  0x2a   : > { %6494 = vmatmul.mubr.msk.f32.gmra.mrb[8].mxu0 %vm135_vm1, %v838_v53  ;;  %v71_v15 = vmul.f32 %v55_v1, %v38_v9  ;;  %v5544_v31 = vld [vmem:[%s7837_s9 + $0x4a] sm:$0xff]  ;;  %v5545_v40 = vld [vmem:[%s7837_s9 + $0x52] sm:$0xff]  ;;  %v5563_v51 = vld [vmem:[%s7842_s12 + $0x5a] sm:$0xff]  ;;  %v1096_v9 = vmul.f32 %v5658_v37, %v5641_v36 }
  0x2b   : > { %6496 = vmatprep.mubr.msk.f32.mxu0 %vm135_vm1, %v839_v58  ;;  %v5561_v32 = vld [vmem:[%s7842_s12 + $0x4a] sm:$0xff]  ;;  %v5562_v41 = vld [vmem:[%s7842_s12 + $0x52] sm:$0xff]  ;;  %v5650_v52 = vld [vmem:[%s7837_s9 + $0x5c] sm:$0xff]  ;;  %v8042_v59 = vmul.f32 %v5563_v51, %v5546_v47 }
  0x2c   : > { %6433 = vmatmul.mubr.msk.f32.gmra.mrb[2].mxu1 %vm135_vm1, %v68_v0  ;;  %v5648_v33 = vld [vmem:[%s7837_s9 + $0x4c] sm:$0xff]  ;;  %v8017_v38 = vmul.f32 %v5561_v32, %v5544_v31  ;;  %v8025_v44 = vmul.f32 %v5562_v41, %v5545_v40  ;;  %v5649_v45 = vld [vmem:[%s7837_s9 + $0x54] sm:$0xff]  ;;  %v5667_v53 = vld [vmem:[%s7842_s12 + $0x5c] sm:$0xff]  ;;  %v1095_v0 = vmul.f32 %v5657_v29, %v5640_v28 }
  0x2d   : > { %6435 = vmatprep.mubr.msk.f32.mxu1 %vm135_vm1, %v69_v3  ;;  %v5665_v39 = vld [vmem:[%s7842_s12 + $0x4c] sm:$0xff]  ;;  %v5666_v46 = vld [vmem:[%s7842_s12 + $0x54] sm:$0xff]  ;;  %v61_v58 = vld [vmem:[%s7842_s12 + $0x60] sm:$0xff]  ;;  %v8044_v60 = vmul.f32 %v5667_v53, %v5650_v52 }
  0x2e   : > { %6497 = vmatmul.mubr.msk.f32.gmra.mrb[10].mxu0 %vm135_vm1, %v840_v2  ;;  %v8023_v43 = vmul.f32 %v5665_v39, %v5648_v33  ;;  %v8032_v50 = vmul.f32 %v5666_v46, %v5649_v45  ;;  %v5651_v63 = vld [vmem:[%s7837_s9 + $0x64] sm:$0xff]  ;;  %v75_v2 = vmul.f32 %v59_v30, %v42_v16  ;;  %v5652_v11 = vld [vmem:[%s7837_s9 + $0x6c] sm:$0xff]  ;;  %v5653_v18 = vld [vmem:[%s7837_s9 + $0x74] sm:$0xff] }
  0x2f   : > { %6499 = vmatprep.mubr.msk.f32.mxu0 %vm135_vm1, %v841_v7  ;;  %v5643_v3 = vld [vmem:[%s7837_s9 + $0x24] sm:$0xff]  ;;  %v5549_v13 = vld [vmem:[%s7837_s9 + $0x72] sm:$0xff]  ;;  %v5550_v23 = vld [vmem:[%s7837_s9 + $0x7a] sm:$0xff] }
  0x30   : > { %6436 = vmatmul.mubr.msk.f32.gmra.mrb[4].mxu1 %vm135_vm1, %v70_v12  ;;  %v5660_v4 = vld [vmem:[%s7842_s12 + $0x24] sm:$0xff]  ;;  %v5669_v12 = vld [vmem:[%s7842_s12 + $0x6c] sm:$0xff]  ;;  %v5670_v19 = vld [vmem:[%s7842_s12 + $0x74] sm:$0xff] }
  0x31   : > { %6438 = vmatprep.mubr.msk.f32.mxu1 %vm135_vm1, %v71_v15  ;;  %v5668_v6 = vld [vmem:[%s7842_s12 + $0x64] sm:$0xff]  ;;  %v8067_v15 = vmul.f32 %v5669_v12, %v5652_v11  ;;  %v5566_v17 = vld [vmem:[%s7842_s12 + $0x72] sm:$0xff]  ;;  %v1108_v22 = vmul.f32 %v5670_v19, %v5653_v18  ;;  %v5567_v24 = vld [vmem:[%s7842_s12 + $0x7a] sm:$0xff]  ;;  %v1098_v31 = vmul.f32 %v5660_v4, %v5643_v3 }
  0x32   : > { %6500 = vmatmul.mubr.msk.f32.gmra.mrb[12].mxu0 %vm135_vm1, %v842_v14  ;;  %v5548_v7 = vld [vmem:[%s7837_s9 + $0x6a] sm:$0xff]  ;;  %v8059_v1 = vmul.f32 %v5668_v6, %v5651_v63  ;;  %v578_v21 = vmul.f32 %v5566_v17, %v5549_v13  ;;  %v5654_v25 = vld [vmem:[%s7837_s9 + $0x7c] sm:$0xff]  ;;  %v579_v16 = vmul.f32 %v5567_v24, %v5550_v23  ;;  %v5645_v36 = vld [vmem:[%s7837_s9 + $0x34] sm:$0xff] }
  0x33   : > { %6502 = vmatprep.mubr.msk.f32.mxu0 %vm135_vm1, %v843_v20  ;;  %v5565_v8 = vld [vmem:[%s7842_s12 + $0x6a] sm:$0xff]  ;;  %v76_v20 = vmul.f32 %v60_v49, %v43_v48  ;;  %v5671_v30 = vld [vmem:[%s7842_s12 + $0x7c] sm:$0xff]  ;;  %v5662_v37 = vld [vmem:[%s7842_s12 + $0x34] sm:$0xff] }
  0x34   : > { %6439 = vmatmul.mubr.msk.f32.gmra.mrb[6].mxu1 %vm135_vm1, %v72_v27  ;;  %v8061_v10 = vmul.f32 %v5565_v8, %v5548_v7  ;;  %v45_v14 = vld [vmem:[%s7837_s9 + $0x68] sm:$0xff]  ;;  %v77_v27 = vmul.f32 %v61_v58, %v44_v57  ;;  %v46_v33 = vld [vmem:[%s7837_s9 + $0x70] sm:$0xff]  ;;  %v64_v45 = vld [vmem:[%s7842_s12 + $0x78] sm:$0xff]  ;;  %v1100_v47 = vmul.f32 %v5662_v37, %v5645_v36 }
  0x35   : > { %6441 = vmatprep.mubr.msk.f32.mxu1 %vm135_vm1, %v73_v35  ;;  %v62_v28 = vld [vmem:[%s7842_s12 + $0x68] sm:$0xff]  ;;  %v1109_v35 = vmul.f32 %v5671_v30, %v5654_v25  ;;  %v5646_v46 = vld [vmem:[%s7837_s9 + $0x3c] sm:$0xff] }
  0x36   : > { %6503 = vmatmul.mubr.msk.f32.gmra.mrb[14].mxu0 %vm135_vm1, %v844_v34  ;;  %v5644_v29 = vld [vmem:[%s7837_s9 + $0x2c] sm:$0xff]  ;;  %v78_v39 = vmul.f32 %v62_v28, %v45_v14  ;;  %v5663_v48 = vld [vmem:[%s7842_s12 + $0x3c] sm:$0xff]  ;;  %v5647_v52 = vld [vmem:[%s7837_s9 + $0x44] sm:$0xff] }
  0x37   : > { %6507 = vmatprep.mubr.msk.f32.mxu0 %vm135_vm1, %v1094_v42  ;;  %v5661_v32 = vld [vmem:[%s7842_s12 + $0x2c] sm:$0xff]  ;;  %v47_v42 = vld [vmem:[%s7837_s9 + $0x78] sm:$0xff]  ;;  %v5543_v49 = vld [vmem:[%s7837_s9 + $0x42] sm:$0xff]  ;;  %v1101_v55 = vmul.f32 %v5663_v48, %v5646_v46 }
  0x38   : > { %6442 = vmatmul.mubr.msk.f32.gmra.mrb[8].mxu1 %vm135_vm1, %v74_v54  ;;  %v63_v34 = vld [vmem:[%s7842_s12 + $0x70] sm:$0xff]  ;;  %v1099_v40 = vmul.f32 %v5661_v32, %v5644_v29  ;;  %v5560_v51 = vld [vmem:[%s7842_s12 + $0x42] sm:$0xff]  ;;  %v80_v54 = vmul.f32 %v64_v45, %v47_v42  ;;  %v8140_v63 = vld [vmem:[%s9608_s3] ss:$0 sm:$0xff] }
  0x39   : > { %6444 = vmatprep.mubr.msk.f32.mxu1 %vm135_vm1, %v75_v2  ;;  %v79_v41 = vmul.f32 %v63_v34, %v46_v33  ;;  %v5664_v53 = vld [vmem:[%s7842_s12 + $0x44] sm:$0xff]  ;;  %v572_v56 = vmul.f32 %v5560_v51, %v5543_v49 }
  0x3a   : > { %6508 = vmatmul.mubr.msk.f32.vlgmr.msra.gmra.mrb[0].mxu0 %vm135_vm1, %v1095_v0  ;;  %v1102_v57 = vmul.f32 %v5664_v53, %v5647_v52 }
  0x3b   : > { %6510 = vmatprep.mubr.msk.f32.mxu0 %vm135_vm1, %v1096_v9 }
  0x3c   : > { %6445 = vmatmul.mubr.msk.f32.gmra.mrb[10].mxu1 %vm135_vm1, %v76_v20 }
  0x3d   : > { %6447 = vmatprep.mubr.msk.f32.mxu1 %vm135_vm1, %v77_v27 }
  0x3e   : > { %6511 = vmatmul.mubr.msk.f32.gmra.mrb[2].mxu0 %vm135_vm1, %v1097_v26 }
  0x3f   : > { %6513 = vmatprep.mubr.msk.f32.mxu0 %vm135_vm1, %v1098_v31 }
  0x40   : > { %6448 = vmatmul.mubr.msk.f32.gmra.mrb[12].mxu1 %vm135_vm1, %v78_v39 }
  0x41   : > { %6450 = vmatprep.mubr.msk.f32.mxu1 %vm135_vm1, %v79_v41 }
  0x42   : > { %6514 = vmatmul.mubr.msk.f32.gmra.mrb[4].mxu0 %vm135_vm1, %v1099_v40 }
  0x43   : > { %6516 = vmatprep.mubr.msk.f32.mxu0 %vm135_vm1, %v1100_v47 }
  0x44   : > { %6451 = vmatmul.mubr.msk.f32.gmra.mrb[14].mxu1 %vm135_vm1, %v80_v54 }
  0x45   : > { %6467 = vmatprep.mubr.msk.f32.mxu1 %vm135_vm1, %v572_v56 }
  0x46   : > { %6517 = vmatmul.mubr.msk.f32.gmra.mrb[6].mxu0 %vm135_vm1, %v1101_v55 }
  0x47   : > { %6519 = vmatprep.mubr.msk.f32.mxu0 %vm135_vm1, %v1102_v57 }
  0x48   : > { %6468 = vmatmul.mubr.msk.f32.vlgmr.msra.gmra.mrb[8].mxu1 %vm135_vm1, %v8017_v38 }
  0x49   : > { %6470 = vmatprep.mubr.msk.f32.mxu1 %vm135_vm1, %v8025_v44 }
  0x4a   : > { %6520 = vmatmul.mubr.msk.f32.gmra.mrb[8].mxu0 %vm135_vm1, %v8023_v43 }
  0x4b   : > { %6522 = vmatprep.mubr.msk.f32.mxu0 %vm135_vm1, %v8032_v50 }
  0x4c   : > { %6471 = vmatmul.mubr.msk.f32.gmra.mrb[10].mxu1 %vm135_vm1, %v8042_v59 }
  0x4d   : > { %6473 = vmatprep.mubr.msk.f32.mxu1 %vm135_vm1, %v8053_v5 }
  0x4e   : > { %6523 = vmatmul.mubr.msk.f32.gmra.mrb[10].mxu0 %vm135_vm1, %v8044_v60 }
  0x4f   : > { %6525 = vmatprep.mubr.msk.f32.mxu0 %vm135_vm1, %v8059_v1 }
  0x50   : > { %6474 = vmatmul.mubr.msk.f32.gmra.mrb[12].mxu1 %vm135_vm1, %v8061_v10 }
  0x51   : > { %6476 = vmatprep.mubr.msk.f32.mxu1 %vm135_vm1, %v578_v21 }
  0x52   : > { %6526 = vmatmul.mubr.msk.f32.gmra.mrb[12].mxu0 %vm135_vm1, %v8067_v15 }
  0x53   : > { %6528 = vmatprep.mubr.msk.f32.mxu0 %vm135_vm1, %v1108_v22 }
  0x54   : > { %6477 = vmatmul.mubr.msk.f32.gmra.mrb[14].mxu1 %vm135_vm1, %v579_v16 }
  0x56   : > { %6529 = vmatmul.mubr.msk.f32.gmra.mrb[14].mxu0 %vm135_vm1, %v1109_v35 }
  0xfb   : > { %v6431_v38 = vpop.f32.mrb[0].mxu1 }
  0xfc   : > { %v450_v43 = vpop.f32.mrb[1].mxu1 }
  0xff   : > { %v6434_v44 = vpop.f32.mrb[2].mxu1 }
 0x100   : > { %v460_v50 = vpop.f32.mrb[3].mxu1 }
 0x103   : > { %v6437_v58 = vpop.f32.mrb[4].mxu1 }
 0x104   : > { %v8131_v59 = vpop.f32.mrb[5].mxu1 }
 0x107   : > { %v8133_v60 = vpop.f32.mrb[6].mxu1 }
 0x108   : > { %v8135_v61 = vpop.f32.mrb[7].mxu1 }
 0x10d   : > { %v6509_v62 = vpop.f32.mrb[0].mxu0 }
 0x10e   : > { %v7483_v0 = vadd.f32 %v6509_v62, %v6431_v38  ;;  %v1229_v2 = vpop.f32.mrb[1].mxu0 }
 0x10f   : > { %v7484_v3 = vadd.f32 %v1229_v2, %v450_v43 }
 0x110   : > { %v1332_v4 = vadd.f32 %v7483_v0, %v8140_v63 }
 0x111   : > { %v1331_v5 = vadd.f32 %v7484_v3, %v8140_v63  ;;  %v6512_v6 = vpop.f32.mrb[2].mxu0 }
 0x112   : > { %v1348_v7 = vmax.f32 %v1332_v4, 0.0  ;;  %v7485_v8 = vadd.f32 %v6512_v6, %v6434_v44  ;;  %v1239_v9 = vpop.f32.mrb[3].mxu0 }
 0x113   : > { %v1347_v1 = vmax.f32 %v1331_v5, 0.0  ;;  %v7486_v10 = vadd.f32 %v1239_v9, %v460_v50 }
 0x114   : > { %v1380_v11 = vcombine.high %v1348_v7, %v1348_v7  ;;  %v1425_v12 = vsel %vm184_vm0, %v1348_v7, -inf  ;;  %v1334_v13 = vadd.f32 %v7485_v8, %v8140_v63 }
 0x115   : > { %v1426_v14 = vrot.slane %v1425_v12, 4  ;;  %v1379_v15 = vcombine.high %v1347_v1, %v1347_v1  ;;  %v1411_v17 = vsel %vm184_vm0, %v1347_v1, -inf  ;;  %v1333_v18 = vadd.f32 %v7486_v10, %v8140_v63  ;;  %v6515_v19 = vpop.f32.mrb[4].mxu0 }
 0x116   : > { %v1432_v20 = vsel %vm184_vm0, %v1380_v11, -inf  ;;  %v1412_v21 = vrot.slane %v1411_v17, 4  ;;  %v1350_v22 = vmax.f32 %v1334_v13, 0.0  ;;  %v7487_v23 = vadd.f32 %v6515_v19, %v6437_v58  ;;  %v8149_v24 = vpop.f32.mrb[5].mxu0 }
 0x117   : > { %v1427_v25 = vmax.f32 %v1425_v12, %v1426_v14  ;;  %v1433_v26 = vrot.slane %v1432_v20, 4  ;;  %v1418_v27 = vsel %vm184_vm0, %v1379_v15, -inf  ;;  %v1349_v28 = vmax.f32 %v1333_v18, 0.0 }
 0x118   : > { %v1413_v29 = vmax.f32 %v1411_v17, %v1412_v21  ;;  %v1419_v16 = vrot.slane %v1418_v27, 4  ;;  %v1382_v30 = vcombine.high %v1350_v22, %v1350_v22  ;;  %v1453_v31 = vsel %vm184_vm0, %v1350_v22, -inf }
 0x119   : > { %v1428_v32 = vrot.slane %v1427_v25, 2  ;;  %v1434_v33 = vmax.f32 %v1432_v20, %v1433_v26  ;;  %v1454_v34 = vrot.slane %v1453_v31, 4  ;;  %v1381_v35 = vcombine.high %v1349_v28, %v1349_v28  ;;  %v6518_v36 = vpop.f32.mrb[6].mxu0 }
 0x11a   : > { %v1414_v37 = vrot.slane %v1413_v29, 2  ;;  %v1420_v39 = vmax.f32 %v1418_v27, %v1419_v16  ;;  %v1460_v40 = vsel %vm184_vm0, %v1382_v30, -inf  ;;  %v1439_v41 = vsel %vm184_vm0, %v1349_v28, -inf  ;;  %v8155_v42 = vpop.f32.mrb[7].mxu0 }
 0x11b   : > { %v1429_v45 = vmax.f32 %v1427_v25, %v1428_v32  ;;  %v1435_v46 = vrot.slane %v1434_v33, 2  ;;  %v1455_v47 = vmax.f32 %v1453_v31, %v1454_v34  ;;  %v1461_v48 = vrot.slane %v1460_v40, 4  ;;  %v8158_v54 = vpop.f32.mrb[8].mxu1 }
 0x11c   : > { %v1415_v49 = vmax.f32 %v1413_v29, %v1414_v37  ;;  %v1421_v51 = vrot.slane %v1420_v39, 2  ;;  %v1440_v52 = vrot.slane %v1439_v41, 4  ;;  %v1446_v53 = vsel %vm184_vm0, %v1381_v35, -inf  ;;  %v8162_v44 = vpop.f32.mrb[9].mxu1 }
 0x11d   : > { %v1430_v55 = vrot.slane %v1429_v45, 1  ;;  %v1436_v56 = vmax.f32 %v1434_v33, %v1435_v46  ;;  %v1456_v57 = vrot.slane %v1455_v47, 2  ;;  %v1462_v38 = vmax.f32 %v1460_v40, %v1461_v48  ;;  %v8160_v43 = vpop.f32.mrb[8].mxu0 }
 0x11e   : > { %v1416_v50 = vrot.slane %v1415_v49, 1  ;;  %v1422_v58 = vmax.f32 %v1420_v39, %v1421_v51  ;;  %v1441_v62 = vmax.f32 %v1439_v41, %v1440_v52  ;;  %v1447_v0 = vrot.slane %v1446_v53, 4  ;;  %v8164_v2 = vpop.f32.mrb[9].mxu0 }
 0x11f   : > { %v1431_v3 = vmax.f32 %v1429_v45, %v1430_v55  ;;  %v1437_v4 = vrot.slane %v1436_v56, 1  ;;  %v1457_v5 = vmax.f32 %v1455_v47, %v1456_v57  ;;  %v1463_v6 = vrot.slane %v1462_v38, 2  ;;  %v8166_v10 = vpop.f32.mrb[10].mxu1 }
 0x120   : > { %v1417_v7 = vmax.f32 %v1415_v49, %v1416_v50  ;;  %v1423_v8 = vrot.slane %v1422_v58, 1  ;;  %v1442_v9 = vrot.slane %v1441_v62, 2  ;;  %v1448_v1 = vmax.f32 %v1446_v53, %v1447_v0  ;;  %v8171_v17 = vpop.f32.mrb[11].mxu1 }
 0x121   : > { %v1438_v11 = vmax.f32 %v1436_v56, %v1437_v4  ;;  %v1458_v12 = vrot.slane %v1457_v5, 1  ;;  %v1464_v13 = vmax.f32 %v1462_v38, %v1463_v6  ;;  %v1336_v14 = vadd.f32 %v7487_v23, %v8140_v63  ;;  %v8169_v15 = vpop.f32.mrb[10].mxu0 }
 0x122   : > { %v1424_v18 = vmax.f32 %v1422_v58, %v1423_v8  ;;  %v1443_v19 = vmax.f32 %v1441_v62, %v1442_v9  ;;  %v1449_v20 = vrot.slane %v1448_v1, 2  ;;  %v7488_v21 = vadd.f32 %v8149_v24, %v8131_v59  ;;  %v8175_v22 = vpop.f32.mrb[11].mxu0 }
 0x123   : > { %v1459_v25 = vmax.f32 %v1457_v5, %v1458_v12  ;;  %v1465_v26 = vrot.slane %v1464_v13, 1  ;;  %v1352_v27 = vmax.f32 %v1336_v14, 0.0  ;;  %v7489_v28 = vadd.f32 %v6518_v36, %v8133_v60  ;;  %v8180_v31 = vpop.f32.mrb[12].mxu1 }
 0x124   : > { %v1668_v29 = vsel %vm1667_vm2, %v1424_v18, %v1417_v7  ;;  %v1444_v23 = vrot.slane %v1443_v19, 1  ;;  %v1450_v16 = vmax.f32 %v1448_v1, %v1449_v20  ;;  %v1335_v30 = vadd.f32 %v7488_v21, %v8140_v63  ;;  %v8186_v35 = vpop.f32.mrb[13].mxu1 }
 0x125   : > { %v1670_v32 = vsel %vm1669_vm3, %v1431_v3, %v1668_v29  ;;  %v1466_v33 = vmax.f32 %v1464_v13, %v1465_v26  ;;  %v1384_v59 = vcombine.high %v1352_v27, %v1352_v27  ;;  %v1481_v24 = vsel %vm184_vm0, %v1352_v27, -inf  ;;  %v8184_v34 = vpop.f32.mrb[12].mxu0 }
 0x126   : > { %v1445_v60 = vmax.f32 %v1443_v19, %v1444_v23  ;;  %v1451_v36 = vrot.slane %v1450_v16, 1  ;;  %v1672_v37 = vsel %vm1671_vm4, %v1438_v11, %v1670_v32  ;;  %v1482_v39 = vrot.slane %v1481_v24, 4  ;;  %v8189_v40 = vpop.f32.mrb[13].mxu0 }
 0x127   : > { %v1488_v41 = vsel %vm184_vm0, %v1384_v59, -inf  ;;  %v1351_v45 = vmax.f32 %v1335_v30, 0.0  ;;  %v1338_v46 = vadd.f32 %v7489_v28, %v8140_v63  ;;  %v7490_v47 = vadd.f32 %v8155_v42, %v8135_v61  ;;  %v8197_v53 = vpop.f32.mrb[14].mxu1 }
 0x128   : > { %v1452_v48 = vmax.f32 %v1450_v16, %v1451_v36  ;;  %v1674_v49 = vsel %vm1673_vm5, %v1445_v60, %v1672_v37  ;;  %v1483_v51 = vmax.f32 %v1481_v24, %v1482_v39  ;;  %v1489_v52 = vrot.slane %v1488_v41, 4  ;;  %v8203_v58 = vpop.f32.mrb[15].mxu1 }
 0x129   : > { %v1383_v55 = vcombine.high %v1351_v45, %v1351_v45  ;;  %v1467_v56 = vsel %vm184_vm0, %v1351_v45, -inf  ;;  %v1354_v57 = vmax.f32 %v1338_v46, 0.0  ;;  %v1337_v38 = vadd.f32 %v7490_v47, %v8140_v63  ;;  %v8201_v50 = vpop.f32.mrb[14].mxu0 }
 0x12a   : > { %v1676_v62 = vsel %vm1675_vm6, %v1452_v48, %v1674_v49  ;;  %v1484_v61 = vrot.slane %v1483_v51, 2  ;;  %v1490_v42 = vmax.f32 %v1488_v41, %v1489_v52  ;;  %v1468_v0 = vrot.slane %v1467_v56, 4  ;;  %v8206_v3 = vpop.f32.mrb[15].mxu0 }
 0x12b   : > { %v1678_v4 = vsel %vm1677_vm7, %v1459_v25, %v1676_v62  ;;  %v1474_v5 = vsel %vm184_vm0, %v1383_v55, -inf  ;;  %v1386_v6 = vcombine.high %v1354_v57, %v1354_v57  ;;  %v1509_v7 = vsel %vm184_vm0, %v1354_v57, -inf }
 0x12c   : > { %v1680_v8 = vsel %vm1679_vm8, %v1466_v33, %v1678_v4  ;;  %v1485_v9 = vmax.f32 %v1483_v51, %v1484_v61  ;;  %v1491_v1 = vrot.slane %v1490_v42, 2  ;;  %v1469_v11 = vmax.f32 %v1467_v56, %v1468_v0 }
 0x12d   : > { %1707 = vst [vmem:[%s8212_s18] sm:$0xff] %v1680_v8  ;;  %v1475_v12 = vrot.slane %v1474_v5, 4  ;;  %v1510_v13 = vrot.slane %v1509_v7, 4  ;;  %v1516_v14 = vsel %vm184_vm0, %v1386_v6, -inf  ;;  %v1353_v18 = vmax.f32 %v1337_v38, 0.0 }
 0x12e   : > { %v1486_v19 = vrot.slane %v1485_v9, 1  ;;  %v1492_v20 = vmax.f32 %v1490_v42, %v1491_v1  ;;  %v1470_v21 = vrot.slane %v1469_v11, 2  ;;  %v1517_v25 = vrot.slane %v1516_v14, 4 }
 0x12f   : > { %v1476_v26 = vmax.f32 %v1474_v5, %v1475_v12  ;;  %v1511_v27 = vmax.f32 %v1509_v7, %v1510_v13  ;;  %v1385_v28 = vcombine.high %v1353_v18, %v1353_v18  ;;  %v1495_v29 = vsel %vm184_vm0, %v1353_v18, -inf }
 0x130   : > { %v1487_v23 = vmax.f32 %v1485_v9, %v1486_v19  ;;  %v1493_v16 = vrot.slane %v1492_v20, 1  ;;  %v1471_v30 = vmax.f32 %v1469_v11, %v1470_v21  ;;  %v1518_v32 = vmax.f32 %v1516_v14, %v1517_v25 }
 0x131   : > { %v1477_v33 = vrot.slane %v1476_v26, 2  ;;  %v1512_v59 = vrot.slane %v1511_v27, 2  ;;  %v1496_v24 = vrot.slane %v1495_v29, 4  ;;  %v1502_v60 = vsel %vm184_vm0, %v1385_v28, -inf }
 0x132   : > { %v1494_v36 = vmax.f32 %v1492_v20, %v1493_v16  ;;  %v1472_v37 = vrot.slane %v1471_v30, 1  ;;  %v1519_v39 = vrot.slane %v1518_v32, 2  ;;  %v1503_v41 = vrot.slane %v1502_v60, 4 }
 0x133   : > { %v1478_v45 = vmax.f32 %v1476_v26, %v1477_v33  ;;  %v1513_v46 = vmax.f32 %v1511_v27, %v1512_v59  ;;  %v1497_v47 = vmax.f32 %v1495_v29, %v1496_v24  ;;  %v7491_v48 = vadd.f32 %v8160_v43, %v8158_v54 }
 0x134   : > { %v1473_v49 = vmax.f32 %v1471_v30, %v1472_v37  ;;  %v1520_v51 = vmax.f32 %v1518_v32, %v1519_v39  ;;  %v1504_v52 = vmax.f32 %v1502_v60, %v1503_v41  ;;  %v7492_v55 = vadd.f32 %v8164_v2, %v8162_v44 }
 0x135   : > { %v1479_v56 = vrot.slane %v1478_v45, 1  ;;  %v1514_v57 = vrot.slane %v1513_v46, 1  ;;  %v1498_v38 = vrot.slane %v1497_v47, 2  ;;  %v1340_v62 = vadd.f32 %v7491_v48, %v8140_v63 }
 0x136   : > { %v1521_v61 = vrot.slane %v1520_v51, 1  ;;  %v1505_v42 = vrot.slane %v1504_v52, 2  ;;  %v1339_v0 = vadd.f32 %v7492_v55, %v8140_v63  ;;  %v7493_v4 = vadd.f32 %v8169_v15, %v8166_v10 }
 0x137   : > { %v1480_v5 = vmax.f32 %v1478_v45, %v1479_v56  ;;  %v1515_v54 = vmax.f32 %v1513_v46, %v1514_v57  ;;  %v1499_v43 = vmax.f32 %v1497_v47, %v1498_v38  ;;  %v1356_v6 = vmax.f32 %v1340_v62, 0.0 }
 0x138   : > { %v1522_v7 = vmax.f32 %v1520_v51, %v1521_v61  ;;  %v1506_v8 = vmax.f32 %v1504_v52, %v1505_v42  ;;  %v1355_v9 = vmax.f32 %v1339_v0, 0.0  ;;  %v1342_v44 = vadd.f32 %v7493_v4, %v8140_v63 }
 0x139   : > { %v1681_v2 = vsel %vm1667_vm2, %v1480_v5, %v1473_v49  ;;  %v1500_v1 = vrot.slane %v1499_v43, 1  ;;  %v1388_v11 = vcombine.high %v1356_v6, %v1356_v6  ;;  %v1537_v12 = vsel %vm184_vm0, %v1356_v6, -inf }
 0x13a   : > { %v1682_v13 = vsel %vm1669_vm3, %v1487_v23, %v1681_v2  ;;  %v1507_v14 = vrot.slane %v1506_v8, 1  ;;  %v1538_v18 = vrot.slane %v1537_v12, 4  ;;  %v1387_v10 = vcombine.high %v1355_v9, %v1355_v9 }
 0x13b   : > { %v1501_v15 = vmax.f32 %v1499_v43, %v1500_v1  ;;  %v1683_v19 = vsel %vm1671_vm4, %v1494_v36, %v1682_v13  ;;  %v1544_v20 = vsel %vm184_vm0, %v1388_v11, -inf  ;;  %v1523_v21 = vsel %vm184_vm0, %v1355_v9, -inf }
 0x13c   : > { %v1508_v25 = vmax.f32 %v1506_v8, %v1507_v14  ;;  %v1539_v26 = vmax.f32 %v1537_v12, %v1538_v18  ;;  %v1545_v27 = vrot.slane %v1544_v20, 4  ;;  %v1524_v28 = vrot.slane %v1523_v21, 4 }
 0x13d   : > { %v1684_v29 = vsel %vm1673_vm5, %v1501_v15, %v1683_v19  ;;  %v1530_v16 = vsel %vm184_vm0, %v1387_v10, -inf  ;;  %v1358_v23 = vmax.f32 %v1342_v44, 0.0  ;;  %v7494_v30 = vadd.f32 %v8175_v22, %v8171_v17 }
 0x13e   : > { %v1685_v32 = vsel %vm1675_vm6, %v1508_v25, %v1684_v29  ;;  %v1540_v33 = vrot.slane %v1539_v26, 2  ;;  %v1546_v59 = vmax.f32 %v1544_v20, %v1545_v27  ;;  %v1525_v24 = vmax.f32 %v1523_v21, %v1524_v28 }
 0x13f   : > { %v1686_v60 = vsel %vm1677_vm7, %v1515_v54, %v1685_v32  ;;  %v1531_v36 = vrot.slane %v1530_v16, 4  ;;  %v1390_v37 = vcombine.high %v1358_v23, %v1358_v23  ;;  %v1565_v39 = vsel %vm184_vm0, %v1358_v23, -inf }
 0x140   : > { %v1687_v41 = vsel %vm1679_vm8, %v1522_v7, %v1686_v60  ;;  %v1541_v45 = vmax.f32 %v1539_v26, %v1540_v33  ;;  %v1547_v46 = vrot.slane %v1546_v59, 2  ;;  %v1526_v47 = vrot.slane %v1525_v24, 2 }
 0x141   : > { %1708 = vst [vmem:[%s8212_s18 + $0x8] sm:$0xff] %v1687_v41  ;;  %v1532_v48 = vmax.f32 %v1530_v16, %v1531_v36  ;;  %v1566_v49 = vrot.slane %v1565_v39, 4  ;;  %v1572_v17 = vsel %vm184_vm0, %v1390_v37, -inf  ;;  %v1341_v22 = vadd.f32 %v7494_v30, %v8140_v63 }
 0x142   : > { %v1542_v51 = vrot.slane %v1541_v45, 1  ;;  %v1548_v52 = vmax.f32 %v1546_v59, %v1547_v46  ;;  %v1527_v55 = vmax.f32 %v1525_v24, %v1526_v47  ;;  %v1573_v56 = vrot.slane %v1572_v17, 4 }
 0x143   : > { %v1533_v57 = vrot.slane %v1532_v48, 2  ;;  %v1567_v38 = vmax.f32 %v1565_v39, %v1566_v49  ;;  %v1357_v62 = vmax.f32 %v1341_v22, 0.0  ;;  %v7495_v61 = vadd.f32 %v8184_v34, %v8180_v31 }
 0x144   : > { %v1528_v42 = vrot.slane %v1527_v55, 1  ;;  %v1574_v0 = vmax.f32 %v1572_v17, %v1573_v56  ;;  %v1543_v6 = vmax.f32 %v1541_v45, %v1542_v51  ;;  %v1549_v7 = vrot.slane %v1548_v52, 1 }
 0x145   : > { %v1534_v4 = vmax.f32 %v1532_v48, %v1533_v57  ;;  %v1568_v5 = vrot.slane %v1567_v38, 2  ;;  %v1389_v54 = vcombine.high %v1357_v62, %v1357_v62  ;;  %v1551_v43 = vsel %vm184_vm0, %v1357_v62, -inf }
 0x146   : > { %v1575_v8 = vrot.slane %v1574_v0, 2  ;;  %v1552_v9 = vrot.slane %v1551_v43, 4  ;;  %v1344_v11 = vadd.f32 %v7495_v61, %v8140_v63  ;;  %v7496_v34 = vadd.f32 %v8189_v40, %v8186_v35 }
 0x147   : > { %v1535_v44 = vrot.slane %v1534_v4, 1  ;;  %v1569_v2 = vmax.f32 %v1567_v38, %v1568_v5  ;;  %v1558_v1 = vsel %vm184_vm0, %v1389_v54, -inf  ;;  %v1529_v14 = vmax.f32 %v1527_v55, %v1528_v42 }
 0x148   : > { %v1576_v12 = vmax.f32 %v1574_v0, %v1575_v8  ;;  %v1553_v13 = vmax.f32 %v1551_v43, %v1552_v9  ;;  %v1559_v31 = vrot.slane %v1558_v1, 4  ;;  %v1360_v10 = vmax.f32 %v1344_v11, 0.0 }
 0x149   : > { %v1536_v18 = vmax.f32 %v1534_v4, %v1535_v44  ;;  %v7497_v15 = vadd.f32 %v8201_v50, %v8197_v53  ;;  %v1550_v19 = vmax.f32 %v1548_v52, %v1549_v7  ;;  %v1343_v25 = vadd.f32 %v7496_v34, %v8140_v63 }
 0x14a   : > { %v1554_v20 = vrot.slane %v1553_v13, 2  ;;  %v1560_v21 = vmax.f32 %v1558_v1, %v1559_v31  ;;  %v1570_v27 = vrot.slane %v1569_v2, 1  ;;  %v1392_v28 = vcombine.high %v1360_v10, %v1360_v10 }
 0x14b   : > { %v1688_v26 = vsel %vm1667_vm2, %v1536_v18, %v1529_v14  ;;  %v1593_v29 = vsel %vm184_vm0, %v1360_v10, -inf  ;;  %v1577_v35 = vrot.slane %v1576_v12, 1  ;;  %v1359_v50 = vmax.f32 %v1343_v25, 0.0 }
 0x14c   : > { %v1689_v16 = vsel %vm1669_vm3, %v1543_v6, %v1688_v26  ;;  %v1555_v40 = vmax.f32 %v1553_v13, %v1554_v20  ;;  %v1561_v23 = vrot.slane %v1560_v21, 2  ;;  %v1594_v32 = vrot.slane %v1593_v29, 4 }
 0x14d   : > { %v1690_v30 = vsel %vm1671_vm4, %v1550_v19, %v1689_v16  ;;  %v1600_v53 = vsel %vm184_vm0, %v1392_v28, -inf  ;;  %v1346_v60 = vadd.f32 %v7497_v15, %v8140_v63  ;;  %v1391_v37 = vcombine.high %v1359_v50, %v1359_v50 }
 0x14e   : > { %v1556_v33 = vrot.slane %v1555_v40, 1  ;;  %v1562_v59 = vmax.f32 %v1560_v21, %v1561_v23  ;;  %v1601_v24 = vrot.slane %v1600_v53, 4  ;;  %v1595_v36 = vmax.f32 %v1593_v29, %v1594_v32 }
 0x14f   : > { %v1579_v39 = vsel %vm184_vm0, %v1359_v50, -inf  ;;  %v7498_v41 = vadd.f32 %v8206_v3, %v8203_v58  ;;  %v1571_v49 = vmax.f32 %v1569_v2, %v1570_v27  ;;  %v1586_v22 = vsel %vm184_vm0, %v1391_v37, -inf }
 0x150   : > { %v1557_v45 = vmax.f32 %v1555_v40, %v1556_v33  ;;  %v1563_v46 = vrot.slane %v1562_v59, 1  ;;  %v1602_v47 = vmax.f32 %v1600_v53, %v1601_v24  ;;  %v1580_v48 = vrot.slane %v1579_v39, 4 }
 0x151   : > { %v1596_v17 = vrot.slane %v1595_v36, 2  ;;  %v1362_v51 = vmax.f32 %v1346_v60, 0.0  ;;  %v1587_v38 = vrot.slane %v1586_v22, 4  ;;  %v1345_v58 = vadd.f32 %v7498_v41, %v8140_v63 }
 0x152   : > { %v1564_v52 = vmax.f32 %v1562_v59, %v1563_v46  ;;  %v1691_v55 = vsel %vm1673_vm5, %v1557_v45, %v1690_v30  ;;  %v1603_v56 = vrot.slane %v1602_v47, 2  ;;  %v1581_v57 = vmax.f32 %v1579_v39, %v1580_v48 }
 0x153   : > { %v1394_v62 = vcombine.high %v1362_v51, %v1362_v51  ;;  %v1621_v61 = vsel %vm184_vm0, %v1362_v51, -inf  ;;  %v1578_v3 = vmax.f32 %v1576_v12, %v1577_v35  ;;  %v1588_v54 = vmax.f32 %v1586_v22, %v1587_v38  ;;  %v8288_v51 = vld [vmem:[%s9607_s2 + $0x8] sm:$0xf] (%p25_p0) }
 0x154   : > { %v1692_v42 = vsel %vm1675_vm6, %v1564_v52, %v1691_v55  ;;  %v1582_v0 = vrot.slane %v1581_v57, 2  ;;  %v1622_v4 = vrot.slane %v1621_v61, 4  ;;  %v1597_v7 = vmax.f32 %v1595_v36, %v1596_v17  ;;  %v5691_v52 = vld [vmem:[%s9607_s2 + $0x4] sm:$0xf] (%p25_p0)  ;;  %6565 = vmatprep.subr.msk.mxu0 (%p25_p0), %vm184_vm0, %v8288_v51 }
 0x155   : > { %v1693_v5 = vsel %vm1677_vm7, %v1571_v49, %v1692_v42  ;;  %v1628_v43 = vsel %vm184_vm0, %v1394_v62, -inf  ;;  %v1604_v8 = vmax.f32 %v1602_v47, %v1603_v56  ;;  %v1589_v44 = vrot.slane %v1588_v54, 2  ;;  %v1742_v55 = vld [vmem:[%s9605_s0 + $0x781] sm:$0xff] (%p25_p0)  ;;  %6531 = vmatprep.subr.msk.mxu1 (%p25_p0), %vm184_vm0, %v5691_v52  ;;  %6566 = vmatpush3.msk.msra.mxu0 (%p25_p0), %vm184_vm0, %v8288_v51  ;;  %v1753_v42 = vld [vmem:[%s9606_s1 + $0x789] sm:$0xff] (%p25_p0) }
 0x156   : > { %v1694_v6 = vsel %vm1679_vm8, %v1578_v3, %v1693_v5  ;;  %v1583_v9 = vmax.f32 %v1581_v57, %v1582_v0  ;;  %v1623_v2 = vmax.f32 %v1621_v61, %v1622_v4  ;;  %v1629_v1 = vrot.slane %v1628_v43, 4  ;;  %v1752_v56 = vld [vmem:[%s9606_s1 + $0x781] sm:$0xff] (%p25_p0)  ;;  %6532 = vmatpush3.msk.msra.mxu1 (%p25_p0), %vm184_vm0, %v5691_v52  ;;  %v1743_v3 = vld [vmem:[%s9605_s0 + $0x789] sm:$0xff] (%p25_p0) }
 0x157   : > { %1709 = vst [vmem:[%s8212_s18 + $0x10] sm:$0xff] %v1694_v6  ;;  %v1361_v63 = vmax.f32 %v1345_v58, 0.0  ;;  %v1590_v12 = vmax.f32 %v1588_v54, %v1589_v44  ;;  %v1598_v14 = vrot.slane %v1597_v7, 1  ;;  %v1605_v10 = vrot.slane %v1604_v8, 1  ;;  %v2072_v57 = vld [vmem:[%s9605_s0 + $0x782] sm:$0xff] (%p25_p0)  ;;  %v2073_v4 = vld [vmem:[%s9605_s0 + $0x78a] sm:$0xff] (%p25_p0) }
 0x158   : > { %v1584_v11 = vrot.slane %v1583_v9, 1  ;;  %v1630_v13 = vmax.f32 %v1628_v43, %v1629_v1  ;;  %v1624_v19 = vrot.slane %v1623_v2, 2  ;;  %v2082_v38 = vld [vmem:[%s9606_s1 + $0x782] sm:$0xff] (%p25_p0)  ;;  %v1762_v62 = vmul.f32 (%p25_p0), %v1752_v56, %v1742_v55  ;;  %v5726_v58 = vld [vmem:[%s9607_s2 + $0xc] sm:$0xf] (%p25_p0)  ;;  %v1744_v54 = vld [vmem:[%s9605_s0 + $0x791] sm:$0xff] (%p25_p0) }
 0x159   : > { %v1393_v31 = vcombine.high %v1361_v63, %v1361_v63  ;;  %v1607_v34 = vsel %vm184_vm0, %v1361_v63, -inf  ;;  %v1591_v15 = vrot.slane %v1590_v12, 1  ;;  %v1599_v29 = vmax.f32 %v1597_v7, %v1598_v14  ;;  %6582 = vmatprep.subr.msk.mxu0 (%p25_p0), %vm184_vm0, %v5726_v58  ;;  %v2083_v5 = vld [vmem:[%s9606_s1 + $0x78a] sm:$0xff] (%p25_p0)  ;;  %v1741_v7 = vld [vmem:[%s9607_s2] sm:$0xf] (%p25_p0)  ;;  %v2084_v44 = vld [vmem:[%s9606_s1 + $0x792] sm:$0xff] (%p25_p0) }
 0x15a   : > { %v1608_v18 = vrot.slane %v1607_v34, 4  ;;  %v1631_v21 = vrot.slane %v1630_v13, 2  ;;  %v1585_v27 = vmax.f32 %v1583_v9, %v1584_v11  ;;  %v1606_v40 = vmax.f32 %v1604_v8, %v1605_v10  ;;  %6533 = vmatprep.mubr.msk.f32.mxu1 (%p25_p0), %vm135_vm1, %v1762_v62  ;;  %v1754_v6 = vld [vmem:[%s9606_s1 + $0x791] sm:$0xff] (%p25_p0)  ;;  %6548 = vmatprep.subr.msk.mxu1 (%p25_p0), %vm184_vm0, %v1741_v7  ;;  %v1755_v1 = vld [vmem:[%s9606_s1 + $0x799] sm:$0xff] (%p25_p0)  ;;  %v1756_v14 = vld [vmem:[%s9606_s1 + $0x7a1] sm:$0xff] (%p25_p0) }
 0x15b   : > { %v1614_v20 = vsel %vm184_vm0, %v1393_v31, -inf  ;;  %v1592_v28 = vmax.f32 %v1590_v12, %v1591_v15  ;;  %v1625_v30 = vmax.f32 %v1623_v2, %v1624_v19  ;;  %v2092_v61 = vmul.f32 (%p25_p0), %v2082_v38, %v2072_v57  ;;  %v2074_v8 = vld [vmem:[%s9605_s0 + $0x792] sm:$0xff] (%p25_p0)  ;;  %v2075_v12 = vld [vmem:[%s9605_s0 + $0x79a] sm:$0xff] (%p25_p0)  ;;  %v2086_v10 = vld [vmem:[%s9606_s1 + $0x7a2] sm:$0xff] (%p25_p0) }
 0x15c   : > { %v1609_v25 = vmax.f32 %v1607_v34, %v1608_v18  ;;  %v1615_v26 = vrot.slane %v1614_v20, 4  ;;  %v1632_v53 = vmax.f32 %v1630_v13, %v1631_v21  ;;  %v1763_v0 = vmul.f32 (%p25_p0), %v1753_v42, %v1743_v3  ;;  %v1745_v2 = vld [vmem:[%s9605_s0 + $0x799] sm:$0xff] (%p25_p0)  ;;  %v1746_v31 = vld [vmem:[%s9605_s0 + $0x7a1] sm:$0xff] (%p25_p0)  ;;  %v1757_v21 = vld [vmem:[%s9606_s1 + $0x7a9] sm:$0xff] (%p25_p0) }
 0x15d   : > { %v1695_v23 = vsel %vm1667_vm2, %v1592_v28, %v1585_v27  ;;  %v1626_v36 = vrot.slane %v1625_v30, 1  ;;  %6567 = vmatprep.mubr.msk.f32.mxu0 (%p25_p0), %vm135_vm1, %v2092_v61  ;;  %v2093_v43 = vmul.f32 (%p25_p0), %v2083_v5, %v2073_v4  ;;  %v1764_v9 = vmul.f32 (%p25_p0), %v1754_v6, %v1744_v54  ;;  %v2085_v13 = vld [vmem:[%s9606_s1 + $0x79a] sm:$0xff] (%p25_p0)  ;;  %v2076_v18 = vld [vmem:[%s9605_s0 + $0x7a2] sm:$0xff] (%p25_p0)  ;;  %v2087_v27 = vld [vmem:[%s9606_s1 + $0x7aa] sm:$0xff] (%p25_p0) }
 0x15e   : > { %v1610_v16 = vrot.slane %v1609_v25, 2  ;;  %v1616_v35 = vmax.f32 %v1614_v20, %v1615_v26  ;;  %v1696_v32 = vsel %vm1669_vm3, %v1599_v29, %v1695_v23  ;;  %v1633_v37 = vrot.slane %v1632_v53, 1  ;;  %6534 = vmatmul.mubr.msk.f32.vlgmr.msra.gmra.mrb[0].mxu1 (%p25_p0), %vm135_vm1, %v1763_v0  ;;  %v1747_v20 = vld [vmem:[%s9605_s0 + $0x7a9] sm:$0xff] (%p25_p0)  ;;  %v1748_v28 = vld [vmem:[%s9605_s0 + $0x7b1] sm:$0xff] (%p25_p0)  ;;  %v1721_v52 = vld [vmem:[%s9606_s1 + $0x780] sm:$0xff] (%p25_p0) }
 0x15f   : > { %v1697_v59 = vsel %vm1671_vm4, %v1606_v40, %v1696_v32  ;;  %v1627_v47 = vmax.f32 %v1625_v30, %v1626_v36  ;;  %6568 = vmatmul.mubr.msk.f32.vlgmr.msra.gmra.mrb[0].mxu0 (%p25_p0), %vm135_vm1, %v2093_v43  ;;  %v2094_v63 = vmul.f32 (%p25_p0), %v2084_v44, %v2074_v8  ;;  %v1765_v11 = vmul.f32 (%p25_p0), %v1755_v1, %v1745_v2  ;;  %v1758_v29 = vld [vmem:[%s9606_s1 + $0x7b1] sm:$0xff] (%p25_p0)  ;;  %v2262_v40 = vld [vmem:[%s9605_s0 + $0x783] sm:$0xff] (%p25_p0)  ;;  %v2269_v2 = vld [vmem:[%s9605_s0 + $0x7bb] sm:$0xff] (%p25_p0) }
 0x160   : > { %v1611_v50 = vmax.f32 %v1609_v25, %v1610_v16  ;;  %v1617_v33 = vrot.slane %v1616_v35, 2  ;;  %v1634_v48 = vmax.f32 %v1632_v53, %v1633_v37  ;;  %6549 = vmatpush3.msk.msra.mxu1 (%p25_p0), %vm184_vm0, %v1741_v7  ;;  %6583 = vmatpush3.msk.msra.mxu0 (%p25_p0), %vm184_vm0, %v5726_v58  ;;  %v2095_v34 = vmul.f32 (%p25_p0), %v2085_v13, %v2075_v12  ;;  %v2077_v25 = vld [vmem:[%s9605_s0 + $0x7aa] sm:$0xff] (%p25_p0)  ;;  %v1749_v53 = vld [vmem:[%s9605_s0 + $0x7b9] sm:$0xff] (%p25_p0) }
 0x161   :  { %6536 = vmatprep.mubr.msk.f32.mxu1 (%p25_p0), %vm135_vm1, %v1764_v9  ;;  %6570 = vmatprep.mubr.msk.f32.mxu0 (%p25_p0), %vm135_vm1, %v2094_v63  ;;  %v1766_v15 = vmul.f32 (%p25_p0), %v1756_v14, %v1746_v31  ;;  %v2096_v19 = vmul.f32 (%p25_p0), %v2086_v10, %v2076_v18  ;;  %v1767_v26 = vmul.f32 (%p25_p0), %v1757_v21, %v1747_v20  ;;  %v2272_v23 = vld [vmem:[%s9606_s1 + $0x783] sm:$0xff] (%p25_p0)  ;;  %v5738_v30 = vld [vmem:[%s9607_s2 + $0x10] sm:$0xf] (%p25_p0)  ;;  %v1714_v9 = vld [vmem:[%s9605_s0 + $0x798] sm:$0xff] (%p25_p0) }
 0x162   : > { %v1612_v24 = vrot.slane %v1611_v50, 1  ;;  %v1618_v60 = vmax.f32 %v1616_v35, %v1617_v33  ;;  %7547 = vmatprep.subr.msk.mxu1 (%p25_p0), %vm184_vm0, %v8288_v51  ;;  %6537 = vmatmul.mubr.msk.f32.gmra.mrb[2].mxu1 (%p25_p0), %vm135_vm1, %v1765_v11  ;;  %v2097_v16 = vmul.f32 (%p25_p0), %v2087_v27, %v2077_v25  ;;  %v1768_v35 = vmul.f32 (%p25_p0), %v1758_v29, %v1748_v28  ;;  %v2263_v33 = vld [vmem:[%s9605_s0 + $0x78b] sm:$0xff] (%p25_p0)  ;;  %v2264_v37 = vld [vmem:[%s9605_s0 + $0x793] sm:$0xff] (%p25_p0)  ;;  %v2266_v55 = vld [vmem:[%s9605_s0 + $0x7a3] sm:$0xff] (%p25_p0) }
 0x163   :  { %6571 = vmatmul.mubr.msk.f32.gmra.mrb[2].mxu0 (%p25_p0), %vm135_vm1, %v2095_v34  ;;  %6539 = vmatprep.mubr.msk.f32.mxu1 (%p25_p0), %vm135_vm1, %v1766_v15  ;;  %v2282_v32 = vmul.f32 (%p25_p0), %v2272_v23, %v2262_v40  ;;  %v2276_v56 = vld [vmem:[%s9606_s1 + $0x7a3] sm:$0xff] (%p25_p0)  ;;  %v2267_v3 = vld [vmem:[%s9605_s0 + $0x7ab] sm:$0xff] (%p25_p0)  ;;  %v2268_v54 = vld [vmem:[%s9605_s0 + $0x7b3] sm:$0xff] (%p25_p0) }
 0x164   : > { %v1613_v39 = vmax.f32 %v1611_v50, %v1612_v24  ;;  %v1619_v41 = vrot.slane %v1618_v60, 1  ;;  %6573 = vmatprep.mubr.msk.f32.mxu0 (%p25_p0), %vm135_vm1, %v2096_v19  ;;  %6599 = vmatprep.subr.msk.mxu0 (%p25_p0), %vm184_vm0, %v5738_v30  ;;  %v1759_v50 = vld [vmem:[%s9606_s1 + $0x7b9] sm:$0xff] (%p25_p0)  ;;  %v1750_v24 = vld [vmem:[%s9605_s0 + $0x7c1] sm:$0xff] (%p25_p0)  ;;  %v2286_v42 = vmul.f32 (%p25_p0), %v2276_v56, %v2266_v55  ;;  %v2277_v0 = vld [vmem:[%s9606_s1 + $0x7ab] sm:$0xff] (%p25_p0) }
 0x165   :  { %27 = sbr.rel (!%p25_p0) target bundleno = 1 (0x1), region = 91  ;;  %v1769_v36 = vmul.f32 (%p25_p0), %v1759_v50, %v1749_v53  ;;  %v1712_v61 = vld [vmem:[%s9605_s0 + $0x788] sm:$0xff] (%p25_p0)  ;;  %v1713_v4 = vld [vmem:[%s9605_s0 + $0x790] sm:$0xff] (%p25_p0)  ;;  %v2287_v7 = vmul.f32 (%p25_p0), %v2277_v0, %v2267_v3  ;;  %v1724_v44 = vld [vmem:[%s9606_s1 + $0x798] sm:$0xff] (%p25_p0) }
 0x166   : > { %v1620_v45 = vmax.f32 %v1618_v60, %v1619_v41  ;;  %v1698_v46 = vsel %vm1673_vm5, %v1613_v39, %v1697_v59  ;;  %v2273_v59 = vld [vmem:[%s9606_s1 + $0x78b] sm:$0xff] (%p25_p0)  ;;  %v1760_v60 = vld [vmem:[%s9606_s1 + $0x7c1] sm:$0xff] (%p25_p0)  ;;  %6540 = vmatmul.mubr.msk.f32.gmra.mrb[4].mxu1 (%p25_p0), %vm135_vm1, %v1767_v26  ;;  %v2274_v39 = vld [vmem:[%s9606_s1 + $0x793] sm:$0xff] (%p25_p0)  ;;  %v1734_v34 = vmul.f32 (%p25_p0), %v1724_v44, %v1714_v9 }
 0x167   :  { %6574 = vmatmul.mubr.msk.f32.gmra.mrb[4].mxu0 (%p25_p0), %vm135_vm1, %v2097_v16  ;;  %6542 = vmatprep.mubr.msk.f32.mxu1 (%p25_p0), %vm135_vm1, %v1768_v35  ;;  %v2283_v41 = vmul.f32 (%p25_p0), %v2273_v59, %v2263_v33  ;;  %v1722_v58 = vld [vmem:[%s9606_s1 + $0x788] sm:$0xff] (%p25_p0)  ;;  %v1723_v5 = vld [vmem:[%s9606_s1 + $0x790] sm:$0xff] (%p25_p0)  ;;  %v2279_v63 = vld [vmem:[%s9606_s1 + $0x7bb] sm:$0xff] (%p25_p0) }
 0x168   : > { %v1699_v49 = vsel %vm1675_vm6, %v1620_v45, %v1698_v46  ;;  %v1770_v45 = vmul.f32 (%p25_p0), %v1760_v60, %v1750_v24  ;;  %v1751_v46 = vld [vmem:[%s9605_s0 + $0x7c9] sm:$0xf] (%p25_p0)  ;;  %6584 = vmatprep.mubr.msk.f32.mxu0 (%p25_p0), %vm135_vm1, %v2282_v32  ;;  %v2278_v43 = vld [vmem:[%s9606_s1 + $0x7b3] sm:$0xff] (%p25_p0)  ;;  %v1732_v6 = vmul.f32 (%p25_p0), %v1722_v58, %v1712_v61  ;;  %v1733_v8 = vmul.f32 (%p25_p0), %v1723_v5, %v1713_v4  ;;  %v1715_v11 = vld [vmem:[%s9605_s0 + $0x7a0] sm:$0xff] (%p25_p0) }
 0x169   : > { %v1700_v17 = vsel %vm1677_vm7, %v1627_v47, %v1699_v49  ;;  %v1761_v47 = vld [vmem:[%s9606_s1 + $0x7c9] sm:$0xf] (%p25_p0)  ;;  %v2284_v49 = vmul.f32 (%p25_p0), %v2274_v39, %v2264_v37  ;;  %v2288_v1 = vmul.f32 (%p25_p0), %v2278_v43, %v2268_v54  ;;  %v1725_v12 = vld [vmem:[%s9606_s1 + $0x7a0] sm:$0xff] (%p25_p0)  ;;  %v2289_v14 = vmul.f32 (%p25_p0), %v2279_v63, %v2269_v2  ;;  %v1717_v25 = vld [vmem:[%s9605_s0 + $0x7b0] sm:$0xff] (%p25_p0) }
 0x16a   : > { %v1701_v22 = vsel %vm1679_vm8, %v1634_v48, %v1700_v17  ;;  %v2265_v48 = vld [vmem:[%s9605_s0 + $0x79b] sm:$0xff] (%p25_p0)  ;;  %6543 = vmatmul.mubr.msk.f32.gmra.mrb[6].mxu1 (%p25_p0), %vm135_vm1, %v1769_v36  ;;  %v1771_v57 = vmul.f32 (%p25_p0), %v1761_v47, %v1751_v46  ;;  %v2270_v13 = vld [vmem:[%s9605_s0 + $0x7c3] sm:$0xff] (%p25_p0)  ;;  %v1735_v18 = vmul.f32 (%p25_p0), %v1725_v12, %v1715_v11  ;;  %v2271_v19 = vld [vmem:[%s9605_s0 + $0x7cb] sm:$0xf] (%p25_p0) }
 0x16b   : > { %1710 = vst [vmem:[%s8212_s18 + $0x18] sm:$0xff] %v1701_v22  ;;  %v2275_v17 = vld [vmem:[%s9606_s1 + $0x79b] sm:$0xff] (%p25_p0)  ;;  %6585 = vmatmul.mubr.msk.f32.vlgmr.msra.gmra.mrb[0].mxu0 (%p25_p0), %vm135_vm1, %v2283_v41  ;;  %6545 = vmatprep.mubr.msk.f32.mxu1 (%p25_p0), %vm135_vm1, %v1770_v45  ;;  %v2280_v31 = vld [vmem:[%s9606_s1 + $0x7c3] sm:$0xff] (%p25_p0)  ;;  %v2281_v21 = vld [vmem:[%s9606_s1 + $0x7cb] sm:$0xf] (%p25_p0) }
 0x16c   :  { %v1711_v22 = vld [vmem:[%s9605_s0 + $0x780] sm:$0xff]  ;;  %v2285_v38 = vmul.f32 %v2275_v17, %v2265_v48  ;;  %6600 = vmatpush3.msk.msra.mxu0 %vm184_vm0, %v5738_v30  ;;  %6587 = vmatprep.mubr.msk.f32.mxu0 %vm135_vm1, %v2284_v49  ;;  %v1716_v10 = vld [vmem:[%s9605_s0 + $0x7a8] sm:$0xff]  ;;  %v2290_v20 = vmul.f32 %v2280_v31, %v2270_v13  ;;  %v1727_v26 = vld [vmem:[%s9606_s1 + $0x7b0] sm:$0xff]  ;;  %v2291_v29 = vmul.f32 %v2281_v21, %v2271_v19 }
 0x16d   :  { %v1731_v62 = vmul.f32 %v1721_v52, %v1711_v22  ;;  %v1726_v15 = vld [vmem:[%s9606_s1 + $0x7a8] sm:$0xff]  ;;  %v1737_v16 = vmul.f32 %v1727_v26, %v1717_v25  ;;  %v1718_v35 = vld [vmem:[%s9605_s0 + $0x7b8] sm:$0xff]  ;;  %v1719_v53 = vld [vmem:[%s9605_s0 + $0x7c0] sm:$0xff] }
 0x16e   :  { %6546 = vmatmul.mubr.msk.f32.gmra.mrb[8].mxu1 %vm135_vm1, %v1771_v57  ;;  %v2452_v27 = vld [vmem:[%s9605_s0 + $0x784] sm:$0xff]  ;;  %v1736_v28 = vmul.f32 %v1726_v15, %v1716_v10  ;;  %v1728_v40 = vld [vmem:[%s9606_s1 + $0x7b8] sm:$0xff]  ;;  %v2453_v23 = vld [vmem:[%s9605_s0 + $0x78c] sm:$0xff] }
 0x16f   :  { %6588 = vmatmul.mubr.msk.f32.gmra.mrb[2].mxu0 %vm135_vm1, %v2285_v38  ;;  %6550 = vmatprep.mubr.msk.f32.mxu1 %vm135_vm1, %v1731_v62  ;;  %v2463_v32 = vld [vmem:[%s9606_s1 + $0x78c] sm:$0xff]  ;;  %v1729_v50 = vld [vmem:[%s9606_s1 + $0x7c0] sm:$0xff]  ;;  %v2454_v33 = vld [vmem:[%s9605_s0 + $0x794] sm:$0xff]  ;;  %v1738_v24 = vmul.f32 %v1728_v40, %v1718_v35 }
 0x170   :  { %6590 = vmatprep.mubr.msk.f32.mxu0 %vm135_vm1, %v2286_v42  ;;  %v2464_v59 = vld [vmem:[%s9606_s1 + $0x794] sm:$0xff]  ;;  %v2473_v60 = vmul.f32 %v2463_v32, %v2453_v23  ;;  %v1739_v36 = vmul.f32 %v1729_v50, %v1719_v53  ;;  %v1720_v37 = vld [vmem:[%s9605_s0 + $0x7c8] sm:$0xf]  ;;  %v2455_v41 = vld [vmem:[%s9605_s0 + $0x79c] sm:$0xff] }
 0x171   :  { %v1730_v39 = vld [vmem:[%s9606_s1 + $0x7c8] sm:$0xf]  ;;  %v2474_v45 = vmul.f32 %v2464_v59, %v2454_v33  ;;  %v2465_v46 = vld [vmem:[%s9606_s1 + $0x79c] sm:$0xff]  ;;  %v2078_v47 = vld [vmem:[%s9605_s0 + $0x7b2] sm:$0xff] }
 0x172   :  { %6551 = vmatmul.mubr.msk.f32.vlgmr.msra.gmra.mrb[0].mxu1 %vm135_vm1, %v1732_v6  ;;  %v2088_v48 = vld [vmem:[%s9606_s1 + $0x7b2] sm:$0xff]  ;;  %v2456_v49 = vld [vmem:[%s9605_s0 + $0x7a4] sm:$0xff]  ;;  %v1740_v22 = vmul.f32 %v1730_v39, %v1720_v37  ;;  %v2475_v52 = vmul.f32 %v2465_v46, %v2455_v41  ;;  %v2079_v56 = vld [vmem:[%s9605_s0 + $0x7ba] sm:$0xff] }
 0x173   :  { %6591 = vmatmul.mubr.msk.f32.gmra.mrb[4].mxu0 %vm135_vm1, %v2287_v7  ;;  %6553 = vmatprep.mubr.msk.f32.mxu1 %vm135_vm1, %v1733_v8  ;;  %v2466_v17 = vld [vmem:[%s9606_s1 + $0x7a4] sm:$0xff]  ;;  %v2098_v55 = vmul.f32 %v2088_v48, %v2078_v47  ;;  %v2089_v57 = vld [vmem:[%s9606_s1 + $0x7ba] sm:$0xff]  ;;  %v2457_v38 = vld [vmem:[%s9605_s0 + $0x7ac] sm:$0xff] }
 0x174   :  { %6593 = vmatprep.mubr.msk.f32.mxu0 %vm135_vm1, %v2288_v1  ;;  %7548 = vmatpush3.msk.msra.mxu1 %vm184_vm0, %v8288_v51  ;;  %v2462_v51 = vld [vmem:[%s9606_s1 + $0x784] sm:$0xff]  ;;  %v2476_v62 = vmul.f32 %v2466_v17, %v2456_v49  ;;  %v2467_v61 = vld [vmem:[%s9606_s1 + $0x7ac] sm:$0xff]  ;;  %v2458_v42 = vld [vmem:[%s9605_s0 + $0x7b4] sm:$0xff]  ;;  %v2099_v4 = vmul.f32 %v2089_v57, %v2079_v56 }
 0x175   :  { %v2472_v30 = vmul.f32 %v2462_v51, %v2452_v27  ;;  %v2080_v58 = vld [vmem:[%s9605_s0 + $0x7c2] sm:$0xff]  ;;  %v2468_v0 = vld [vmem:[%s9606_s1 + $0x7b4] sm:$0xff]  ;;  %v2477_v5 = vmul.f32 %v2467_v61, %v2457_v38  ;;  %v2081_v43 = vld [vmem:[%s9605_s0 + $0x7ca] sm:$0xf] }
 0x176   :  { %6554 = vmatmul.mubr.msk.f32.gmra.mrb[2].mxu1 %vm135_vm1, %v1734_v34  ;;  %v2090_v3 = vld [vmem:[%s9606_s1 + $0x7c2] sm:$0xff]  ;;  %v2091_v6 = vld [vmem:[%s9606_s1 + $0x7ca] sm:$0xf]  ;;  %v2478_v7 = vmul.f32 %v2468_v0, %v2458_v42  ;;  %v8673_v21 = vld [vmem:[%s9608_s3] ss:$0 sm:$0xff] }
 0x177   :  { %6594 = vmatmul.mubr.msk.f32.gmra.mrb[6].mxu0 %vm135_vm1, %v2289_v14  ;;  %6556 = vmatprep.mubr.msk.f32.mxu1 %vm135_vm1, %v1735_v18  ;;  %v2100_v54 = vmul.f32 %v2090_v3, %v2080_v58  ;;  %v2459_v8 = vld [vmem:[%s9605_s0 + $0x7bc] sm:$0xff]  ;;  %v2460_v44 = vld [vmem:[%s9605_s0 + $0x7c4] sm:$0xff]  ;;  %v2101_v1 = vmul.f32 %v2091_v6, %v2081_v43  ;;  %v2461_v12 = vld [vmem:[%s9605_s0 + $0x7cc] sm:$0xf] }
 0x178   :  { %6596 = vmatprep.mubr.msk.f32.mxu0 %vm135_vm1, %v2290_v20  ;;  %v2469_v9 = vld [vmem:[%s9606_s1 + $0x7bc] sm:$0xff]  ;;  %v2470_v2 = vld [vmem:[%s9606_s1 + $0x7c4] sm:$0xff]  ;;  %v2471_v13 = vld [vmem:[%s9606_s1 + $0x7cc] sm:$0xf]  ;;  %s8739_s1 = smov 0  }
 0x179   :  { %v2479_v63 = vmul.f32 %v2469_v9, %v2459_v8  ;;  %v2480_v11 = vmul.f32 %v2470_v2, %v2460_v44  ;;  %v2481_v31 = vmul.f32 %v2471_v13, %v2461_v12 }
 0x17a   :  { %6557 = vmatmul.mubr.msk.f32.gmra.mrb[4].mxu1 %vm135_vm1, %v1736_v28 }
 0x17b   :  { %6597 = vmatmul.mubr.msk.f32.gmra.mrb[8].mxu0 %vm135_vm1, %v2291_v29  ;;  %6559 = vmatprep.mubr.msk.f32.mxu1 %vm135_vm1, %v1737_v16 }
 0x17c   :  { %6601 = vmatprep.mubr.msk.f32.mxu0 %vm135_vm1, %v2472_v30 }
 0x17e   :  { %6560 = vmatmul.mubr.msk.f32.gmra.mrb[6].mxu1 %vm135_vm1, %v1738_v24 }
 0x17f   :  { %6602 = vmatmul.mubr.msk.f32.vlgmr.msra.gmra.mrb[0].mxu0 %vm135_vm1, %v2473_v60  ;;  %6562 = vmatprep.mubr.msk.f32.mxu1 %vm135_vm1, %v1739_v36 }
 0x180   :  { %6604 = vmatprep.mubr.msk.f32.mxu0 %vm135_vm1, %v2474_v45 }
 0x182   :  { %6563 = vmatmul.mubr.msk.f32.gmra.mrb[8].mxu1 %vm135_vm1, %v1740_v22 }
 0x183   :  { %6605 = vmatmul.mubr.msk.f32.gmra.mrb[2].mxu0 %vm135_vm1, %v2475_v52  ;;  %6576 = vmatprep.mubr.msk.f32.mxu1 %vm135_vm1, %v2098_v55 }
 0x184   :  { %6607 = vmatprep.mubr.msk.f32.mxu0 %vm135_vm1, %v2476_v62 }
 0x186   :  { %6577 = vmatmul.mubr.msk.f32.vlgmr.msra.gmra.mrb[6].mxu1 %vm135_vm1, %v2099_v4 }
 0x187   :  { %6608 = vmatmul.mubr.msk.f32.gmra.mrb[4].mxu0 %vm135_vm1, %v2477_v5  ;;  %6579 = vmatprep.mubr.msk.f32.mxu1 %vm135_vm1, %v2100_v54 }
 0x188   :  { %6610 = vmatprep.mubr.msk.f32.mxu0 %vm135_vm1, %v2478_v7 }
 0x18a   :  { %6580 = vmatmul.mubr.msk.f32.gmra.mrb[8].mxu1 %vm135_vm1, %v2101_v1 }
 0x18b   :  { %6611 = vmatmul.mubr.msk.f32.gmra.mrb[6].mxu0 %vm135_vm1, %v2479_v63 }
 0x18c   :  { %6613 = vmatprep.mubr.msk.f32.mxu0 %vm135_vm1, %v2480_v11 }
 0x18f   :  { %6614 = vmatmul.mubr.msk.f32.gmra.mrb[8].mxu0 %vm135_vm1, %v2481_v31 }
 0x245   :  { %v6552_v34 = vpop.f32.mrb[0].mxu1 }
 0x246   :  { %v2023_v14 = vpop.f32.mrb[1].mxu1 }
 0x249   :  { %v6555_v18 = vpop.f32.mrb[2].mxu1 }
 0x24a   :  { %v2033_v10 = vpop.f32.mrb[3].mxu1 }
 0x24d   :  { %v6558_v15 = vpop.f32.mrb[4].mxu1 }
 0x24e   :  { %v8668_v19 = vpop.f32.mrb[5].mxu1 }
 0x252   :  { %v6603_v20 = vpop.f32.mrb[0].mxu0 }
 0x253   :  { %v7549_v25 = vadd.f32 %v6603_v20, %v6552_v34  ;;  %v2583_v26 = vpop.f32.mrb[1].mxu0 }
 0x254   :  { %v7550_v27 = vadd.f32 %v2583_v26, %v2023_v14 }
 0x255   :  { %v2650_v51 = vadd.f32 %v7549_v25, %v8673_v21 }
 0x256   :  { %v2649_v28 = vadd.f32 %v7550_v27, %v8673_v21  ;;  %v6606_v29 = vpop.f32.mrb[2].mxu0 }
 0x257   :  { %v2660_v16 = vmax.f32 %v2650_v51, 0.0  ;;  %v7551_v35 = vadd.f32 %v6606_v29, %v6555_v18  ;;  %v2593_v40 = vpop.f32.mrb[3].mxu0 }
 0x258   :  { %v2659_v23 = vmax.f32 %v2649_v28, 0.0  ;;  %v7552_v30 = vadd.f32 %v2593_v40, %v2033_v10 }
 0x259   :  { %v2679_v32 = vcombine.high %v2660_v16, %v2660_v16  ;;  %v2710_v53 = vsel %vm184_vm0, %v2660_v16, -inf  ;;  %v2652_v50 = vadd.f32 %v7551_v35, %v8673_v21  ;;  %v8679_v33 = vpop.f32.mrb[6].mxu1 }
 0x25a   :  { %v2711_v59 = vrot.slane %v2710_v53, 4  ;;  %v2678_v24 = vcombine.high %v2659_v23, %v2659_v23  ;;  %v2696_v60 = vsel %vm184_vm0, %v2659_v23, -inf  ;;  %v2651_v36 = vadd.f32 %v7552_v30, %v8673_v21  ;;  %v6609_v37 = vpop.f32.mrb[4].mxu0  ;;  %v8683_v39 = vpop.f32.mrb[7].mxu1 }
 0x25b   :  { %v2717_v41 = vsel %vm184_vm0, %v2679_v32, -inf  ;;  %v2697_v45 = vrot.slane %v2696_v60, 4  ;;  %v2662_v46 = vmax.f32 %v2652_v50, 0.0  ;;  %v7553_v47 = vadd.f32 %v6609_v37, %v6558_v15  ;;  %v2603_v48 = vpop.f32.mrb[5].mxu0 }
 0x25c   :  { %v2712_v49 = vmax.f32 %v2710_v53, %v2711_v59  ;;  %v2718_v17 = vrot.slane %v2717_v41, 4  ;;  %v2703_v22 = vsel %vm184_vm0, %v2678_v24, -inf  ;;  %v2661_v52 = vmax.f32 %v2651_v36, 0.0 }
 0x25d   :  { %v2698_v55 = vmax.f32 %v2696_v60, %v2697_v45  ;;  %v2704_v56 = vrot.slane %v2703_v22, 4  ;;  %v2681_v57 = vcombine.high %v2662_v46, %v2662_v46  ;;  %v2738_v38 = vsel %vm184_vm0, %v2662_v46, -inf  ;;  %v8688_v62 = vpop.f32.mrb[8].mxu1 }
 0x25e   :  { %v2713_v61 = vrot.slane %v2712_v49, 2  ;;  %v2719_v58 = vmax.f32 %v2717_v41, %v2718_v17  ;;  %v2739_v3 = vrot.slane %v2738_v38, 4  ;;  %v2680_v42 = vcombine.high %v2661_v52, %v2661_v52  ;;  %v6612_v0 = vpop.f32.mrb[6].mxu0  ;;  %v8690_v4 = vpop.f32.mrb[9].mxu1 }
 0x25f   :  { %v2699_v5 = vrot.slane %v2698_v55, 2  ;;  %v2705_v54 = vmax.f32 %v2703_v22, %v2704_v56  ;;  %v2745_v43 = vsel %vm184_vm0, %v2681_v57, -inf  ;;  %v2724_v6 = vsel %vm184_vm0, %v2661_v52, -inf  ;;  %v2613_v7 = vpop.f32.mrb[7].mxu0 }
 0x260   :  { %v2714_v8 = vmax.f32 %v2712_v49, %v2713_v61  ;;  %v2720_v9 = vrot.slane %v2719_v58, 2  ;;  %v2740_v44 = vmax.f32 %v2738_v38, %v2739_v3  ;;  %v2746_v2 = vrot.slane %v2745_v43, 4 }
 0x261   :  { %v2700_v1 = vmax.f32 %v2698_v55, %v2699_v5  ;;  %v2706_v63 = vrot.slane %v2705_v54, 2  ;;  %v2725_v11 = vrot.slane %v2724_v6, 4  ;;  %v2731_v12 = vsel %vm184_vm0, %v2680_v42, -inf }
 0x262   :  { %v2715_v13 = vrot.slane %v2714_v8, 1  ;;  %v2721_v31 = vmax.f32 %v2719_v58, %v2720_v9  ;;  %v2741_v34 = vrot.slane %v2740_v44, 2  ;;  %v2747_v14 = vmax.f32 %v2745_v43, %v2746_v2  ;;  %v8695_v18 = vpop.f32.mrb[8].mxu0 }
 0x263   :  { %v2701_v10 = vrot.slane %v2700_v1, 1  ;;  %v2707_v15 = vmax.f32 %v2705_v54, %v2706_v63  ;;  %v2726_v20 = vmax.f32 %v2724_v6, %v2725_v11  ;;  %v2732_v25 = vrot.slane %v2731_v12, 4  ;;  %v8697_v26 = vpop.f32.mrb[9].mxu0 }
 0x264   :  { %v2716_v27 = vmax.f32 %v2714_v8, %v2715_v13  ;;  %v2722_v51 = vrot.slane %v2721_v31, 1  ;;  %v2742_v28 = vmax.f32 %v2740_v44, %v2741_v34  ;;  %v2748_v29 = vrot.slane %v2747_v14, 2 }
 0x265   :  { %v2702_v16 = vmax.f32 %v2700_v1, %v2701_v10  ;;  %v2708_v35 = vrot.slane %v2707_v15, 1  ;;  %v2727_v40 = vrot.slane %v2726_v20, 2  ;;  %v2733_v23 = vmax.f32 %v2731_v12, %v2732_v25 }
 0x266   :  { %v2723_v30 = vmax.f32 %v2721_v31, %v2722_v51  ;;  %v2743_v32 = vrot.slane %v2742_v28, 1  ;;  %v2749_v53 = vmax.f32 %v2747_v14, %v2748_v29  ;;  %v2654_v50 = vadd.f32 %v7553_v47, %v8673_v21 }
 0x267   :  { %v2709_v59 = vmax.f32 %v2707_v15, %v2708_v35  ;;  %v2728_v24 = vmax.f32 %v2726_v20, %v2727_v40  ;;  %v2734_v60 = vrot.slane %v2733_v23, 2  ;;  %v7554_v36 = vadd.f32 %v2603_v48, %v8668_v19 }
 0x268   :  { %v2744_v37 = vmax.f32 %v2742_v28, %v2743_v32  ;;  %v2750_v41 = vrot.slane %v2749_v53, 1  ;;  %v2664_v45 = vmax.f32 %v2654_v50, 0.0  ;;  %v7555_v46 = vadd.f32 %v6612_v0, %v8679_v33 }
 0x269   :  { %v2849_v49 = vsel %vm1667_vm2, %v2709_v59, %v2702_v16  ;;  %v2729_v17 = vrot.slane %v2728_v24, 1  ;;  %v2735_v22 = vmax.f32 %v2733_v23, %v2734_v60  ;;  %v2653_v52 = vadd.f32 %v7554_v36, %v8673_v21 }
 0x26a   :  { %v2851_v55 = vsel %vm1669_vm3, %v2716_v27, %v2849_v49  ;;  %v2751_v56 = vmax.f32 %v2749_v53, %v2750_v41  ;;  %v2683_v47 = vcombine.high %v2664_v45, %v2664_v45  ;;  %v2766_v57 = vsel %vm184_vm0, %v2664_v45, -inf }
 0x26b   :  { %v2730_v38 = vmax.f32 %v2728_v24, %v2729_v17  ;;  %v2736_v61 = vrot.slane %v2735_v22, 1  ;;  %v2853_v19 = vsel %vm1671_vm4, %v2723_v30, %v2851_v55  ;;  %v2767_v48 = vrot.slane %v2766_v57, 4 }
 0x26c   :  { %v2773_v58 = vsel %vm184_vm0, %v2683_v47, -inf  ;;  %v2663_v33 = vmax.f32 %v2653_v52, 0.0  ;;  %v2656_v3 = vadd.f32 %v7555_v46, %v8673_v21  ;;  %v7556_v42 = vadd.f32 %v2613_v7, %v8683_v39 }
 0x26d   :  { %v2737_v0 = vmax.f32 %v2735_v22, %v2736_v61  ;;  %v2855_v5 = vsel %vm1673_vm5, %v2730_v38, %v2853_v19  ;;  %v2768_v54 = vmax.f32 %v2766_v57, %v2767_v48  ;;  %v2774_v43 = vrot.slane %v2773_v58, 4 }
 0x26e   :  { %v2682_v6 = vcombine.high %v2663_v33, %v2663_v33  ;;  %v2752_v8 = vsel %vm184_vm0, %v2663_v33, -inf  ;;  %v2666_v9 = vmax.f32 %v2656_v3, 0.0  ;;  %v2655_v44 = vadd.f32 %v7556_v42, %v8673_v21 }
 0x26f   :  { %v2857_v2 = vsel %vm1675_vm6, %v2737_v0, %v2855_v5  ;;  %v2769_v1 = vrot.slane %v2768_v54, 2  ;;  %v2775_v63 = vmax.f32 %v2773_v58, %v2774_v43  ;;  %v2753_v11 = vrot.slane %v2752_v8, 4 }
 0x270   :  { %v2859_v12 = vsel %vm1677_vm7, %v2744_v37, %v2857_v2  ;;  %v2759_v39 = vsel %vm184_vm0, %v2682_v6, -inf  ;;  %v2685_v7 = vcombine.high %v2666_v9, %v2666_v9  ;;  %v2794_v13 = vsel %vm184_vm0, %v2666_v9, -inf }
 0x271   :  { %v2861_v31 = vsel %vm1679_vm8, %v2751_v56, %v2859_v12  ;;  %v2776_v34 = vrot.slane %v2775_v63, 2  ;;  %v2754_v14 = vmax.f32 %v2752_v8, %v2753_v11  ;;  %v2760_v10 = vrot.slane %v2759_v39, 4 }
 0x272   :  { %2874 = vst [vmem:[#allocation2 + $0x1e0] sm:$0xff] %v2861_v31  ;;  %v2795_v15 = vrot.slane %v2794_v13, 4  ;;  %v2801_v20 = vsel %vm184_vm0, %v2685_v7, -inf  ;;  %v2665_v25 = vmax.f32 %v2655_v44, 0.0  ;;  %v2770_v27 = vmax.f32 %v2768_v54, %v2769_v1 }
 0x273   :  { %v2755_v51 = vrot.slane %v2754_v14, 2  ;;  %v2802_v28 = vrot.slane %v2801_v20, 4  ;;  %v2761_v29 = vmax.f32 %v2759_v39, %v2760_v10  ;;  %v2777_v23 = vmax.f32 %v2775_v63, %v2776_v34 }
 0x274   :  { %v2796_v16 = vmax.f32 %v2794_v13, %v2795_v15  ;;  %v2684_v35 = vcombine.high %v2665_v25, %v2665_v25  ;;  %v2780_v40 = vsel %vm184_vm0, %v2665_v25, -inf  ;;  %v2771_v60 = vrot.slane %v2770_v27, 1 }
 0x275   :  { %v2756_v30 = vmax.f32 %v2754_v14, %v2755_v51  ;;  %v2803_v32 = vmax.f32 %v2801_v20, %v2802_v28  ;;  %v2762_v53 = vrot.slane %v2761_v29, 2  ;;  %v2781_v59 = vrot.slane %v2780_v40, 4 }
 0x276   :  { %v2797_v50 = vrot.slane %v2796_v16, 2  ;;  %v2787_v24 = vsel %vm184_vm0, %v2684_v35, -inf  ;;  %v7557_v49 = vadd.f32 %v8695_v18, %v8688_v62  ;;  %v2778_v17 = vrot.slane %v2777_v23, 1 }
 0x277   :  { %v2804_v36 = vrot.slane %v2803_v32, 2  ;;  %v2788_v37 = vrot.slane %v2787_v24, 4  ;;  %v2757_v41 = vrot.slane %v2756_v30, 1  ;;  %v2763_v45 = vmax.f32 %v2761_v29, %v2762_v53 }
 0x278   :  { %v2782_v46 = vmax.f32 %v2780_v40, %v2781_v59  ;;  %v2798_v22 = vmax.f32 %v2796_v16, %v2797_v50  ;;  %v7558_v55 = vadd.f32 %v8697_v26, %v8690_v4  ;;  %v2658_v38 = vadd.f32 %v7557_v49, %v8673_v21 }
 0x279   :  { %v2789_v52 = vmax.f32 %v2787_v24, %v2788_v37  ;;  %v2764_v56 = vrot.slane %v2763_v45, 1  ;;  %v2805_v47 = vmax.f32 %v2803_v32, %v2804_v36  ;;  %v2772_v61 = vmax.f32 %v2770_v27, %v2771_v60 }
 0x27a   :  { %v2783_v57 = vrot.slane %v2782_v46, 2  ;;  %v2657_v48 = vadd.f32 %v7558_v55, %v8673_v21  ;;  %v2758_v58 = vmax.f32 %v2756_v30, %v2757_v41  ;;  %v2668_v42 = vmax.f32 %v2658_v38, 0.0 }
 0x27b   :  { %v2790_v19 = vrot.slane %v2789_v52, 2  ;;  %v2765_v33 = vmax.f32 %v2763_v45, %v2764_v56  ;;  %v2779_v62 = vmax.f32 %v2777_v23, %v2778_v17  ;;  %v2799_v18 = vrot.slane %v2798_v22, 1 }
 0x27c   :  { %v2784_v3 = vmax.f32 %v2782_v46, %v2783_v57  ;;  %v2667_v5 = vmax.f32 %v2657_v48, 0.0  ;;  %v2806_v4 = vrot.slane %v2805_v47, 1  ;;  %v2822_v43 = vsel %vm184_vm0, %v2668_v42, -inf }
 0x27d   :  { %v2791_v0 = vmax.f32 %v2789_v52, %v2790_v19  ;;  %v2862_v54 = vsel %vm1667_vm2, %v2765_v33, %v2758_v58  ;;  %v2823_v9 = vrot.slane %v2822_v43, 4  ;;  %v2800_v7 = vmax.f32 %v2798_v22, %v2799_v18 }
 0x27e   :  { %v2785_v26 = vrot.slane %v2784_v3, 1  ;;  %v2863_v6 = vsel %vm1669_vm3, %v2772_v61, %v2862_v54  ;;  %v2686_v44 = vcombine.high %v2667_v5, %v2667_v5  ;;  %v2808_v1 = vsel %vm184_vm0, %v2667_v5, -inf }
 0x27f   :  { %v2792_v8 = vrot.slane %v2791_v0, 1  ;;  %v2864_v2 = vsel %vm1671_vm4, %v2779_v62, %v2863_v6  ;;  %v2824_v11 = vmax.f32 %v2822_v43, %v2823_v9  ;;  %v2809_v12 = vrot.slane %v2808_v1, 4 }
 0x280   :  { %v2786_v21 = vmax.f32 %v2784_v3, %v2785_v26  ;;  %v2815_v39 = vsel %vm184_vm0, %v2686_v44, -inf  ;;  %v2807_v34 = vmax.f32 %v2805_v47, %v2806_v4 }
 0x281   :  { %v2793_v63 = vmax.f32 %v2791_v0, %v2792_v8  ;;  %v2816_v31 = vrot.slane %v2815_v39, 4  ;;  %v2825_v10 = vrot.slane %v2824_v11, 2  ;;  %v2810_v15 = vmax.f32 %v2808_v1, %v2809_v12 }
 0x282   :  { %v2865_v13 = vsel %vm1673_vm5, %v2786_v21, %v2864_v2 }
 0x283   :  { %v2866_v14 = vsel %vm1675_vm6, %v2793_v63, %v2865_v13  ;;  %v2817_v25 = vmax.f32 %v2815_v39, %v2816_v31  ;;  %v2826_v51 = vmax.f32 %v2824_v11, %v2825_v10  ;;  %v2811_v28 = vrot.slane %v2810_v15, 2 }
 0x284   :  { %v2867_v20 = vsel %vm1677_vm7, %v2800_v7, %v2866_v14 }
 0x285   :  { %v2868_v27 = vsel %vm1679_vm8, %v2807_v34, %v2867_v20  ;;  %v2818_v29 = vrot.slane %v2817_v25, 2  ;;  %v2812_v16 = vmax.f32 %v2810_v15, %v2811_v28  ;;  %v2827_v40 = vrot.slane %v2826_v51, 1 }
 0x286   :  { %2875 = vst [vmem:[#allocation2 + $0x1e8] sm:$0xff] %v2868_v27 }
 0x287   :  { %v2819_v35 = vmax.f32 %v2817_v25, %v2818_v29  ;;  %v2813_v23 = vrot.slane %v2812_v16, 1  ;;  %v2828_v50 = vmax.f32 %v2826_v51, %v2827_v40 }
 0x289   :  { %v2820_v30 = vrot.slane %v2819_v35, 1  ;;  %v2814_v32 = vmax.f32 %v2812_v16, %v2813_v23 }
 0x28b   :  { %v2821_v53 = vmax.f32 %v2819_v35, %v2820_v30 }
 0x28d   :  { %v2869_v59 = vsel %vm1667_vm2, %v2821_v53, %v2814_v32 }
 0x28e   :  { %v2870_v24 = vsel %vm1669_vm3, %v2828_v50, %v2869_v59 }
 0x28f   :  { %2876 = vst [vmem:[#allocation2 + $0x1f0] sm:$0x7] %v2870_v24 }
 0x290 LB: > { %v5770_v60 = vld [vmem:[%s9609_s4 + $0x80] sm:$0xff]  ;;  %v5771_v36 = vld [vmem:[%s9609_s4 + $0x88] sm:$0xff]  ;;  %v5772_v46 = vld [vmem:[%s9609_s4 + $0x90] sm:$0xff]  ;;  %s5751_s30 = sshll.u32 %s7771_s1, 7  ;;  %s5752_s12 = sshll.u32 %s7771_s1, 5  ;;  %s7771_s1 = sphi %s8739_s1, %s2882_s1  }
 0x291   : > { %v5803_v37 = vld [vmem:[%s9609_s4 + $0x100] sm:$0xff]  ;;  %v7161_v41 = vpack.c.bf16 %v5771_v36, %v5770_v60  ;;  %v5804_v45 = vld [vmem:[%s9609_s4 + $0x108] sm:$0xff]  ;;  %v5773_v49 = vld [vmem:[%s9609_s4 + $0x98] sm:$0xff]  ;;  %s8799_s17 = scalar_lea.vmem [#allocation2], %s5751_s30  ;;  %s9177_s15 = scalar_lea.vmem %s9611_s6, %s5752_s12 }
 0x292   : > { %v7225_v17 = vpack.c.bf16 %v5804_v45, %v5803_v37  ;;  %v7165_v22 = vpack.c.bf16 %v5773_v49, %v5772_v46  ;;  %v5805_v52 = vld [vmem:[%s9609_s4 + $0x110] sm:$0xff]  ;;  %v5806_v55 = vld [vmem:[%s9609_s4 + $0x118] sm:$0xff]  ;;  %v5774_v56 = vld [vmem:[%s9609_s4 + $0xa0] sm:$0xff]  ;;  %s2882_s1 = sadd.s32 1, %s7771_s1  }
 0x293   : > { %7162 = vmatprep.subr.bf16.mxu1 %v7161_v41  ;;  %v7229_v47 = vpack.c.bf16 %v5806_v55, %v5805_v52  ;;  %v5775_v57 = vld [vmem:[%s9609_s4 + $0xa8] sm:$0xff]  ;;  %v5807_v38 = vld [vmem:[%s9609_s4 + $0x120] sm:$0xff]  ;;  %v5776_v58 = vld [vmem:[%s9609_s4 + $0xb0] sm:$0xff]  ;;  %p2879_p1 = scmp.ge.s32.totalorder %s2882_s1, 3  }
 0x294   : > { %v5808_v61 = vld [vmem:[%s9609_s4 + $0x128] sm:$0xff]  ;;  %7226 = vmatprep.subr.bf16.mxu0 %v7225_v17  ;;  %7164 = vmatpush3.bf16.msra.mxu1 %v7161_v41  ;;  %v7169_v19 = vpack.c.bf16 %v5775_v57, %v5774_v56  ;;  %v5777_v33 = vld [vmem:[%s9609_s4 + $0xb8] sm:$0xff]  ;;  %v5809_v3 = vld [vmem:[%s9609_s4 + $0x130] sm:$0xff] }
 0x295   : > { %7228 = vmatpush3.bf16.msra.mxu0 %v7225_v17  ;;  %7166 = vmatprep.subr.bf16.mxu1 %v7165_v22  ;;  %v7233_v48 = vpack.c.bf16 %v5808_v61, %v5807_v38  ;;  %v5810_v42 = vld [vmem:[%s9609_s4 + $0x138] sm:$0xff]  ;;  %v7173_v62 = vpack.c.bf16 %v5777_v33, %v5776_v58  ;;  %v5778_v0 = vld [vmem:[%s9609_s4 + $0xc0] sm:$0xff]  ;;  %v5779_v5 = vld [vmem:[%s9609_s4 + $0xc8] sm:$0xff] }
 0x296   : > { %7230 = vmatprep.subr.bf16.mxu0 %v7229_v47  ;;  %v7237_v18 = vpack.c.bf16 %v5810_v42, %v5809_v3  ;;  %v5754_v54 = vld [vmem:[%s8799_s17 + $0x1] sm:$0xff]  ;;  %v7177_v6 = vpack.c.bf16 %v5779_v5, %v5778_v0  ;;  %v5780_v9 = vld [vmem:[%s9609_s4 + $0xd0] sm:$0xff]  ;;  %v5781_v44 = vld [vmem:[%s9609_s4 + $0xd8] sm:$0xff] }
 0x297   : > { %v5811_v4 = vld [vmem:[%s9609_s4 + $0x140] sm:$0xff]  ;;  %v5812_v26 = vld [vmem:[%s9609_s4 + $0x148] sm:$0xff]  ;;  %6648 = vmatprep.mubr.f32.mxu1 %v5754_v54  ;;  %v5813_v21 = vld [vmem:[%s9609_s4 + $0x150] sm:$0xff]  ;;  %v7181_v1 = vpack.c.bf16 %v5781_v44, %v5780_v9 }
 0x298   : > { %7168 = vmatpush3.bf16.msra.mxu1 %v7165_v22  ;;  %v5787_v43 = vld [vmem:[%s8799_s17 + $0x2] sm:$0xff]  ;;  %v7241_v8 = vpack.c.bf16 %v5812_v26, %v5811_v4  ;;  %v5814_v2 = vld [vmem:[%s9609_s4 + $0x158] sm:$0xff]  ;;  %v5784_v34 = vld [vmem:[%s9609_s4 + $0xf0] sm:$0xff] }
 0x299   : > { %7232 = vmatpush3.bf16.msra.mxu0 %v7229_v47  ;;  %7170 = vmatprep.subr.bf16.mxu1 %v7169_v19  ;;  %v7245_v63 = vpack.c.bf16 %v5814_v2, %v5813_v21  ;;  %v5782_v11 = vld [vmem:[%s9609_s4 + $0xe0] sm:$0xff]  ;;  %v5783_v12 = vld [vmem:[%s9609_s4 + $0xe8] sm:$0xff]  ;;  %v5785_v14 = vld [vmem:[%s9609_s4 + $0xf8] sm:$0xff] }
 0x29a   : > { %7234 = vmatprep.subr.bf16.mxu0 %v7233_v48  ;;  %6760 = vmatprep.mubr.f32.mxu0 %v5787_v43  ;;  %v5815_v39 = vld [vmem:[%s9609_s4 + $0x160] sm:$0xff]  ;;  %v5816_v7 = vld [vmem:[%s9609_s4 + $0x168] sm:$0xff]  ;;  %v7185_v13 = vpack.c.bf16 %v5783_v12, %v5782_v11  ;;  %v5817_v10 = vld [vmem:[%s9609_s4 + $0x170] sm:$0xff]  ;;  %v7189_v20 = vpack.c.bf16 %v5785_v14, %v5784_v34 }
 0x29b   : > { %v7249_v31 = vpack.c.bf16 %v5816_v7, %v5815_v39  ;;  %v5818_v15 = vld [vmem:[%s9609_s4 + $0x178] sm:$0xff]  ;;  %v2902_v27 = vld [vmem:[%s9609_s4] sm:$0xff]  ;;  %v2903_v51 = vld [vmem:[%s9609_s4 + $0x8] sm:$0xff] }
 0x29c   : > { %7172 = vmatpush3.bf16.msra.mxu1 %v7169_v19  ;;  %v7253_v25 = vpack.c.bf16 %v5818_v15, %v5817_v10  ;;  %v5836_v28 = vld [vmem:[%s9609_s4 + $0x180] sm:$0xff]  ;;  %v5837_v29 = vld [vmem:[%s9609_s4 + $0x188] sm:$0xff]  ;;  %v7193_v16 = vpack.c.bf16 %v2903_v51, %v2902_v27  ;;  %v2904_v40 = vld [vmem:[%s9609_s4 + $0x10] sm:$0xff] }
 0x29d   : > { %7236 = vmatpush3.bf16.msra.mxu0 %v7233_v48  ;;  %7174 = vmatprep.subr.bf16.mxu1 %v7173_v62  ;;  %v7257_v35 = vpack.c.bf16 %v5837_v29, %v5836_v28  ;;  %v2905_v23 = vld [vmem:[%s9609_s4 + $0x18] sm:$0xff]  ;;  %v5755_v30 = vld [vmem:[%s8799_s17 + $0x9] sm:$0xff]  ;;  %v2906_v37 = vld [vmem:[%s9609_s4 + $0x20] sm:$0xff] }
 0x29e   : > { %7238 = vmatprep.subr.bf16.mxu0 %v7237_v18  ;;  %v5838_v32 = vld [vmem:[%s9609_s4 + $0x190] sm:$0xff]  ;;  %v5839_v53 = vld [vmem:[%s9609_s4 + $0x198] sm:$0xff]  ;;  %v7197_v24 = vpack.c.bf16 %v2905_v23, %v2904_v40  ;;  %v2907_v41 = vld [vmem:[%s9609_s4 + $0x28] sm:$0xff] }
 0x29f   : > { %v5788_v50 = vld [vmem:[%s8799_s17 + $0xa] sm:$0xff]  ;;  %v5789_v60 = vld [vmem:[%s8799_s17 + $0x12] sm:$0xff]  ;;  %v7261_v36 = vpack.c.bf16 %v5839_v53, %v5838_v32  ;;  %v5840_v46 = vld [vmem:[%s9609_s4 + $0x1a0] sm:$0xff]  ;;  %v7201_v52 = vpack.c.bf16 %v2907_v41, %v2906_v37 }
 0x2a0   : > { %7176 = vmatpush3.bf16.msra.mxu1 %v7173_v62  ;;  %v5756_v59 = vld [vmem:[%s8799_s17 + $0x11] sm:$0xff]  ;;  %v5757_v45 = vld [vmem:[%s8799_s17 + $0x19] sm:$0xff]  ;;  %v5841_v49 = vld [vmem:[%s9609_s4 + $0x1a8] sm:$0xff] }
 0x2a1   : > { %7240 = vmatpush3.bf16.msra.mxu0 %v7237_v18  ;;  %7178 = vmatprep.subr.bf16.mxu1 %v7177_v6  ;;  %v5790_v17 = vld [vmem:[%s8799_s17 + $0x1a] sm:$0xff]  ;;  %v5791_v55 = vld [vmem:[%s8799_s17 + $0x22] sm:$0xff]  ;;  %v7265_v56 = vpack.c.bf16 %v5841_v49, %v5840_v46  ;;  %v2908_v47 = vld [vmem:[%s9609_s4 + $0x30] sm:$0xff] }
 0x2a2   : > { %7242 = vmatprep.subr.bf16.mxu0 %v7241_v8  ;;  %v5758_v22 = vld [vmem:[%s8799_s17 + $0x21] sm:$0xff]  ;;  %v2909_v57 = vld [vmem:[%s9609_s4 + $0x38] sm:$0xff]  ;;  %v5759_v38 = vld [vmem:[%s8799_s17 + $0x29] sm:$0xff] }
 0x2a3   : > { %v5842_v61 = vld [vmem:[%s9609_s4 + $0x1b0] sm:$0xff]  ;;  %v5843_v19 = vld [vmem:[%s9609_s4 + $0x1b8] sm:$0xff]  ;;  %v7205_v33 = vpack.c.bf16 %v2909_v57, %v2908_v47  ;;  %v2910_v62 = vld [vmem:[%s9609_s4 + $0x40] sm:$0xff] }
 0x2a4   : > { %7180 = vmatpush3.bf16.msra.mxu1 %v7177_v6  ;;  %v5792_v48 = vld [vmem:[%s8799_s17 + $0x2a] sm:$0xff]  ;;  %v5793_v3 = vld [vmem:[%s8799_s17 + $0x32] sm:$0xff]  ;;  %v7269_v42 = vpack.c.bf16 %v5843_v19, %v5842_v61  ;;  %v5844_v5 = vld [vmem:[%s9609_s4 + $0x1c0] sm:$0xff] }
 0x2a5   : > { %7244 = vmatpush3.bf16.msra.mxu0 %v7241_v8  ;;  %7182 = vmatprep.subr.bf16.mxu1 %v7181_v1  ;;  %v5760_v58 = vld [vmem:[%s8799_s17 + $0x31] sm:$0xff]  ;;  %v2911_v18 = vld [vmem:[%s9609_s4 + $0x48] sm:$0xff]  ;;  %v5761_v0 = vld [vmem:[%s8799_s17 + $0x39] sm:$0xff] }
 0x2a6   : > { %7246 = vmatprep.subr.bf16.mxu0 %v7245_v63  ;;  %v5845_v54 = vld [vmem:[%s9609_s4 + $0x1c8] sm:$0xff]  ;;  %v5794_v4 = vld [vmem:[%s8799_s17 + $0x3a] sm:$0xff]  ;;  %v7209_v43 = vpack.c.bf16 %v2911_v18, %v2910_v62  ;;  %v2912_v9 = vld [vmem:[%s9609_s4 + $0x50] sm:$0xff] }
 0x2a7   : > { %v5762_v26 = vld [vmem:[%s8799_s17 + $0x41] sm:$0xff]  ;;  %v7273_v8 = vpack.c.bf16 %v5845_v54, %v5844_v5  ;;  %v2913_v44 = vld [vmem:[%s9609_s4 + $0x58] sm:$0xff]  ;;  %v5763_v21 = vld [vmem:[%s8799_s17 + $0x49] sm:$0xff] }
 0x2a8   : > { %7184 = vmatpush3.bf16.msra.mxu1 %v7181_v1  ;;  %v5795_v6 = vld [vmem:[%s8799_s17 + $0x42] sm:$0xff]  ;;  %v5846_v2 = vld [vmem:[%s9609_s4 + $0x1d0] sm:$0xff]  ;;  %v5847_v1 = vld [vmem:[%s9609_s4 + $0x1d8] sm:$0xff]  ;;  %v7213_v12 = vpack.c.bf16 %v2913_v44, %v2912_v9 }
 0x2a9   : > { %7248 = vmatpush3.bf16.msra.mxu0 %v7245_v63  ;;  %7186 = vmatprep.subr.bf16.mxu1 %v7185_v13  ;;  %v5796_v63 = vld [vmem:[%s8799_s17 + $0x4a] sm:$0xff]  ;;  %v5797_v39 = vld [vmem:[%s8799_s17 + $0x52] sm:$0xff]  ;;  %v7277_v7 = vpack.c.bf16 %v5847_v1, %v5846_v2  ;;  %v5848_v14 = vld [vmem:[%s9609_s4 + $0x1e0] sm:$0xff] }
 0x2aa   : > { %7250 = vmatprep.subr.bf16.mxu0 %v7249_v31  ;;  %v5764_v11 = vld [vmem:[%s8799_s17 + $0x51] sm:$0xff]  ;;  %v5765_v34 = vld [vmem:[%s8799_s17 + $0x59] sm:$0xff]  ;;  %v5849_v10 = vld [vmem:[%s9609_s4 + $0x1e8] sm:$0xff] }
 0x2ab   : > { %v5798_v15 = vld [vmem:[%s8799_s17 + $0x5a] sm:$0xff]  ;;  %v5799_v27 = vld [vmem:[%s8799_s17 + $0x62] sm:$0xff]  ;;  %v7281_v51 = vpack.c.bf16 %v5849_v10, %v5848_v14  ;;  %v2916_v28 = vld [vmem:[%s9609_s4 + $0x70] sm:$0xff] }
 0x2ac   : > { %7188 = vmatpush3.bf16.msra.mxu1 %v7185_v13  ;;  %v2914_v13 = vld [vmem:[%s9609_s4 + $0x60] sm:$0xff]  ;;  %v2917_v29 = vld [vmem:[%s9609_s4 + $0x78] sm:$0xff]  ;;  %v5800_v23 = vld [vmem:[%s8799_s17 + $0x6a] sm:$0xff] }
 0x2ad   : > { %7252 = vmatpush3.bf16.msra.mxu0 %v7249_v31  ;;  %7190 = vmatprep.subr.bf16.mxu1 %v7189_v20  ;;  %v2915_v31 = vld [vmem:[%s9609_s4 + $0x68] sm:$0xff]  ;;  %v5851_v40 = vld [vmem:[%s9609_s4 + $0x1f8] sm:$0xff]  ;;  %v7221_v32 = vpack.c.bf16 %v2917_v29, %v2916_v28  ;;  %v2886_v37 = vld [vmem:[%s8799_s17] sm:$0xff] }
 0x2ae   : > { %7254 = vmatprep.subr.bf16.mxu0 %v7253_v25  ;;  %v5801_v53 = vld [vmem:[%s8799_s17 + $0x72] sm:$0xff]  ;;  %v5873_v47 = vld [vmem:[%s9609_s4 + $0x220] sm:$0xff]  ;;  %v5874_v57 = vld [vmem:[%s9609_s4 + $0x228] sm:$0xff] }
 0x2af   : > { %v5871_v46 = vld [vmem:[%s9609_s4 + $0x210] sm:$0xff]  ;;  %v5872_v49 = vld [vmem:[%s9609_s4 + $0x218] sm:$0xff]  ;;  %v2890_v19 = vld [vmem:[%s8799_s17 + $0x20] sm:$0xff] }
 0x2b0   : > { %7192 = vmatpush3.bf16.msra.mxu1 %v7189_v20  ;;  %v5766_v20 = vld [vmem:[%s8799_s17 + $0x61] sm:$0xff]  ;;  %v5825_v62 = vld [vmem:[%s8799_s17 + $0x2b] sm:$0xff]  ;;  %v5826_v5 = vld [vmem:[%s8799_s17 + $0x33] sm:$0xff] }
 0x2b1   : > { %7256 = vmatpush3.bf16.msra.mxu0 %v7253_v25  ;;  %7194 = vmatprep.subr.bf16.mxu1 %v7193_v16  ;;  %v7217_v25 = vpack.c.bf16 %v2915_v31, %v2914_v13  ;;  %v5823_v61 = vld [vmem:[%s8799_s17 + $0x1b] sm:$0xff]  ;;  %v2892_v18 = vld [vmem:[%s8799_s17 + $0x30] sm:$0xff]  ;;  %v5828_v9 = vld [vmem:[%s8799_s17 + $0x43] sm:$0xff] }
 0x2b2   : > { %7258 = vmatprep.subr.bf16.mxu0 %v7257_v35  ;;  %v5877_v54 = vld [vmem:[%s9609_s4 + $0x240] sm:$0xff]  ;;  %v5879_v44 = vld [vmem:[%s9609_s4 + $0x250] sm:$0xff]  ;;  %v2895_v2 = vld [vmem:[%s8799_s17 + $0x48] sm:$0xff] }
 0x2b3   : > { %6649 = vmatmul.mubr.f32.vlgmr.msra.gmra.mrb[0].mxu1 %v5755_v30  ;;  %v5768_v30 = vld [vmem:[%s8799_s17 + $0x71] sm:$0xff]  ;;  %v5831_v31 = vld [vmem:[%s8799_s17 + $0x5b] sm:$0xff]  ;;  %v5832_v10 = vld [vmem:[%s8799_s17 + $0x63] sm:$0xff] }
 0x2b4   : > { %6761 = vmatmul.mubr.f32.vlgmr.msra.gmra.mrb[0].mxu0 %v5788_v50  ;;  %7196 = vmatpush3.bf16.msra.mxu1 %v7193_v16  ;;  %v5767_v16 = vld [vmem:[%s8799_s17 + $0x69] sm:$0xff]  ;;  %v2897_v13 = vld [vmem:[%s8799_s17 + $0x58] sm:$0xff] }
 0x2b5   : > { %7260 = vmatpush3.bf16.msra.mxu0 %v7257_v35  ;;  %6651 = vmatprep.mubr.f32.mxu1 %v5756_v59  ;;  %v5850_v35 = vld [vmem:[%s9609_s4 + $0x1f0] sm:$0xff]  ;;  %v5869_v59 = vld [vmem:[%s9609_s4 + $0x200] sm:$0xff] }
 0x2b6   : > { %6763 = vmatprep.mubr.f32.mxu0 %v5789_v60  ;;  %7198 = vmatprep.subr.bf16.mxu1 %v7197_v24  ;;  %v7285_v50 = vpack.c.bf16 %v5851_v40, %v5850_v35  ;;  %v5769_v60 = vld [vmem:[%s8799_s17 + $0x79] sm:$0xff]  ;;  %v5829_v1 = vld [vmem:[%s8799_s17 + $0x4b] sm:$0xff] }
 0x2b7   : > { %6652 = vmatmul.mubr.f32.gmra.mrb[2].mxu1 %v5757_v45  ;;  %7262 = vmatprep.subr.bf16.mxu0 %v7261_v36  ;;  %v5820_v45 = vld [vmem:[%s8799_s17 + $0x3] sm:$0xff]  ;;  %v5834_v29 = vld [vmem:[%s8799_s17 + $0x73] sm:$0xff]  ;;  %v5835_v35 = vld [vmem:[%s8799_s17 + $0x7b] sm:$0xff] }
 0x2b8   : > { %6764 = vmatmul.mubr.f32.gmra.mrb[2].mxu0 %v5790_v17  ;;  %7200 = vmatpush3.bf16.msra.mxu1 %v7197_v24  ;;  %v5870_v24 = vld [vmem:[%s9609_s4 + $0x208] sm:$0xff] }
 0x2b9   : > { %7264 = vmatpush3.bf16.msra.mxu0 %v7261_v36  ;;  %6654 = vmatprep.mubr.f32.mxu1 %v5758_v22  ;;  %v5802_v36 = vld [vmem:[%s8799_s17 + $0x7a] sm:$0xff]  ;;  %v7289_v41 = vpack.c.bf16 %v5870_v24, %v5869_v59  ;;  %v2887_v17 = vld [vmem:[%s8799_s17 + $0x8] sm:$0xff] }
 0x2ba   : > { %6766 = vmatprep.mubr.f32.mxu0 %v5791_v55  ;;  %7202 = vmatprep.subr.bf16.mxu1 %v7201_v52  ;;  %v5821_v22 = vld [vmem:[%s8799_s17 + $0xb] sm:$0xff]  ;;  %v7293_v55 = vpack.c.bf16 %v5872_v49, %v5871_v46  ;;  %v5864_v59 = vld [vmem:[%s8799_s17 + $0x5c] sm:$0xff]  ;;  %v5859_v46 = vld [vmem:[%s8799_s17 + $0x34] sm:$0xff] }
 0x2bb   : > { %6655 = vmatmul.mubr.f32.gmra.mrb[4].mxu1 %v5759_v38  ;;  %7266 = vmatprep.subr.bf16.mxu0 %v7265_v56  ;;  %v2889_v38 = vld [vmem:[%s8799_s17 + $0x18] sm:$0xff]  ;;  %v5853_v40 = vld [vmem:[%s8799_s17 + $0x4] sm:$0xff] }
 0x2bc   : > { %6767 = vmatmul.mubr.f32.gmra.mrb[4].mxu0 %v5792_v48  ;;  %7204 = vmatpush3.bf16.msra.mxu1 %v7201_v52  ;;  %v2888_v52 = vld [vmem:[%s8799_s17 + $0x10] sm:$0xff]  ;;  %v7297_v48 = vpack.c.bf16 %v5874_v57, %v5873_v47  ;;  %v5856_v24 = vld [vmem:[%s8799_s17 + $0x1c] sm:$0xff] }
 0x2bd   : > { %7268 = vmatpush3.bf16.msra.mxu0 %v7265_v56  ;;  %6657 = vmatprep.mubr.f32.mxu1 %v5760_v58  ;;  %v5822_v56 = vld [vmem:[%s8799_s17 + $0x13] sm:$0xff]  ;;  %v5824_v58 = vld [vmem:[%s8799_s17 + $0x23] sm:$0xff] }
 0x2be   : > { %6769 = vmatprep.mubr.f32.mxu0 %v5793_v3  ;;  %7206 = vmatprep.subr.bf16.mxu1 %v7205_v33  ;;  %v5876_v3 = vld [vmem:[%s9609_s4 + $0x238] sm:$0xff] }
 0x2bf   : > { %6658 = vmatmul.mubr.f32.gmra.mrb[6].mxu1 %v5761_v0  ;;  %7270 = vmatprep.subr.bf16.mxu0 %v7269_v42  ;;  %v5868_v49 = vld [vmem:[%s8799_s17 + $0x7c] sm:$0xff] }
 0x2c0   : > { %6770 = vmatmul.mubr.f32.gmra.mrb[6].mxu0 %v5794_v4  ;;  %7208 = vmatpush3.bf16.msra.mxu1 %v7205_v33  ;;  %v5875_v33 = vld [vmem:[%s9609_s4 + $0x230] sm:$0xff]  ;;  %v5878_v4 = vld [vmem:[%s9609_s4 + $0x248] sm:$0xff] }
 0x2c1   : > { %7272 = vmatpush3.bf16.msra.mxu0 %v7269_v42  ;;  %6660 = vmatprep.mubr.f32.mxu1 %v5762_v26  ;;  %v2891_v42 = vld [vmem:[%s8799_s17 + $0x28] sm:$0xff]  ;;  %v7301_v0 = vpack.c.bf16 %v5876_v3, %v5875_v33  ;;  %v2893_v26 = vld [vmem:[%s8799_s17 + $0x38] sm:$0xff] }
 0x2c2   : > { %6772 = vmatprep.mubr.f32.mxu0 %v5795_v6  ;;  %7210 = vmatprep.subr.bf16.mxu1 %v7209_v43  ;;  %v2894_v6 = vld [vmem:[%s8799_s17 + $0x40] sm:$0xff] }
 0x2c3   : > { %6661 = vmatmul.mubr.f32.gmra.mrb[8].mxu1 %v5763_v21  ;;  %7274 = vmatprep.subr.bf16.mxu0 %v7273_v8  ;;  %v5880_v21 = vld [vmem:[%s9609_s4 + $0x258] sm:$0xff] }
 0x2c4   : > { %6773 = vmatmul.mubr.f32.gmra.mrb[8].mxu0 %v5796_v63  ;;  %7212 = vmatpush3.bf16.msra.mxu1 %v7209_v43  ;;  %v5827_v43 = vld [vmem:[%s8799_s17 + $0x3b] sm:$0xff]  ;;  %v2896_v63 = vld [vmem:[%s8799_s17 + $0x50] sm:$0xff] }
 0x2c5   : > { %7276 = vmatpush3.bf16.msra.mxu0 %v7273_v8  ;;  %6663 = vmatprep.mubr.f32.mxu1 %v5764_v11  ;;  %v7305_v8 = vpack.c.bf16 %v5878_v4, %v5877_v54  ;;  %v7309_v11 = vpack.c.bf16 %v5880_v21, %v5879_v44 }
 0x2c6   : > { %6775 = vmatprep.mubr.f32.mxu0 %v5797_v39  ;;  %7214 = vmatprep.subr.bf16.mxu1 %v7213_v12  ;;  %v5881_v39 = vld [vmem:[%s9609_s4 + $0x260] sm:$0xff] }
 0x2c7   : > { %6664 = vmatmul.mubr.f32.gmra.mrb[10].mxu1 %v5765_v34  ;;  %7278 = vmatprep.subr.bf16.mxu0 %v7277_v7  ;;  %v2898_v34 = vld [vmem:[%s8799_s17 + $0x60] sm:$0xff] }
 0x2c8   : > { %6776 = vmatmul.mubr.f32.gmra.mrb[10].mxu0 %v5798_v15  ;;  %7216 = vmatpush3.bf16.msra.mxu1 %v7213_v12  ;;  %v5830_v12 = vld [vmem:[%s8799_s17 + $0x53] sm:$0xff] }
 0x2c9   : > { %7280 = vmatpush3.bf16.msra.mxu0 %v7277_v7  ;;  %6666 = vmatprep.mubr.f32.mxu1 %v5766_v20  ;;  %v5882_v7 = vld [vmem:[%s9609_s4 + $0x268] sm:$0xff]  ;;  %v5883_v15 = vld [vmem:[%s9609_s4 + $0x270] sm:$0xff]  ;;  %v5884_v20 = vld [vmem:[%s9609_s4 + $0x278] sm:$0xff] }
 0x2ca   : > { %6778 = vmatprep.mubr.f32.mxu0 %v5799_v27  ;;  %7218 = vmatprep.subr.bf16.mxu1 %v7217_v25  ;;  %v7313_v14 = vpack.c.bf16 %v5882_v7, %v5881_v39  ;;  %v5833_v27 = vld [vmem:[%s8799_s17 + $0x6b] sm:$0xff]  ;;  %v7317_v28 = vpack.c.bf16 %v5884_v20, %v5883_v15  ;;  %v9088_v39 = vld [vmem:[%s9610_s5] ss:$0 sm:$0xff] }
 0x2cb   : > { %6667 = vmatmul.mubr.f32.gmra.mrb[12].mxu1 %v5767_v16  ;;  %7282 = vmatprep.subr.bf16.mxu0 %v7281_v51  ;;  %v2901_v16 = vld [vmem:[%s8799_s17 + $0x78] sm:$0xff] }
 0x2cc   : > { %6779 = vmatmul.mubr.f32.gmra.mrb[12].mxu0 %v5800_v23  ;;  %7220 = vmatpush3.bf16.msra.mxu1 %v7217_v25  ;;  %v2899_v25 = vld [vmem:[%s8799_s17 + $0x68] sm:$0xff] }
 0x2cd   : > { %7284 = vmatpush3.bf16.msra.mxu0 %v7281_v51  ;;  %6669 = vmatprep.mubr.f32.mxu1 %v5768_v30  ;;  %v2900_v51 = vld [vmem:[%s8799_s17 + $0x70] sm:$0xff]  ;;  %v5861_v23 = vld [vmem:[%s8799_s17 + $0x44] sm:$0xff] }
 0x2ce   : > { %6781 = vmatprep.mubr.f32.mxu0 %v5801_v53  ;;  %7222 = vmatprep.subr.bf16.mxu1 %v7221_v32  ;;  %v5862_v30 = vld [vmem:[%s8799_s17 + $0x4c] sm:$0xff]  ;;  %v5863_v53 = vld [vmem:[%s8799_s17 + $0x54] sm:$0xff] }
 0x2cf   : > { %6670 = vmatmul.mubr.f32.gmra.mrb[14].mxu1 %v5769_v60  ;;  %7286 = vmatprep.subr.bf16.mxu0 %v7285_v50  ;;  %v5865_v60 = vld [vmem:[%s8799_s17 + $0x64] sm:$0xff] }
 0x2d0   : > { %6782 = vmatmul.mubr.f32.gmra.mrb[14].mxu0 %v5802_v36  ;;  %7224 = vmatpush3.bf16.msra.mxu1 %v7221_v32  ;;  %v5854_v32 = vld [vmem:[%s8799_s17 + $0xc] sm:$0xff]  ;;  %v5857_v36 = vld [vmem:[%s8799_s17 + $0x24] sm:$0xff] }
 0x2d1   : > { %7288 = vmatpush3.bf16.msra.mxu0 %v7285_v50  ;;  %6704 = vmatprep.mubr.f32.mxu1 %v2886_v37  ;;  %v5855_v50 = vld [vmem:[%s8799_s17 + $0x14] sm:$0xff]  ;;  %v5866_v37 = vld [vmem:[%s8799_s17 + $0x6c] sm:$0xff] }
 0x2d2   : > { %6816 = vmatprep.mubr.f32.mxu0 %v5820_v45  ;;  %7290 = vmatprep.subr.bf16.mxu0 %v7289_v41  ;;  %v5867_v45 = vld [vmem:[%s8799_s17 + $0x74] sm:$0xff] }
 0x2d3   : > { %6705 = vmatmul.mubr.f32.vlgmr.msra.gmra.mrb[0].mxu1 %v2887_v17  ;;  %7589 = vmatprep.subr.bf16.mxu1 %v7289_v41  ;;  %v5860_v17 = vld [vmem:[%s8799_s17 + $0x3c] sm:$0xff] }
 0x2d4   : > { %6817 = vmatmul.mubr.f32.vlgmr.msra.gmra.mrb[0].mxu0 %v5821_v22  ;;  %7597 = vmatpush3.bf16.msra.mxu1 %v7289_v41 }
 0x2d5   : > { %7292 = vmatpush3.bf16.msra.mxu0 %v7289_v41  ;;  %6707 = vmatprep.mubr.f32.mxu1 %v2888_v52  ;;  %v5858_v41 = vld [vmem:[%s8799_s17 + $0x2c] sm:$0xff] }
 0x2d6   : > { %6819 = vmatprep.mubr.f32.mxu0 %v5822_v56  ;;  %7294 = vmatprep.subr.bf16.mxu0 %v7293_v55 }
 0x2d7   : > { %6708 = vmatmul.mubr.f32.gmra.mrb[2].mxu1 %v2889_v38  ;;  %7590 = vmatprep.subr.bf16.mxu1 %v7293_v55 }
 0x2d8   : > { %6820 = vmatmul.mubr.f32.gmra.mrb[2].mxu0 %v5823_v61  ;;  %7598 = vmatpush3.bf16.msra.mxu1 %v7293_v55 }
 0x2d9   : > { %7296 = vmatpush3.bf16.msra.mxu0 %v7293_v55  ;;  %6710 = vmatprep.mubr.f32.mxu1 %v2890_v19 }
 0x2da   : > { %6822 = vmatprep.mubr.f32.mxu0 %v5824_v58  ;;  %7298 = vmatprep.subr.bf16.mxu0 %v7297_v48 }
 0x2db   : > { %6711 = vmatmul.mubr.f32.gmra.mrb[4].mxu1 %v2891_v42  ;;  %7591 = vmatprep.subr.bf16.mxu1 %v7297_v48 }
 0x2dc   : > { %6823 = vmatmul.mubr.f32.gmra.mrb[4].mxu0 %v5825_v62  ;;  %7599 = vmatpush3.bf16.msra.mxu1 %v7297_v48 }
 0x2dd   : > { %7300 = vmatpush3.bf16.msra.mxu0 %v7297_v48  ;;  %6713 = vmatprep.mubr.f32.mxu1 %v2892_v18 }
 0x2de   : > { %6825 = vmatprep.mubr.f32.mxu0 %v5826_v5  ;;  %7302 = vmatprep.subr.bf16.mxu0 %v7301_v0 }
 0x2df   : > { %6714 = vmatmul.mubr.f32.gmra.mrb[6].mxu1 %v2893_v26  ;;  %7592 = vmatprep.subr.bf16.mxu1 %v7301_v0 }
 0x2e0   : > { %6826 = vmatmul.mubr.f32.gmra.mrb[6].mxu0 %v5827_v43  ;;  %7600 = vmatpush3.bf16.msra.mxu1 %v7301_v0 }
 0x2e1   : > { %7304 = vmatpush3.bf16.msra.mxu0 %v7301_v0  ;;  %6716 = vmatprep.mubr.f32.mxu1 %v2894_v6 }
 0x2e2   : > { %6828 = vmatprep.mubr.f32.mxu0 %v5828_v9  ;;  %7306 = vmatprep.subr.bf16.mxu0 %v7305_v8 }
 0x2e3   : > { %6717 = vmatmul.mubr.f32.gmra.mrb[8].mxu1 %v2895_v2  ;;  %7593 = vmatprep.subr.bf16.mxu1 %v7305_v8 }
 0x2e4   : > { %6829 = vmatmul.mubr.f32.gmra.mrb[8].mxu0 %v5829_v1  ;;  %7601 = vmatpush3.bf16.msra.mxu1 %v7305_v8 }
 0x2e5   : > { %7308 = vmatpush3.bf16.msra.mxu0 %v7305_v8  ;;  %6719 = vmatprep.mubr.f32.mxu1 %v2896_v63 }
 0x2e6   : > { %6831 = vmatprep.mubr.f32.mxu0 %v5830_v12  ;;  %7310 = vmatprep.subr.bf16.mxu0 %v7309_v11 }
 0x2e7   : > { %6720 = vmatmul.mubr.f32.gmra.mrb[10].mxu1 %v2897_v13  ;;  %7594 = vmatprep.subr.bf16.mxu1 %v7309_v11 }
 0x2e8   : > { %6832 = vmatmul.mubr.f32.gmra.mrb[10].mxu0 %v5831_v31  ;;  %7602 = vmatpush3.bf16.msra.mxu1 %v7309_v11 }
 0x2e9   : > { %7312 = vmatpush3.bf16.msra.mxu0 %v7309_v11  ;;  %6722 = vmatprep.mubr.f32.mxu1 %v2898_v34 }
 0x2ea   : > { %6834 = vmatprep.mubr.f32.mxu0 %v5832_v10  ;;  %7314 = vmatprep.subr.bf16.mxu0 %v7313_v14 }
 0x2eb   : > { %6723 = vmatmul.mubr.f32.gmra.mrb[12].mxu1 %v2899_v25  ;;  %7595 = vmatprep.subr.bf16.mxu1 %v7313_v14 }
 0x2ec   : > { %6835 = vmatmul.mubr.f32.gmra.mrb[12].mxu0 %v5833_v27  ;;  %7603 = vmatpush3.bf16.msra.mxu1 %v7313_v14 }
 0x2ed   : > { %7316 = vmatpush3.bf16.msra.mxu0 %v7313_v14  ;;  %6725 = vmatprep.mubr.f32.mxu1 %v2900_v51 }
 0x2ee   : > { %6837 = vmatprep.mubr.f32.mxu0 %v5834_v29  ;;  %7318 = vmatprep.subr.bf16.mxu0 %v7317_v28 }
 0x2ef   : > { %6726 = vmatmul.mubr.f32.gmra.mrb[14].mxu1 %v2901_v16  ;;  %7596 = vmatprep.subr.bf16.mxu1 %v7317_v28 }
 0x2f0   : > { %6838 = vmatmul.mubr.f32.gmra.mrb[14].mxu0 %v5835_v35  ;;  %7604 = vmatpush3.bf16.msra.mxu1 %v7317_v28 }
 0x2f1   : > { %7320 = vmatpush3.bf16.msra.mxu0 %v7317_v28  ;;  %6872 = vmatprep.mubr.f32.mxu0 %v5853_v40 }
 0x2f2   : > { %6884 = vmatprep.mubr.f32.mxu1 %v5861_v23 }
 0x2f3   : > { %6885 = vmatmul.mubr.f32.vlgmr.msra.gmra.mrb[16].mxu1 %v5862_v30 }
 0x2f4   : > { %6873 = vmatmul.mubr.f32.vlgmr.msra.gmra.mrb[0].mxu0 %v5854_v32  ;;  %6887 = vmatprep.mubr.f32.mxu1 %v5863_v53 }
 0x2f5   : > { %6875 = vmatprep.mubr.f32.mxu0 %v5855_v50 }
 0x2f7   : > { %6888 = vmatmul.mubr.f32.gmra.mrb[18].mxu1 %v5864_v59 }
 0x2f8   : > { %6876 = vmatmul.mubr.f32.gmra.mrb[2].mxu0 %v5856_v24  ;;  %6890 = vmatprep.mubr.f32.mxu1 %v5865_v60 }
 0x2f9   : > { %6878 = vmatprep.mubr.f32.mxu0 %v5857_v36 }
 0x2fb   : > { %6891 = vmatmul.mubr.f32.gmra.mrb[20].mxu1 %v5866_v37 }
 0x2fc   : > { %6879 = vmatmul.mubr.f32.gmra.mrb[4].mxu0 %v5858_v41  ;;  %6893 = vmatprep.mubr.f32.mxu1 %v5867_v45 }
 0x2fd   : > { %6881 = vmatprep.mubr.f32.mxu0 %v5859_v46 }
 0x2ff   : > { %6894 = vmatmul.mubr.f32.gmra.mrb[22].mxu1 %v5868_v49 }
 0x300   : > { %6882 = vmatmul.mubr.f32.gmra.mrb[6].mxu0 %v5860_v17 }
 0x3a6   : > { %v6706_v22 = vpop.f32.mrb[0].mxu1 }
 0x3a7   : > { %v3164_v52 = vpop.f32.mrb[1].mxu1 }
 0x3aa   : > { %v6709_v55 = vpop.f32.mrb[2].mxu1 }
 0x3ab   : > { %v9067_v56 = vpop.f32.mrb[3].mxu1 }
 0x3ae   : > { %v9069_v47 = vpop.f32.mrb[4].mxu1 }
 0x3af   : > { %v9071_v57 = vpop.f32.mrb[5].mxu1 }
 0x3b2   : > { %v9073_v38 = vpop.f32.mrb[6].mxu1 }
 0x3b3   : > { %v9075_v61 = vpop.f32.mrb[7].mxu1 }
 0x3b6   : > { %v6718_v19 = vpop.f32.mrb[8].mxu1 }
 0x3b7   : > { %v6830_v48 = vpop.f32.mrb[8].mxu0  ;;  %v3204_v58 = vpop.f32.mrb[9].mxu1 }
 0x3b8   : > { %v7613_v33 = vadd.f32 %v6830_v48, %v6718_v19  ;;  %v3580_v3 = vpop.f32.mrb[9].mxu0 }
 0x3b9   : > { %v7615_v42 = vadd.f32 %v3580_v3, %v3204_v58 }
 0x3ba   : > { %v6721_v62 = vpop.f32.mrb[10].mxu1 }
 0x3bb   : > { %v6833_v18 = vpop.f32.mrb[10].mxu0  ;;  %v3214_v0 = vpop.f32.mrb[11].mxu1 }
 0x3bc   : > { %v7617_v5 = vadd.f32 %v6833_v18, %v6721_v62  ;;  %v3590_v54 = vpop.f32.mrb[11].mxu0 }
 0x3bd   : > { %v7619_v4 = vadd.f32 %v3590_v54, %v3214_v0 }
 0x3be   : > { %v6724_v26 = vpop.f32.mrb[12].mxu1 }
 0x3bf   : > { %v6836_v43 = vpop.f32.mrb[12].mxu0  ;;  %v3224_v6 = vpop.f32.mrb[13].mxu1 }
 0x3c0   : > { %v9077_v8 = vadd.f32 %v6836_v43, %v6724_v26  ;;  %v3600_v9 = vpop.f32.mrb[13].mxu0 }
 0x3c1   : > { %v9079_v44 = vadd.f32 %v3600_v9, %v3224_v6 }
 0x3c2   : > { %v6727_v21 = vpop.f32.mrb[14].mxu1 }
 0x3c3   : > { %v6839_v2 = vpop.f32.mrb[14].mxu0  ;;  %v3234_v1 = vpop.f32.mrb[15].mxu1 }
 0x3c4   : > { %v9081_v63 = vadd.f32 %v6839_v2, %v6727_v21  ;;  %v3610_v11 = vpop.f32.mrb[15].mxu0 }
 0x3c5   : > { %v9083_v12 = vadd.f32 %v3610_v11, %v3234_v1 }
 0x3c6   : > { %v6886_v7 = vpop.f32.mrb[16].mxu1 }
 0x3c7   : > { %v6874_v13 = vpop.f32.mrb[0].mxu0  ;;  %v7614_v31 = vadd.f32 %v7613_v33, %v6886_v7  ;;  %v3776_v34 = vpop.f32.mrb[17].mxu1 }
 0x3c8   : > { %v7605_v14 = vadd.f32 %v6874_v13, %v6706_v22  ;;  %v3736_v10 = vpop.f32.mrb[1].mxu0  ;;  %v7616_v15 = vadd.f32 %v7615_v42, %v3776_v34 }
 0x3c9   : > { %v3847_v20 = vadd.f32 %v7614_v31, %v9088_v39  ;;  %v7606_v25 = vadd.f32 %v3736_v10, %v3164_v52 }
 0x3ca   : > { %v3839_v27 = vadd.f32 %v7605_v14, %v9088_v39  ;;  %v3846_v51 = vadd.f32 %v7616_v15, %v9088_v39  ;;  %v6889_v28 = vpop.f32.mrb[18].mxu1 }
 0x3cb   : > { %v3863_v29 = vmax.f32 %v3847_v20, 0.0  ;;  %v3838_v16 = vadd.f32 %v7606_v25, %v9088_v39  ;;  %v6877_v35 = vpop.f32.mrb[2].mxu0  ;;  %v7618_v40 = vadd.f32 %v7617_v5, %v6889_v28  ;;  %v3786_v23 = vpop.f32.mrb[19].mxu1 }
 0x3cc   : > { %v3855_v30 = vmax.f32 %v3839_v27, 0.0  ;;  %v3862_v32 = vmax.f32 %v3846_v51, 0.0  ;;  %v9094_v53 = vadd.f32 %v6877_v35, %v6709_v55  ;;  %v9096_v50 = vpop.f32.mrb[3].mxu0  ;;  %v9098_v59 = vadd.f32 %v7619_v4, %v3786_v23 }
 0x3cd   : > { %v3895_v24 = vcombine.high %v3863_v29, %v3863_v29  ;;  %v4044_v60 = vsel %vm184_vm0, %v3863_v29, -inf  ;;  %v3854_v36 = vmax.f32 %v3838_v16, 0.0  ;;  %v9102_v37 = vadd.f32 %v7618_v40, %v9088_v39 }
 0x3ce   : > { %v3887_v41 = vcombine.high %v3855_v30, %v3855_v30  ;;  %v3932_v45 = vsel %vm184_vm0, %v3855_v30, -inf  ;;  %v4045_v46 = vrot.slane %v4044_v60, 4  ;;  %v3894_v49 = vcombine.high %v3862_v32, %v3862_v32  ;;  %v9105_v17 = vpop.f32.mrb[20].mxu1 }
 0x3cf   : > { %v3933_v22 = vrot.slane %v3932_v45, 4  ;;  %v4051_v52 = vsel %vm184_vm0, %v3895_v24, -inf  ;;  %v3886_v55 = vcombine.high %v3854_v36, %v3854_v36  ;;  %v3918_v19 = vsel %vm184_vm0, %v3854_v36, -inf  ;;  %v9109_v48 = vpop.f32.mrb[4].mxu0  ;;  %v9111_v58 = vpop.f32.mrb[21].mxu1 }
 0x3d0   : > { %v3939_v33 = vsel %vm184_vm0, %v3887_v41, -inf  ;;  %v4046_v3 = vmax.f32 %v4044_v60, %v4045_v46  ;;  %v4052_v42 = vrot.slane %v4051_v52, 4  ;;  %v3919_v62 = vrot.slane %v3918_v19, 4  ;;  %v9114_v18 = vpop.f32.mrb[5].mxu0 }
 0x3d1   : > { %v3934_v0 = vmax.f32 %v3932_v45, %v3933_v22  ;;  %v3940_v5 = vrot.slane %v3939_v33, 4  ;;  %v3925_v54 = vsel %vm184_vm0, %v3886_v55, -inf  ;;  %v4030_v4 = vsel %vm184_vm0, %v3862_v32, -inf }
 0x3d2   : > { %v4047_v26 = vrot.slane %v4046_v3, 2  ;;  %v4053_v43 = vmax.f32 %v4051_v52, %v4052_v42  ;;  %v3920_v6 = vmax.f32 %v3918_v19, %v3919_v62  ;;  %v3926_v9 = vrot.slane %v3925_v54, 4  ;;  %v9118_v21 = vpop.f32.mrb[22].mxu1 }
 0x3d3   : > { %v3935_v2 = vrot.slane %v3934_v0, 2  ;;  %v3941_v1 = vmax.f32 %v3939_v33, %v3940_v5  ;;  %v4031_v11 = vrot.slane %v4030_v4, 4  ;;  %v4037_v7 = vsel %vm184_vm0, %v3894_v49, -inf  ;;  %v9121_v13 = vpop.f32.mrb[6].mxu0  ;;  %v9123_v31 = vpop.f32.mrb[23].mxu1 }
 0x3d4   : > { %v4048_v34 = vmax.f32 %v4046_v3, %v4047_v26  ;;  %v4054_v14 = vrot.slane %v4053_v43, 2  ;;  %v3921_v10 = vrot.slane %v3920_v6, 2  ;;  %v3927_v15 = vmax.f32 %v3925_v54, %v3926_v9  ;;  %v9125_v20 = vpop.f32.mrb[7].mxu0 }
 0x3d5   : > { %v3936_v25 = vmax.f32 %v3934_v0, %v3935_v2  ;;  %v3942_v27 = vrot.slane %v3941_v1, 2  ;;  %v4032_v51 = vmax.f32 %v4030_v4, %v4031_v11  ;;  %v4038_v28 = vrot.slane %v4037_v7, 4 }
 0x3d6   : > { %v4049_v29 = vrot.slane %v4048_v34, 1  ;;  %v4055_v16 = vmax.f32 %v4053_v43, %v4054_v14  ;;  %v3922_v35 = vmax.f32 %v3920_v6, %v3921_v10  ;;  %v3928_v40 = vrot.slane %v3927_v15, 2 }
 0x3d7   : > { %v3937_v23 = vrot.slane %v3936_v25, 1  ;;  %v3943_v30 = vmax.f32 %v3941_v1, %v3942_v27  ;;  %v4033_v32 = vrot.slane %v4032_v51, 2  ;;  %v4039_v24 = vmax.f32 %v4037_v7, %v4038_v28 }
 0x3d8   : > { %v4050_v60 = vmax.f32 %v4048_v34, %v4049_v29  ;;  %v4056_v36 = vrot.slane %v4055_v16, 1  ;;  %v3923_v41 = vrot.slane %v3922_v35, 1  ;;  %v3929_v45 = vmax.f32 %v3927_v15, %v3928_v40 }
 0x3d9   : > { %v3938_v46 = vmax.f32 %v3936_v25, %v3937_v23  ;;  %v3944_v49 = vrot.slane %v3943_v30, 1  ;;  %v4034_v22 = vmax.f32 %v4032_v51, %v4033_v32  ;;  %v4040_v52 = vrot.slane %v4039_v24, 2 }
 0x3da   : > { %v4057_v55 = vmax.f32 %v4055_v16, %v4056_v36  ;;  %v3924_v19 = vmax.f32 %v3922_v35, %v3923_v41  ;;  %v3930_v33 = vrot.slane %v3929_v45, 1  ;;  %v3841_v3 = vadd.f32 %v9094_v53, %v9088_v39 }
 0x3db   : > { %v3945_v42 = vmax.f32 %v3943_v30, %v3944_v49  ;;  %v4035_v62 = vrot.slane %v4034_v22, 1  ;;  %v4041_v0 = vmax.f32 %v4039_v24, %v4040_v52  ;;  %v3865_v5 = vmax.f32 %v9102_v37, 0.0 }
 0x3dc   : > { %v3931_v54 = vmax.f32 %v3929_v45, %v3930_v33  ;;  %v3857_v4 = vmax.f32 %v3841_v3, 0.0  ;;  %v7608_v26 = vadd.f32 %v9096_v50, %v9067_v56  ;;  %v3848_v43 = vadd.f32 %v9098_v59, %v9088_v39 }
 0x3dd   : > { %v4036_v6 = vmax.f32 %v4034_v22, %v4035_v62  ;;  %v4042_v9 = vrot.slane %v4041_v0, 1  ;;  %v3897_v2 = vcombine.high %v3865_v5, %v3865_v5  ;;  %v4072_v1 = vsel %vm184_vm0, %v3865_v5, -inf }
 0x3de   : > { %v4174_v53 = vsel %vm1667_vm2, %v3931_v54, %v3924_v19  ;;  %v3889_v11 = vcombine.high %v3857_v4, %v3857_v4  ;;  %v3960_v7 = vsel %vm184_vm0, %v3857_v4, -inf  ;;  %v4073_v34 = vrot.slane %v4072_v1, 4 }
 0x3df   : > { %v4175_v37 = vsel %vm1669_vm3, %v3938_v46, %v4174_v53  ;;  %v4043_v14 = vmax.f32 %v4041_v0, %v4042_v9  ;;  %v3961_v10 = vrot.slane %v3960_v7, 4  ;;  %v4079_v56 = vsel %vm184_vm0, %v3897_v2, -inf }
 0x3e0   : > { %v3967_v50 = vsel %vm184_vm0, %v3889_v11, -inf  ;;  %v4074_v59 = vmax.f32 %v4072_v1, %v4073_v34  ;;  %v4080_v15 = vrot.slane %v4079_v56, 4  ;;  %v3840_v25 = vadd.f32 %v7608_v26, %v9088_v39 }
 0x3e1   : > { %v4188_v27 = vsel %vm1667_vm2, %v4043_v14, %v4036_v6  ;;  %v3962_v51 = vmax.f32 %v3960_v7, %v3961_v10  ;;  %v3968_v28 = vrot.slane %v3967_v50, 4  ;;  %v9143_v29 = vsel %vm1671_vm4, %v3945_v42, %v4175_v37 }
 0x3e2   : > { %v4189_v16 = vsel %vm1669_vm3, %v4050_v60, %v4188_v27  ;;  %v4075_v35 = vrot.slane %v4074_v59, 2  ;;  %v4081_v40 = vmax.f32 %v4079_v56, %v4080_v15  ;;  %v3856_v23 = vmax.f32 %v3840_v25, 0.0 }
 0x3e3   : > { %v3963_v30 = vrot.slane %v3962_v51, 2  ;;  %v3969_v32 = vmax.f32 %v3967_v50, %v3968_v28  ;;  %v3864_v24 = vmax.f32 %v3848_v43, 0.0  ;;  %v9147_v36 = vsel %vm1671_vm4, %v4057_v55, %v4189_v16 }
 0x3e4   : > { %v4076_v41 = vmax.f32 %v4074_v59, %v4075_v35  ;;  %v4082_v45 = vrot.slane %v4081_v40, 2  ;;  %v3888_v46 = vcombine.high %v3856_v23, %v3856_v23  ;;  %v3946_v49 = vsel %vm184_vm0, %v3856_v23, -inf }
 0x3e5   : > { %v3964_v22 = vmax.f32 %v3962_v51, %v3963_v30  ;;  %v3970_v52 = vrot.slane %v3969_v32, 2  ;;  %v3947_v19 = vrot.slane %v3946_v49, 4  ;;  %v3896_v33 = vcombine.high %v3864_v24, %v3864_v24 }
 0x3e6   : > { %v4077_v3 = vrot.slane %v4076_v41, 1  ;;  %v4083_v60 = vmax.f32 %v4081_v40, %v4082_v45  ;;  %v3953_v42 = vsel %vm184_vm0, %v3888_v46, -inf  ;;  %v4058_v62 = vsel %vm184_vm0, %v3864_v24, -inf }
 0x3e7   : > { %v3965_v0 = vrot.slane %v3964_v22, 1  ;;  %v3971_v5 = vmax.f32 %v3969_v32, %v3970_v52  ;;  %v3948_v54 = vmax.f32 %v3946_v49, %v3947_v19  ;;  %v3954_v55 = vrot.slane %v3953_v42, 4 }
 0x3e8   : > { %v9152_v4 = vmax.f32 %v4076_v41, %v4077_v3  ;;  %v4084_v26 = vrot.slane %v4083_v60, 1  ;;  %v4059_v43 = vrot.slane %v4058_v62, 4  ;;  %v4065_v6 = vsel %vm184_vm0, %v3896_v33, -inf }
 0x3e9   : > { %v3966_v9 = vmax.f32 %v3964_v22, %v3965_v0  ;;  %v3972_v2 = vrot.slane %v3971_v5, 1  ;;  %v3949_v1 = vrot.slane %v3948_v54, 2  ;;  %v3955_v53 = vmax.f32 %v3953_v42, %v3954_v55 }
 0x3ea   : > { %v4085_v11 = vmax.f32 %v4083_v60, %v4084_v26  ;;  %v4060_v7 = vmax.f32 %v4058_v62, %v4059_v43  ;;  %v4066_v34 = vrot.slane %v4065_v6, 4  ;;  %v7609_v37 = vadd.f32 %v9109_v48, %v9069_v47 }
 0x3eb   : > { %v3973_v14 = vmax.f32 %v3971_v5, %v3972_v2  ;;  %v3950_v10 = vmax.f32 %v3948_v54, %v3949_v1  ;;  %v3956_v56 = vrot.slane %v3955_v53, 2  ;;  %v7622_v50 = vadd.f32 %v9077_v8, %v9105_v17 }
 0x3ec   : > { %v4061_v59 = vrot.slane %v4060_v7, 2  ;;  %v4067_v15 = vmax.f32 %v4065_v6, %v4066_v34  ;;  %v3843_v25 = vadd.f32 %v7609_v37, %v9088_v39  ;;  %v7610_v27 = vadd.f32 %v9114_v18, %v9071_v57 }
 0x3ed   : > { %v3951_v51 = vrot.slane %v3950_v10, 1  ;;  %v3957_v28 = vmax.f32 %v3955_v53, %v3956_v56  ;;  %v3851_v16 = vadd.f32 %v7622_v50, %v9088_v39  ;;  %v7624_v47 = vadd.f32 %v9079_v44, %v9111_v58 }
 0x3ee   : > { %v4062_v48 = vmax.f32 %v4060_v7, %v4061_v59  ;;  %v4068_v35 = vrot.slane %v4067_v15, 2  ;;  %v3859_v40 = vmax.f32 %v3843_v25, 0.0  ;;  %v3842_v8 = vadd.f32 %v7610_v27, %v9088_v39 }
 0x3ef   : > { %v3952_v17 = vmax.f32 %v3950_v10, %v3951_v51  ;;  %v3958_v23 = vrot.slane %v3957_v28, 1  ;;  %v3867_v30 = vmax.f32 %v3851_v16, 0.0  ;;  %v3850_v32 = vadd.f32 %v7624_v47, %v9088_v39 }
 0x3f0   : > { %v4063_v24 = vrot.slane %v4062_v48, 1  ;;  %v4069_v57 = vmax.f32 %v4067_v15, %v4068_v35  ;;  %v3891_v18 = vcombine.high %v3859_v40, %v3859_v40  ;;  %v3988_v41 = vsel %vm184_vm0, %v3859_v40, -inf }
 0x3f1   : > { %v3959_v45 = vmax.f32 %v3957_v28, %v3958_v23  ;;  %v4177_v44 = vsel %vm1673_vm5, %v3952_v17, %v9143_v29  ;;  %v3989_v58 = vrot.slane %v3988_v41, 4  ;;  %v3899_v46 = vcombine.high %v3867_v30, %v3867_v30 }
 0x3f2   : > { %v4064_v49 = vmax.f32 %v4062_v48, %v4063_v24  ;;  %v4070_v22 = vrot.slane %v4069_v57, 1  ;;  %v3995_v52 = vsel %vm184_vm0, %v3891_v18, -inf  ;;  %v4100_v19 = vsel %vm184_vm0, %v3867_v30, -inf }
 0x3f3   : > { %v4178_v33 = vsel %vm1675_vm6, %v3959_v45, %v4177_v44  ;;  %v3990_v3 = vmax.f32 %v3988_v41, %v3989_v58  ;;  %v3996_v60 = vrot.slane %v3995_v52, 4  ;;  %v4101_v42 = vrot.slane %v4100_v19, 4 }
 0x3f4   : > { %v4179_v29 = vsel %vm1677_vm7, %v3966_v9, %v4178_v33  ;;  %v4071_v62 = vmax.f32 %v4069_v57, %v4070_v22  ;;  %v4191_v0 = vsel %vm1673_vm5, %v4064_v49, %v9147_v36  ;;  %v4107_v5 = vsel %vm184_vm0, %v3899_v46, -inf }
 0x3f5   : > { %v4180_v54 = vsel %vm1679_vm8, %v3973_v14, %v4179_v29  ;;  %v3991_v55 = vrot.slane %v3990_v3, 2  ;;  %v3997_v26 = vmax.f32 %v3995_v52, %v3996_v60  ;;  %v4102_v43 = vmax.f32 %v4100_v19, %v4101_v42 }
 0x3f6   : > { %4207 = vst [vmem:[%s9177_s15] sm:$0xff] %v4180_v54  ;;  %v4192_v6 = vsel %vm1675_vm6, %v4071_v62, %v4191_v0  ;;  %v4108_v2 = vrot.slane %v4107_v5, 4  ;;  %v3858_v1 = vmax.f32 %v3842_v8, 0.0  ;;  %v3866_v53 = vmax.f32 %v3850_v32, 0.0 }
 0x3f7   : > { %v4193_v9 = vsel %vm1677_vm7, %v9152_v4, %v4192_v6  ;;  %v3992_v7 = vmax.f32 %v3990_v3, %v3991_v55  ;;  %v3998_v34 = vrot.slane %v3997_v26, 2  ;;  %v4103_v37 = vrot.slane %v4102_v43, 2 }
 0x3f8   : > { %v4194_v36 = vsel %vm1679_vm8, %v4085_v11, %v4193_v9  ;;  %v3890_v10 = vcombine.high %v3858_v1, %v3858_v1  ;;  %v3974_v14 = vsel %vm184_vm0, %v3858_v1, -inf  ;;  %v4109_v50 = vmax.f32 %v4107_v5, %v4108_v2 }
 0x3f9   : > { %4209 = vst [vmem:[%s9177_s15 + $0x10] sm:$0xff] %v4194_v36  ;;  %v3993_v56 = vrot.slane %v3992_v7, 1  ;;  %v3975_v59 = vrot.slane %v3974_v14, 4  ;;  %v3999_v15 = vmax.f32 %v3997_v26, %v3998_v34  ;;  %v3898_v27 = vcombine.high %v3866_v53, %v3866_v53 }
 0x3fa   : > { %v3981_v25 = vsel %vm184_vm0, %v3890_v10, -inf  ;;  %v4086_v51 = vsel %vm184_vm0, %v3866_v53, -inf  ;;  %v4104_v4 = vmax.f32 %v4102_v43, %v4103_v37  ;;  %v4110_v35 = vrot.slane %v4109_v50, 2 }
 0x3fb   : > { %v3976_v28 = vmax.f32 %v3974_v14, %v3975_v59  ;;  %v3982_v16 = vrot.slane %v3981_v25, 4  ;;  %v4087_v47 = vrot.slane %v4086_v51, 4  ;;  %v4093_v11 = vsel %vm184_vm0, %v3898_v27, -inf }
 0x3fc   : > { %v3994_v48 = vmax.f32 %v3992_v7, %v3993_v56  ;;  %v4094_v8 = vrot.slane %v4093_v11, 4  ;;  %v4000_v17 = vrot.slane %v3999_v15, 1  ;;  %v7611_v32 = vadd.f32 %v9121_v13, %v9073_v38 }
 0x3fd   : > { %v3977_v40 = vrot.slane %v3976_v28, 2  ;;  %v3983_v23 = vmax.f32 %v3981_v25, %v3982_v16  ;;  %v4088_v30 = vmax.f32 %v4086_v51, %v4087_v47  ;;  %v7626_v18 = vadd.f32 %v9081_v63, %v9118_v21 }
 0x3fe   : > { %v4095_v57 = vmax.f32 %v4093_v11, %v4094_v8  ;;  %v7612_v41 = vadd.f32 %v9125_v20, %v9075_v61  ;;  %v4105_v45 = vrot.slane %v4104_v4, 1  ;;  %v3845_v46 = vadd.f32 %v7611_v32, %v9088_v39 }
 0x3ff   : > { %v3978_v24 = vmax.f32 %v3976_v28, %v3977_v40  ;;  %v3984_v44 = vrot.slane %v3983_v23, 2  ;;  %v4089_v58 = vrot.slane %v4088_v30, 2  ;;  %v3853_v52 = vadd.f32 %v7626_v18, %v9088_v39 }
 0x400   : > { %v4096_v22 = vrot.slane %v4095_v57, 2  ;;  %v3844_v19 = vadd.f32 %v7612_v41, %v9088_v39  ;;  %v3861_v33 = vmax.f32 %v3845_v46, 0.0  ;;  %v7628_v63 = vadd.f32 %v9083_v12, %v9123_v31 }
 0x401   : > { %v3979_v49 = vrot.slane %v3978_v24, 1  ;;  %v3985_v38 = vmax.f32 %v3983_v23, %v3984_v44  ;;  %v4090_v13 = vmax.f32 %v4088_v30, %v4089_v58  ;;  %v4111_v21 = vmax.f32 %v4109_v50, %v4110_v35 }
 0x402   : > { %v4097_v3 = vmax.f32 %v4095_v57, %v4096_v22  ;;  %v3869_v61 = vmax.f32 %v3853_v52, 0.0  ;;  %v3860_v20 = vmax.f32 %v3844_v19, 0.0  ;;  %v3893_v29 = vcombine.high %v3861_v33, %v3861_v33 }
 0x403   : > { %v3986_v60 = vrot.slane %v3985_v38, 1  ;;  %v4091_v42 = vrot.slane %v4090_v13, 1  ;;  %v4016_v62 = vsel %vm184_vm0, %v3861_v33, -inf  ;;  %v4106_v0 = vmax.f32 %v4104_v4, %v4105_v45 }
 0x404   : > { %v4098_v5 = vrot.slane %v4097_v3, 1  ;;  %v4017_v54 = vrot.slane %v4016_v62, 4  ;;  %v3901_v55 = vcombine.high %v3869_v61, %v3869_v61  ;;  %v3980_v26 = vmax.f32 %v3978_v24, %v3979_v49 }
 0x405   : > { %v3987_v43 = vmax.f32 %v3985_v38, %v3986_v60  ;;  %v4023_v6 = vsel %vm184_vm0, %v3893_v29, -inf  ;;  %v4128_v2 = vsel %vm184_vm0, %v3869_v61, -inf  ;;  %v4092_v12 = vmax.f32 %v4090_v13, %v4091_v42 }
 0x406   : > { %v4099_v31 = vmax.f32 %v4097_v3, %v4098_v5  ;;  %v4018_v1 = vmax.f32 %v4016_v62, %v4017_v54  ;;  %v4024_v53 = vrot.slane %v4023_v6, 4  ;;  %v4112_v9 = vrot.slane %v4111_v21, 1 }
 0x407   : > { %v4181_v7 = vsel %vm1667_vm2, %v3987_v43, %v3980_v26  ;;  %v4135_v34 = vsel %vm184_vm0, %v3901_v55, -inf  ;;  %v3892_v36 = vcombine.high %v3860_v20, %v3860_v20  ;;  %v4001_v56 = vmax.f32 %v3999_v15, %v4000_v17 }
 0x408   : > { %v4182_v37 = vsel %vm1669_vm3, %v3994_v48, %v4181_v7  ;;  %v4195_v10 = vsel %vm1667_vm2, %v4099_v31, %v4092_v12  ;;  %v4025_v14 = vmax.f32 %v4023_v6, %v4024_v53  ;;  %v4129_v59 = vrot.slane %v4128_v2, 4 }
 0x409   : > { %v4196_v50 = vsel %vm1669_vm3, %v4106_v0, %v4195_v10  ;;  %v4002_v25 = vsel %vm184_vm0, %v3860_v20, -inf  ;;  %v4019_v27 = vrot.slane %v4018_v1, 2  ;;  %v4136_v51 = vrot.slane %v4135_v34, 4 }
 0x40a   : > { %v4003_v28 = vrot.slane %v4002_v25, 4  ;;  %v4009_v4 = vsel %vm184_vm0, %v3892_v36, -inf  ;;  %v4113_v16 = vmax.f32 %v4111_v21, %v4112_v9  ;;  %v4026_v47 = vrot.slane %v4025_v14, 2 }
 0x40b   : > { %v4010_v11 = vrot.slane %v4009_v4, 4  ;;  %v4183_v35 = vsel %vm1671_vm4, %v4001_v56, %v4182_v37  ;;  %v3852_v40 = vadd.f32 %v7628_v63, %v9088_v39  ;;  %v4130_v8 = vmax.f32 %v4128_v2, %v4129_v59  ;;  %v5886_v56 = vld [vmem:[%s9609_s4 + $0x80] sm:$0xff] (%p2879_p1) }
 0x40c   : > { %v4004_v48 = vmax.f32 %v4002_v25, %v4003_v28  ;;  %v4197_v17 = vsel %vm1671_vm4, %v4113_v16, %v4196_v50  ;;  %v4020_v23 = vmax.f32 %v4018_v1, %v4019_v27  ;;  %v4137_v30 = vmax.f32 %v4135_v34, %v4136_v51  ;;  %v5887_v50 = vld [vmem:[%s9609_s4 + $0x88] sm:$0xff] (%p2879_p1)  ;;  %v5902_v59 = vld [vmem:[%s9609_s4 + $0x100] sm:$0xff] (%p2879_p1)  ;;  %v5888_v51 = vld [vmem:[%s9609_s4 + $0x90] sm:$0xff] (%p2879_p1) }
 0x40d   : > { %v4011_v15 = vmax.f32 %v4009_v4, %v4010_v11  ;;  %v3868_v24 = vmax.f32 %v3852_v40, 0.0  ;;  %v4027_v57 = vmax.f32 %v4025_v14, %v4026_v47  ;;  %v4131_v58 = vrot.slane %v4130_v8, 2  ;;  %v5903_v27 = vld [vmem:[%s9609_s4 + $0x108] sm:$0xff] (%p2879_p1)  ;;  %v5889_v28 = vld [vmem:[%s9609_s4 + $0x98] sm:$0xff] (%p2879_p1)  ;;  %v5904_v47 = vld [vmem:[%s9609_s4 + $0x110] sm:$0xff] (%p2879_p1) }
 0x40e   : > { %v4005_v32 = vrot.slane %v4004_v48, 2  ;;  %v4021_v22 = vrot.slane %v4020_v23, 1  ;;  %v4138_v52 = vrot.slane %v4137_v30, 2  ;;  %v7321_v25 = vpack.c.bf16 (%p2879_p1), %v5887_v50, %v5886_v56  ;;  %v5905_v11 = vld [vmem:[%s9609_s4 + $0x118] sm:$0xff] (%p2879_p1)  ;;  %v5891_v40 = vld [vmem:[%s9609_s4 + $0xa8] sm:$0xff] (%p2879_p1)  ;;  %v4229_v56 = vld [vmem:[%s9609_s4 + $0x20] sm:$0xff] (%p2879_p1) }
 0x40f   : > { %v4012_v18 = vrot.slane %v4011_v15, 2  ;;  %v3900_v45 = vcombine.high %v3868_v24, %v3868_v24  ;;  %v4114_v44 = vsel %vm184_vm0, %v3868_v24, -inf  ;;  %v4028_v38 = vrot.slane %v4027_v57, 1  ;;  %v5908_v24 = vld [vmem:[%s9609_s4 + $0x130] sm:$0xff] (%p2879_p1)  ;;  %v4230_v50 = vld [vmem:[%s9609_s4 + $0x28] sm:$0xff] (%p2879_p1) }
 0x410   : > { %v4006_v41 = vmax.f32 %v4004_v48, %v4005_v32  ;;  %v4115_v49 = vrot.slane %v4114_v44, 4  ;;  %v4022_v60 = vmax.f32 %v4020_v23, %v4021_v22  ;;  %v4132_v42 = vmax.f32 %v4130_v8, %v4131_v58  ;;  %7322 = vmatprep.subr.bf16.mxu1 (%p2879_p1), %v7321_v25  ;;  %v5906_v8 = vld [vmem:[%s9609_s4 + $0x120] sm:$0xff] (%p2879_p1)  ;;  %v5893_v32 = vld [vmem:[%s9609_s4 + $0xb8] sm:$0xff] (%p2879_p1) }
 0x411   : > { %v4013_v46 = vmax.f32 %v4011_v15, %v4012_v18  ;;  %v4121_v19 = vsel %vm184_vm0, %v3900_v45, -inf  ;;  %v4139_v29 = vmax.f32 %v4137_v30, %v4138_v52  ;;  %v4029_v0 = vmax.f32 %v4027_v57, %v4028_v38  ;;  %v5907_v15 = vld [vmem:[%s9609_s4 + $0x128] sm:$0xff] (%p2879_p1)  ;;  %7324 = vmatpush3.bf16.msra.mxu1 (%p2879_p1), %v7321_v25  ;;  %v5892_v30 = vld [vmem:[%s9609_s4 + $0xb0] sm:$0xff] (%p2879_p1)  ;;  %v5909_v57 = vld [vmem:[%s9609_s4 + $0x138] sm:$0xff] (%p2879_p1) }
 0x412   : > { %v4007_v39 = vrot.slane %v4006_v41, 1  ;;  %v4116_v33 = vmax.f32 %v4114_v44, %v4115_v49  ;;  %v4122_v63 = vrot.slane %v4121_v19, 4  ;;  %v4133_v12 = vrot.slane %v4132_v42, 1  ;;  %v5894_v45 = vld [vmem:[%s9609_s4 + $0xc0] sm:$0xff] (%p2879_p1)  ;;  %v5895_v44 = vld [vmem:[%s9609_s4 + $0xc8] sm:$0xff] (%p2879_p1)  ;;  %v4241_v58 = vld [vmem:[#allocation2 + $0x181] sm:$0xff] (%p2879_p1) }
 0x413   : > { %v4014_v13 = vrot.slane %v4013_v46, 1  ;;  %v4140_v31 = vrot.slane %v4139_v29, 1  ;;  %v7385_v4 = vpack.c.bf16 (%p2879_p1), %v5903_v27, %v5902_v59  ;;  %v7325_v16 = vpack.c.bf16 (%p2879_p1), %v5889_v28, %v5888_v51  ;;  %v5911_v49 = vld [vmem:[%s9609_s4 + $0x148] sm:$0xff] (%p2879_p1)  ;;  %6928 = vmatprep.mubr.f32.mxu1 (%p2879_p1), %v4241_v58  ;;  %v4542_v22 = vld [vmem:[#allocation2 + $0x182] sm:$0xff] (%p2879_p1)  ;;  %v5922_v25 = vld [vmem:[%s9609_s4 + $0x1a0] sm:$0xff] (%p2879_p1) }
 0x414   : > { %v4008_v21 = vmax.f32 %v4006_v41, %v4007_v39  ;;  %v4117_v61 = vrot.slane %v4116_v33, 2  ;;  %v4123_v20 = vmax.f32 %v4121_v19, %v4122_v63  ;;  %v4134_v34 = vmax.f32 %v4132_v42, %v4133_v12  ;;  %7034 = vmatprep.mubr.f32.mxu0 (%p2879_p1), %v4542_v22  ;;  %v5896_v19 = vld [vmem:[%s9609_s4 + $0xd0] sm:$0xff] (%p2879_p1)  ;;  %v5897_v38 = vld [vmem:[%s9609_s4 + $0xd8] sm:$0xff] (%p2879_p1)  ;;  %v5919_v12 = vld [vmem:[%s9609_s4 + $0x188] sm:$0xff] (%p2879_p1) }
 0x415   : > { %v4015_v3 = vmax.f32 %v4013_v46, %v4014_v13  ;;  %v4141_v36 = vmax.f32 %v4139_v29, %v4140_v31  ;;  %v7389_v48 = vpack.c.bf16 (%p2879_p1), %v5905_v11, %v5904_v47  ;;  %7386 = vmatprep.subr.bf16.mxu0 (%p2879_p1), %v7385_v4  ;;  %7326 = vmatprep.subr.bf16.mxu1 (%p2879_p1), %v7325_v16  ;;  %v5910_v46 = vld [vmem:[%s9609_s4 + $0x140] sm:$0xff] (%p2879_p1)  ;;  %v5912_v13 = vld [vmem:[%s9609_s4 + $0x150] sm:$0xff] (%p2879_p1)  ;;  %v5923_v27 = vld [vmem:[%s9609_s4 + $0x1a8] sm:$0xff] (%p2879_p1) }
 0x416   : > { %v4184_v62 = vsel %vm1673_vm5, %v4008_v21, %v4183_v35  ;;  %v4118_v54 = vmax.f32 %v4116_v33, %v4117_v61  ;;  %v4124_v55 = vrot.slane %v4123_v20, 2  ;;  %v5890_v35 = vld [vmem:[%s9609_s4 + $0xa0] sm:$0xff] (%p2879_p1)  ;;  %7388 = vmatpush3.bf16.msra.mxu0 (%p2879_p1), %v7385_v4  ;;  %v7393_v23 = vpack.c.bf16 (%p2879_p1), %v5907_v15, %v5906_v8  ;;  %7328 = vmatpush3.bf16.msra.mxu1 (%p2879_p1), %v7325_v16  ;;  %v5913_v33 = vld [vmem:[%s9609_s4 + $0x158] sm:$0xff] (%p2879_p1)  ;;  %v5899_v61 = vld [vmem:[%s9609_s4 + $0xe8] sm:$0xff] (%p2879_p1) }
 0x417   : > { %v4185_v5 = vsel %vm1675_vm6, %v4015_v3, %v4184_v62  ;;  %7390 = vmatprep.subr.bf16.mxu0 (%p2879_p1), %v7389_v48  ;;  %v7333_v18 = vpack.c.bf16 (%p2879_p1), %v5893_v32, %v5892_v30  ;;  %v7397_v41 = vpack.c.bf16 (%p2879_p1), %v5909_v57, %v5908_v24  ;;  %v7337_v52 = vpack.c.bf16 (%p2879_p1), %v5895_v44, %v5894_v45  ;;  %v5898_v3 = vld [vmem:[%s9609_s4 + $0xe0] sm:$0xff] (%p2879_p1)  ;;  %v5900_v62 = vld [vmem:[%s9609_s4 + $0xf0] sm:$0xff] (%p2879_p1)  ;;  %v5925_v8 = vld [vmem:[%s9609_s4 + $0x1b8] sm:$0xff] (%p2879_p1) }
 0x418   : > { %v4186_v26 = vsel %vm1677_vm7, %v4022_v60, %v4185_v5  ;;  %v4119_v6 = vrot.slane %v4118_v54, 1  ;;  %v4125_v2 = vmax.f32 %v4123_v20, %v4124_v55  ;;  %v7401_v39 = vpack.c.bf16 (%p2879_p1), %v5911_v49, %v5910_v46  ;;  %v5914_v20 = vld [vmem:[%s9609_s4 + $0x160] sm:$0xff] (%p2879_p1)  ;;  %v5915_v60 = vld [vmem:[%s9609_s4 + $0x168] sm:$0xff] (%p2879_p1)  ;;  %v5916_v5 = vld [vmem:[%s9609_s4 + $0x170] sm:$0xff] (%p2879_p1) }
 0x419   : > { %v4187_v43 = vsel %vm1679_vm8, %v4029_v0, %v4186_v26  ;;  %v7341_v63 = vpack.c.bf16 (%p2879_p1), %v5897_v38, %v5896_v19  ;;  %v7405_v21 = vpack.c.bf16 (%p2879_p1), %v5913_v33, %v5912_v13  ;;  %v7345_v42 = vpack.c.bf16 (%p2879_p1), %v5899_v61, %v5898_v3  ;;  %v5901_v0 = vld [vmem:[%s9609_s4 + $0xf8] sm:$0xff] (%p2879_p1)  ;;  %v4243_v59 = vld [vmem:[#allocation2 + $0x191] sm:$0xff] (%p2879_p1)  ;;  %v4244_v28 = vld [vmem:[#allocation2 + $0x199] sm:$0xff] (%p2879_p1) }
 0x41a   : > { %4208 = vst [vmem:[%s9177_s15 + $0x8] sm:$0xff] %v4187_v43  ;;  %v4120_v1 = vmax.f32 %v4118_v54, %v4119_v6  ;;  %v4126_v53 = vrot.slane %v4125_v2, 1  ;;  %7392 = vmatpush3.bf16.msra.mxu0 (%p2879_p1), %v7389_v48  ;;  %v7409_v29 = vpack.c.bf16 (%p2879_p1), %v5915_v60, %v5914_v20  ;;  %v5917_v54 = vld [vmem:[%s9609_s4 + $0x178] sm:$0xff] (%p2879_p1)  ;;  %v7349_v55 = vpack.c.bf16 (%p2879_p1), %v5901_v0, %v5900_v62  ;;  %v4225_v43 = vld [vmem:[%s9609_s4] sm:$0xff] (%p2879_p1)  ;;  %v4226_v6 = vld [vmem:[%s9609_s4 + $0x8] sm:$0xff] (%p2879_p1) }
 0x41b   :  { %2881 = sbr.rel (!%p2879_p1) target bundleno = 656 (0x290), region = 102  ;;  %7394 = vmatprep.subr.bf16.mxu0 (%p2879_p1), %v7393_v23  ;;  %v7413_v26 = vpack.c.bf16 (%p2879_p1), %v5917_v54, %v5916_v5  ;;  %v7353_v31 = vpack.c.bf16 (%p2879_p1), %v4226_v6, %v4225_v43  ;;  %v4544_v51 = vld [vmem:[#allocation2 + $0x192] sm:$0xff] (%p2879_p1)  ;;  %v7361_v4 = vpack.c.bf16 (%p2879_p1), %v4230_v50, %v4229_v56  ;;  %v4545_v16 = vld [vmem:[#allocation2 + $0x19a] sm:$0xff] (%p2879_p1)  ;;  %v7425_v47 = vpack.c.bf16 (%p2879_p1), %v5923_v27, %v5922_v25  ;;  %v4546_v15 = vld [vmem:[#allocation2 + $0x1a2] sm:$0xff] (%p2879_p1) }
 0x41c   : > { %v4127_v9 = vmax.f32 %v4125_v2, %v4126_v53  ;;  %v4198_v7 = vsel %vm1673_vm5, %v4120_v1, %v4197_v17  ;;  %v7329_v17 = vpack.c.bf16 (%p2879_p1), %v5891_v40, %v5890_v35  ;;  %v5918_v2 = vld [vmem:[%s9609_s4 + $0x180] sm:$0xff] (%p2879_p1)  ;;  %v4227_v53 = vld [vmem:[%s9609_s4 + $0x10] sm:$0xff] (%p2879_p1)  ;;  %v4232_v35 = vld [vmem:[%s9609_s4 + $0x38] sm:$0xff] (%p2879_p1) }
 0x41d   :  { %v7417_v1 = vpack.c.bf16 (%p2879_p1), %v5919_v12, %v5918_v2  ;;  %v4231_v11 = vld [vmem:[%s9609_s4 + $0x30] sm:$0xff] (%p2879_p1)  ;;  %v4547_v30 = vld [vmem:[#allocation2 + $0x1aa] sm:$0xff] (%p2879_p1)  ;;  %v4234_v57 = vld [vmem:[%s9609_s4 + $0x48] sm:$0xff] (%p2879_p1) }
 0x41e   : > { %v4199_v37 = vsel %vm1675_vm6, %v4127_v9, %v4198_v7  ;;  %7330 = vmatprep.subr.bf16.mxu1 (%p2879_p1), %v7329_v17  ;;  %7396 = vmatpush3.bf16.msra.mxu0 (%p2879_p1), %v7393_v23  ;;  %v4228_v9 = vld [vmem:[%s9609_s4 + $0x18] sm:$0xff] (%p2879_p1)  ;;  %v5920_v7 = vld [vmem:[%s9609_s4 + $0x190] sm:$0xff] (%p2879_p1)  ;;  %v7365_v23 = vpack.c.bf16 (%p2879_p1), %v4232_v35, %v4231_v11  ;;  %v4233_v24 = vld [vmem:[%s9609_s4 + $0x40] sm:$0xff] (%p2879_p1) }
 0x41f   : > { %v4200_v10 = vsel %vm1677_vm7, %v4134_v34, %v4199_v37  ;;  %7332 = vmatpush3.bf16.msra.mxu1 (%p2879_p1), %v7329_v17  ;;  %7398 = vmatprep.subr.bf16.mxu0 (%p2879_p1), %v7397_v41  ;;  %v5921_v34 = vld [vmem:[%s9609_s4 + $0x198] sm:$0xff] (%p2879_p1)  ;;  %v5924_v40 = vld [vmem:[%s9609_s4 + $0x1b0] sm:$0xff] (%p2879_p1)  ;;  %v5927_v45 = vld [vmem:[%s9609_s4 + $0x1c8] sm:$0xff] (%p2879_p1)  ;;  %v7369_v46 = vpack.c.bf16 (%p2879_p1), %v4234_v57, %v4233_v24 }
 0x420   : > { %v4201_v14 = vsel %vm1679_vm8, %v4141_v36, %v4200_v10  ;;  %7334 = vmatprep.subr.bf16.mxu1 (%p2879_p1), %v7333_v18  ;;  %v4242_v36 = vld [vmem:[#allocation2 + $0x189] sm:$0xff] (%p2879_p1)  ;;  %v7357_v10 = vpack.c.bf16 (%p2879_p1), %v4228_v9, %v4227_v53  ;;  %v4245_v48 = vld [vmem:[#allocation2 + $0x1a1] sm:$0xff] (%p2879_p1)  ;;  %v7429_v32 = vpack.c.bf16 (%p2879_p1), %v5925_v8, %v5924_v40  ;;  %v4548_v44 = vld [vmem:[#allocation2 + $0x1b2] sm:$0xff] (%p2879_p1) }
 0x421   : > { %4210 = vst [vmem:[%s9177_s15 + $0x18] sm:$0xff] %v4201_v14  ;;  %v4543_v37 = vld [vmem:[#allocation2 + $0x18a] sm:$0xff] (%p2879_p1)  ;;  %v7421_v14 = vpack.c.bf16 (%p2879_p1), %v5921_v34, %v5920_v7  ;;  %v4248_v58 = vld [vmem:[#allocation2 + $0x1b9] sm:$0xff] (%p2879_p1)  ;;  %v4249_v19 = vld [vmem:[#allocation2 + $0x1c1] sm:$0xff] (%p2879_p1) }
 0x422   :  { %7400 = vmatpush3.bf16.msra.mxu0 %v7397_v41  ;;  %v4246_v17 = vld [vmem:[#allocation2 + $0x1a9] sm:$0xff]  ;;  %v4549_v49 = vld [vmem:[#allocation2 + $0x1ba] sm:$0xff]  ;;  %v4552_v0 = vld [vmem:[#allocation2 + $0x1d2] sm:$0xff] }
 0x423   :  { %7336 = vmatpush3.bf16.msra.mxu1 %v7333_v18  ;;  %7402 = vmatprep.subr.bf16.mxu0 %v7401_v39  ;;  %v4247_v18 = vld [vmem:[#allocation2 + $0x1b1] sm:$0xff]  ;;  %v5928_v38 = vld [vmem:[%s9609_s4 + $0x1d0] sm:$0xff]  ;;  %v5929_v13 = vld [vmem:[%s9609_s4 + $0x1d8] sm:$0xff] }
 0x424   :  { %7338 = vmatprep.subr.bf16.mxu1 %v7337_v52  ;;  %v5926_v41 = vld [vmem:[%s9609_s4 + $0x1c0] sm:$0xff]  ;;  %v4550_v33 = vld [vmem:[#allocation2 + $0x1c2] sm:$0xff]  ;;  %v7437_v61 = vpack.c.bf16 %v5929_v13, %v5928_v38  ;;  %v4238_v60 = vld [vmem:[%s9609_s4 + $0x68] sm:$0xff] }
 0x425   :  { %v7433_v22 = vpack.c.bf16 %v5927_v45, %v5926_v41  ;;  %v4551_v3 = vld [vmem:[#allocation2 + $0x1ca] sm:$0xff]  ;;  %v5931_v62 = vld [vmem:[%s9609_s4 + $0x1e8] sm:$0xff]  ;;  %v4239_v43 = vld [vmem:[%s9609_s4 + $0x70] sm:$0xff] }
 0x426   :  { %7404 = vmatpush3.bf16.msra.mxu0 %v7401_v39  ;;  %v4236_v39 = vld [vmem:[%s9609_s4 + $0x58] sm:$0xff]  ;;  %v4237_v20 = vld [vmem:[%s9609_s4 + $0x60] sm:$0xff]  ;;  %v4252_v5 = vld [vmem:[#allocation2 + $0x1d9] sm:$0xff] }
 0x427   :  { %7340 = vmatpush3.bf16.msra.mxu1 %v7337_v52  ;;  %7406 = vmatprep.subr.bf16.mxu0 %v7405_v21  ;;  %v4235_v52 = vld [vmem:[%s9609_s4 + $0x50] sm:$0xff]  ;;  %v7377_v54 = vpack.c.bf16 %v4238_v60, %v4237_v20  ;;  %v4240_v6 = vld [vmem:[%s9609_s4 + $0x78] sm:$0xff]  ;;  %v4214_v11 = vld [vmem:[#allocation2 + $0x198] sm:$0xff] }
 0x428   :  { %7342 = vmatprep.subr.bf16.mxu1 %v7341_v63  ;;  %v4253_v2 = vld [vmem:[#allocation2 + $0x1e1] sm:$0xff]  ;;  %v4254_v53 = vld [vmem:[#allocation2 + $0x1e9] sm:$0xf]  ;;  %v7381_v9 = vpack.c.bf16 %v4240_v6, %v4239_v43  ;;  %v4728_v57 = vld [vmem:[#allocation2 + $0x1b3] sm:$0xff] }
 0x429   :  { %v5932_v12 = vld [vmem:[%s9609_s4 + $0x1f0] sm:$0xff]  ;;  %v4555_v7 = vld [vmem:[#allocation2 + $0x1ea] sm:$0xf]  ;;  %v5943_v41 = vld [vmem:[%s9609_s4 + $0x248] sm:$0xff] }
 0x42a   :  { %7408 = vmatpush3.bf16.msra.mxu0 %v7405_v21  ;;  %v7373_v21 = vpack.c.bf16 %v4236_v39, %v4235_v52  ;;  %v5936_v50 = vld [vmem:[%s9609_s4 + $0x210] sm:$0xff]  ;;  %v4212_v25 = vld [vmem:[#allocation2 + $0x188] sm:$0xff]  ;;  %v4218_v45 = vld [vmem:[#allocation2 + $0x1b8] sm:$0xff] }
 0x42b   :  { %7344 = vmatpush3.bf16.msra.mxu1 %v7341_v63  ;;  %7410 = vmatprep.subr.bf16.mxu0 %v7409_v29  ;;  %v4250_v63 = vld [vmem:[#allocation2 + $0x1c9] sm:$0xff]  ;;  %v4725_v35 = vld [vmem:[#allocation2 + $0x19b] sm:$0xff] }
 0x42c   :  { %7346 = vmatprep.subr.bf16.mxu1 %v7345_v42  ;;  %v4723_v27 = vld [vmem:[#allocation2 + $0x18b] sm:$0xff]  ;;  %v4726_v8 = vld [vmem:[#allocation2 + $0x1a3] sm:$0xff] }
 0x42d   :  { %v5945_v52 = vld [vmem:[%s9609_s4 + $0x258] sm:$0xff]  ;;  %v4221_v38 = vld [vmem:[#allocation2 + $0x1d0] sm:$0xff]  ;;  %v4223_v20 = vld [vmem:[#allocation2 + $0x1e0] sm:$0xff] }
 0x42e   :  { %7412 = vmatpush3.bf16.msra.mxu0 %v7409_v29  ;;  %v5930_v29 = vld [vmem:[%s9609_s4 + $0x1e0] sm:$0xff]  ;;  %v4220_v39 = vld [vmem:[#allocation2 + $0x1c8] sm:$0xff] }
 0x42f   :  { %7348 = vmatpush3.bf16.msra.mxu1 %v7345_v42  ;;  %7414 = vmatprep.subr.bf16.mxu0 %v7413_v26  ;;  %v4251_v42 = vld [vmem:[#allocation2 + $0x1d1] sm:$0xff] }
 0x430   :  { %7350 = vmatprep.subr.bf16.mxu1 %v7349_v55  ;;  %v4911_v43 = vld [vmem:[#allocation2 + $0x1cc] sm:$0xff] }
 0x431   :  { %v4903_v6 = vld [vmem:[#allocation2 + $0x18c] sm:$0xff] }
 0x432   :  { %7416 = vmatpush3.bf16.msra.mxu0 %v7413_v26  ;;  %v7441_v26 = vpack.c.bf16 %v5931_v62, %v5930_v29  ;;  %v5949_v29 = vld [vmem:[%s9609_s4 + $0x278] sm:$0xff] }
 0x433   :  { %7352 = vmatpush3.bf16.msra.mxu1 %v7349_v55  ;;  %7418 = vmatprep.subr.bf16.mxu0 %v7417_v1  ;;  %v4553_v55 = vld [vmem:[#allocation2 + $0x1da] sm:$0xff]  ;;  %v4734_v62 = vld [vmem:[#allocation2 + $0x1e3] sm:$0xff] }
 0x434   :  { %7354 = vmatprep.subr.bf16.mxu1 %v7353_v31 }
 0x435   :  { %7035 = vmatmul.mubr.f32.vlgmr.msra.gmra.mrb[0].mxu0 %v4543_v37  ;;  %v5935_v37 = vld [vmem:[%s9609_s4 + $0x208] sm:$0xff] }
 0x436   :  { %6929 = vmatmul.mubr.f32.vlgmr.msra.gmra.mrb[0].mxu1 %v4242_v36  ;;  %7420 = vmatpush3.bf16.msra.mxu0 %v7417_v1  ;;  %v4554_v1 = vld [vmem:[#allocation2 + $0x1e2] sm:$0xff]  ;;  %v5934_v36 = vld [vmem:[%s9609_s4 + $0x200] sm:$0xff] }
 0x437   :  { %7356 = vmatpush3.bf16.msra.mxu1 %v7353_v31  ;;  %7422 = vmatprep.subr.bf16.mxu0 %v7421_v14  ;;  %v5933_v31 = vld [vmem:[%s9609_s4 + $0x1f8] sm:$0xff]  ;;  %v7449_v56 = vpack.c.bf16 %v5935_v37, %v5934_v36  ;;  %v4908_v36 = vld [vmem:[#allocation2 + $0x1b4] sm:$0xff]  ;;  %v4909_v37 = vld [vmem:[#allocation2 + $0x1bc] sm:$0xff] }
 0x438   :  { %7358 = vmatprep.subr.bf16.mxu1 %v7357_v10  ;;  %6931 = vmatprep.mubr.f32.mxu1 %v4243_v59  ;;  %v7445_v34 = vpack.c.bf16 %v5933_v31, %v5932_v12  ;;  %v5937_v59 = vld [vmem:[%s9609_s4 + $0x218] sm:$0xff]  ;;  %v4904_v12 = vld [vmem:[#allocation2 + $0x194] sm:$0xff]  ;;  %v4913_v31 = vld [vmem:[#allocation2 + $0x1dc] sm:$0xff] }
 0x439   :  { %7037 = vmatprep.mubr.f32.mxu0 %v4544_v51  ;;  %v4213_v51 = vld [vmem:[#allocation2 + $0x190] sm:$0xff] }
 0x43a   :  { %6932 = vmatmul.mubr.f32.gmra.mrb[2].mxu1 %v4244_v28  ;;  %7038 = vmatmul.mubr.f32.gmra.mrb[2].mxu0 %v4545_v16  ;;  %v7453_v28 = vpack.c.bf16 %v5937_v59, %v5936_v50  ;;  %v5938_v16 = vld [vmem:[%s9609_s4 + $0x220] sm:$0xff] }
 0x43b   :  { %7360 = vmatpush3.bf16.msra.mxu1 %v7357_v10  ;;  %7424 = vmatpush3.bf16.msra.mxu0 %v7421_v14  ;;  %v4211_v10 = vld [vmem:[#allocation2 + $0x180] sm:$0xff] }
 0x43c   :  { %7362 = vmatprep.subr.bf16.mxu1 %v7361_v4  ;;  %7426 = vmatprep.subr.bf16.mxu0 %v7425_v47  ;;  %v4722_v14 = vld [vmem:[#allocation2 + $0x183] sm:$0xff] }
 0x43d   :  { %6934 = vmatprep.mubr.f32.mxu1 %v4245_v48  ;;  %7040 = vmatprep.mubr.f32.mxu0 %v4546_v15  ;;  %v4215_v48 = vld [vmem:[#allocation2 + $0x1a0] sm:$0xff] }
 0x43e   :  { %6935 = vmatmul.mubr.f32.gmra.mrb[4].mxu1 %v4246_v17  ;;  %7041 = vmatmul.mubr.f32.gmra.mrb[4].mxu0 %v4547_v30  ;;  %v5940_v15 = vld [vmem:[%s9609_s4 + $0x230] sm:$0xff]  ;;  %v5941_v17 = vld [vmem:[%s9609_s4 + $0x238] sm:$0xff] }
 0x43f   :  { %7364 = vmatpush3.bf16.msra.mxu1 %v7361_v4  ;;  %7428 = vmatpush3.bf16.msra.mxu0 %v7425_v47  ;;  %v4724_v4 = vld [vmem:[#allocation2 + $0x193] sm:$0xff]  ;;  %v4727_v30 = vld [vmem:[#allocation2 + $0x1ab] sm:$0xff]  ;;  %v7461_v24 = vpack.c.bf16 %v5941_v17, %v5940_v15 }
 0x440   :  { %7366 = vmatprep.subr.bf16.mxu1 %v7365_v23  ;;  %7430 = vmatprep.subr.bf16.mxu0 %v7429_v32  ;;  %v5939_v47 = vld [vmem:[%s9609_s4 + $0x228] sm:$0xff] }
 0x441   :  { %6937 = vmatprep.mubr.f32.mxu1 %v4247_v18  ;;  %7043 = vmatprep.mubr.f32.mxu0 %v4548_v44  ;;  %v7457_v40 = vpack.c.bf16 %v5939_v47, %v5938_v16  ;;  %v5942_v18 = vld [vmem:[%s9609_s4 + $0x240] sm:$0xff]  ;;  %v4729_v44 = vld [vmem:[#allocation2 + $0x1bb] sm:$0xff] }
 0x442   :  { %6938 = vmatmul.mubr.f32.gmra.mrb[6].mxu1 %v4248_v58  ;;  %7044 = vmatmul.mubr.f32.gmra.mrb[6].mxu0 %v4549_v49  ;;  %v4219_v58 = vld [vmem:[#allocation2 + $0x1c0] sm:$0xff] }
 0x443   :  { %7368 = vmatpush3.bf16.msra.mxu1 %v7365_v23  ;;  %7432 = vmatpush3.bf16.msra.mxu0 %v7429_v32  ;;  %v4216_v23 = vld [vmem:[#allocation2 + $0x1a8] sm:$0xff]  ;;  %v4217_v32 = vld [vmem:[#allocation2 + $0x1b0] sm:$0xff] }
 0x444   :  { %7370 = vmatprep.subr.bf16.mxu1 %v7369_v46  ;;  %7434 = vmatprep.subr.bf16.mxu0 %v7433_v22  ;;  %v4730_v49 = vld [vmem:[#allocation2 + $0x1c3] sm:$0xff] }
 0x445   :  { %6940 = vmatprep.mubr.f32.mxu1 %v4249_v19  ;;  %7046 = vmatprep.mubr.f32.mxu0 %v4550_v33  ;;  %v4731_v19 = vld [vmem:[#allocation2 + $0x1cb] sm:$0xff]  ;;  %v4732_v33 = vld [vmem:[#allocation2 + $0x1d3] sm:$0xff] }
 0x446   :  { %6941 = vmatmul.mubr.f32.gmra.mrb[8].mxu1 %v4250_v63  ;;  %7047 = vmatmul.mubr.f32.gmra.mrb[8].mxu0 %v4551_v3  ;;  %v5946_v63 = vld [vmem:[%s9609_s4 + $0x260] sm:$0xff]  ;;  %v4222_v3 = vld [vmem:[#allocation2 + $0x1d8] sm:$0xff] }
 0x447   :  { %7372 = vmatpush3.bf16.msra.mxu1 %v7369_v46  ;;  %7436 = vmatpush3.bf16.msra.mxu0 %v7433_v22  ;;  %v7465_v46 = vpack.c.bf16 %v5943_v41, %v5942_v18  ;;  %v5944_v22 = vld [vmem:[%s9609_s4 + $0x250] sm:$0xff] }
 0x448   :  { %7374 = vmatprep.subr.bf16.mxu1 %v7373_v21  ;;  %7438 = vmatprep.subr.bf16.mxu0 %v7437_v61  ;;  %v7469_v13 = vpack.c.bf16 %v5945_v52, %v5944_v22 }
 0x449   :  { %6943 = vmatprep.mubr.f32.mxu1 %v4251_v42  ;;  %7049 = vmatprep.mubr.f32.mxu0 %v4552_v0  ;;  %v5948_v42 = vld [vmem:[%s9609_s4 + $0x270] sm:$0xff]  ;;  %v4224_v0 = vld [vmem:[#allocation2 + $0x1e8] sm:$0xf] }
 0x44a   :  { %6944 = vmatmul.mubr.f32.gmra.mrb[10].mxu1 %v4252_v5  ;;  %7050 = vmatmul.mubr.f32.gmra.mrb[10].mxu0 %v4553_v55  ;;  %v4735_v5 = vld [vmem:[#allocation2 + $0x1eb] sm:$0xf] }
 0x44b   :  { %7376 = vmatpush3.bf16.msra.mxu1 %v7373_v21  ;;  %7440 = vmatpush3.bf16.msra.mxu0 %v7437_v61  ;;  %v5947_v21 = vld [vmem:[%s9609_s4 + $0x268] sm:$0xff]  ;;  %v4902_v55 = vld [vmem:[#allocation2 + $0x184] sm:$0xff] }
 0x44c   :  { %7378 = vmatprep.subr.bf16.mxu1 %v7377_v54  ;;  %7442 = vmatprep.subr.bf16.mxu0 %v7441_v26  ;;  %v4733_v61 = vld [vmem:[#allocation2 + $0x1db] sm:$0xff]  ;;  %v7473_v60 = vpack.c.bf16 %v5947_v21, %v5946_v63 }
 0x44d   :  { %6946 = vmatprep.mubr.f32.mxu1 %v4253_v2  ;;  %7052 = vmatprep.mubr.f32.mxu0 %v4554_v1  ;;  %v4912_v2 = vld [vmem:[#allocation2 + $0x1d4] sm:$0xff]  ;;  %v4905_v1 = vld [vmem:[#allocation2 + $0x19c] sm:$0xff] }
 0x44e   :  { %6947 = vmatmul.mubr.f32.gmra.mrb[12].mxu1 %v4254_v53  ;;  %7053 = vmatmul.mubr.f32.gmra.mrb[12].mxu0 %v4555_v7  ;;  %v4914_v53 = vld [vmem:[#allocation2 + $0x1e4] sm:$0xff]  ;;  %v4915_v7 = vld [vmem:[#allocation2 + $0x1ec] sm:$0xf] }
 0x44f   :  { %7380 = vmatpush3.bf16.msra.mxu1 %v7377_v54  ;;  %7444 = vmatpush3.bf16.msra.mxu0 %v7441_v26  ;;  %v7477_v54 = vpack.c.bf16 %v5949_v29, %v5948_v42  ;;  %v4910_v26 = vld [vmem:[#allocation2 + $0x1c4] sm:$0xff] }
 0x450   :  { %7382 = vmatprep.subr.bf16.mxu1 %v7381_v9  ;;  %7446 = vmatprep.subr.bf16.mxu0 %v7445_v34 }
 0x451   :  { %6981 = vmatprep.mubr.f32.mxu1 %v4211_v10  ;;  %7087 = vmatprep.mubr.f32.mxu0 %v4722_v14 }
 0x453   :  { %7384 = vmatpush3.bf16.msra.mxu1 %v7381_v9  ;;  %7448 = vmatpush3.bf16.msra.mxu0 %v7445_v34  ;;  %v4906_v9 = vld [vmem:[#allocation2 + $0x1a4] sm:$0xff]  ;;  %v4907_v34 = vld [vmem:[#allocation2 + $0x1ac] sm:$0xff] }
 0x454   :  { %7669 = vmatprep.subr.bf16.mxu1 %v7449_v56  ;;  %7450 = vmatprep.subr.bf16.mxu0 %v7449_v56 }
 0x456   :  { %6982 = vmatmul.mubr.f32.vlgmr.msra.gmra.mrb[0].mxu1 %v4212_v25  ;;  %7088 = vmatmul.mubr.f32.vlgmr.msra.gmra.mrb[0].mxu0 %v4723_v27 }
 0x457   :  { %7677 = vmatpush3.bf16.msra.mxu1 %v7449_v56  ;;  %7452 = vmatpush3.bf16.msra.mxu0 %v7449_v56 }
 0x458   :  { %6984 = vmatprep.mubr.f32.mxu1 %v4213_v51  ;;  %7090 = vmatprep.mubr.f32.mxu0 %v4724_v4 }
 0x459   :  { %7454 = vmatprep.subr.bf16.mxu0 %v7453_v28  ;;  %7670 = vmatprep.subr.bf16.mxu1 %v7453_v28 }
 0x45a   :  { %6985 = vmatmul.mubr.f32.gmra.mrb[2].mxu1 %v4214_v11  ;;  %7091 = vmatmul.mubr.f32.gmra.mrb[2].mxu0 %v4725_v35 }
 0x45b   :  { %7678 = vmatpush3.bf16.msra.mxu1 %v7453_v28  ;;  %7456 = vmatpush3.bf16.msra.mxu0 %v7453_v28 }
 0x45c   :  { %6987 = vmatprep.mubr.f32.mxu1 %v4215_v48  ;;  %7093 = vmatprep.mubr.f32.mxu0 %v4726_v8 }
 0x45d   :  { %7458 = vmatprep.subr.bf16.mxu0 %v7457_v40  ;;  %7671 = vmatprep.subr.bf16.mxu1 %v7457_v40 }
 0x45e   :  { %6988 = vmatmul.mubr.f32.gmra.mrb[4].mxu1 %v4216_v23  ;;  %7094 = vmatmul.mubr.f32.gmra.mrb[4].mxu0 %v4727_v30 }
 0x45f   :  { %7679 = vmatpush3.bf16.msra.mxu1 %v7457_v40  ;;  %7460 = vmatpush3.bf16.msra.mxu0 %v7457_v40 }
 0x460   :  { %6990 = vmatprep.mubr.f32.mxu1 %v4217_v32  ;;  %7096 = vmatprep.mubr.f32.mxu0 %v4728_v57 }
 0x461   :  { %7462 = vmatprep.subr.bf16.mxu0 %v7461_v24  ;;  %7672 = vmatprep.subr.bf16.mxu1 %v7461_v24 }
 0x462   :  { %6991 = vmatmul.mubr.f32.gmra.mrb[6].mxu1 %v4218_v45  ;;  %7097 = vmatmul.mubr.f32.gmra.mrb[6].mxu0 %v4729_v44  ;;  %v9490_v45 = vld [vmem:[%s9610_s5] ss:$0 sm:$0xff] }
 0x463   :  { %7680 = vmatpush3.bf16.msra.mxu1 %v7461_v24  ;;  %7464 = vmatpush3.bf16.msra.mxu0 %v7461_v24 }
 0x464   :  { %6993 = vmatprep.mubr.f32.mxu1 %v4219_v58  ;;  %7099 = vmatprep.mubr.f32.mxu0 %v4730_v49 }
 0x465   :  { %7466 = vmatprep.subr.bf16.mxu0 %v7465_v46  ;;  %7673 = vmatprep.subr.bf16.mxu1 %v7465_v46 }
 0x466   :  { %6994 = vmatmul.mubr.f32.gmra.mrb[8].mxu1 %v4220_v39  ;;  %7100 = vmatmul.mubr.f32.gmra.mrb[8].mxu0 %v4731_v19 }
 0x467   :  { %7681 = vmatpush3.bf16.msra.mxu1 %v7465_v46  ;;  %7468 = vmatpush3.bf16.msra.mxu0 %v7465_v46 }
 0x468   :  { %6996 = vmatprep.mubr.f32.mxu1 %v4221_v38  ;;  %7102 = vmatprep.mubr.f32.mxu0 %v4732_v33 }
 0x469   :  { %7470 = vmatprep.subr.bf16.mxu0 %v7469_v13  ;;  %7674 = vmatprep.subr.bf16.mxu1 %v7469_v13 }
 0x46a   :  { %6997 = vmatmul.mubr.f32.gmra.mrb[10].mxu1 %v4222_v3  ;;  %7103 = vmatmul.mubr.f32.gmra.mrb[10].mxu0 %v4733_v61 }
 0x46b   :  { %7682 = vmatpush3.bf16.msra.mxu1 %v7469_v13  ;;  %7472 = vmatpush3.bf16.msra.mxu0 %v7469_v13 }
 0x46c   :  { %6999 = vmatprep.mubr.f32.mxu1 %v4223_v20  ;;  %7105 = vmatprep.mubr.f32.mxu0 %v4734_v62 }
 0x46d   :  { %7474 = vmatprep.subr.bf16.mxu0 %v7473_v60  ;;  %7675 = vmatprep.subr.bf16.mxu1 %v7473_v60 }
 0x46e   :  { %7000 = vmatmul.mubr.f32.gmra.mrb[12].mxu1 %v4224_v0  ;;  %7106 = vmatmul.mubr.f32.gmra.mrb[12].mxu0 %v4735_v5 }
 0x46f   :  { %7683 = vmatpush3.bf16.msra.mxu1 %v7473_v60  ;;  %7476 = vmatpush3.bf16.msra.mxu0 %v7473_v60 }
 0x470   :  { %7676 = vmatprep.subr.bf16.mxu1 %v7477_v54  ;;  %7478 = vmatprep.subr.bf16.mxu0 %v7477_v54 }
 0x471   :  { %7140 = vmatprep.mubr.f32.mxu0 %v4902_v55  ;;  %7152 = vmatprep.mubr.f32.mxu1 %v4910_v26 }
 0x473   :  { %7684 = vmatpush3.bf16.msra.mxu1 %v7477_v54  ;;  %7480 = vmatpush3.bf16.msra.mxu0 %v7477_v54 }
 0x476   :  { %7153 = vmatmul.mubr.f32.vlgmr.msra.gmra.mrb[14].mxu1 %v4911_v43  ;;  %7141 = vmatmul.mubr.f32.vlgmr.msra.gmra.mrb[0].mxu0 %v4903_v6 }
 0x477   :  { %7155 = vmatprep.mubr.f32.mxu1 %v4912_v2  ;;  %7143 = vmatprep.mubr.f32.mxu0 %v4904_v12 }
 0x47a   :  { %7156 = vmatmul.mubr.f32.gmra.mrb[16].mxu1 %v4913_v31  ;;  %7144 = vmatmul.mubr.f32.gmra.mrb[2].mxu0 %v4905_v1 }
 0x47b   :  { %7158 = vmatprep.mubr.f32.mxu1 %v4914_v53  ;;  %7146 = vmatprep.mubr.f32.mxu0 %v4906_v9 }
 0x47e   :  { %7159 = vmatmul.mubr.f32.gmra.mrb[18].mxu1 %v4915_v7  ;;  %7147 = vmatmul.mubr.f32.gmra.mrb[4].mxu0 %v4907_v34 }
 0x47f   :  { %7149 = vmatprep.mubr.f32.mxu0 %v4908_v36 }
 0x482   :  { %7150 = vmatmul.mubr.f32.gmra.mrb[6].mxu0 %v4909_v37 }
 0x529   :  { %v6983_v10 = vpop.f32.mrb[0].mxu1 }
 0x52a   :  { %v4473_v14 = vpop.f32.mrb[1].mxu1 }
 0x52d   :  { %v6986_v56 = vpop.f32.mrb[2].mxu1 }
 0x52e   :  { %v9473_v50 = vpop.f32.mrb[3].mxu1 }
 0x531   :  { %v9475_v59 = vpop.f32.mrb[4].mxu1 }
 0x532   :  { %v9477_v25 = vpop.f32.mrb[5].mxu1 }
 0x535   :  { %v9479_v27 = vpop.f32.mrb[6].mxu1 }
 0x536   :  { %v9481_v51 = vpop.f32.mrb[7].mxu1 }
 0x539   :  { %v6995_v28 = vpop.f32.mrb[8].mxu1  ;;  %v7101_v4 = vpop.f32.mrb[8].mxu0 }
 0x53a   :  { %v4513_v16 = vpop.f32.mrb[9].mxu1  ;;  %v7693_v47 = vadd.f32 %v7101_v4, %v6995_v28  ;;  %v4859_v11 = vpop.f32.mrb[9].mxu0 }
 0x53b   :  { %v7695_v35 = vadd.f32 %v4859_v11, %v4513_v16 }
 0x53d   :  { %v6998_v48 = vpop.f32.mrb[10].mxu1  ;;  %v7104_v40 = vpop.f32.mrb[10].mxu0 }
 0x53e   :  { %v4523_v8 = vpop.f32.mrb[11].mxu1  ;;  %v7697_v15 = vadd.f32 %v7104_v40, %v6998_v48  ;;  %v4869_v17 = vpop.f32.mrb[11].mxu0 }
 0x53f   :  { %v7699_v23 = vadd.f32 %v4869_v17, %v4523_v8 }
 0x541   :  { %v7001_v30 = vpop.f32.mrb[12].mxu1  ;;  %v7107_v32 = vpop.f32.mrb[12].mxu0 }
 0x542   :  { %v4533_v24 = vpop.f32.mrb[13].mxu1  ;;  %v9483_v57 = vadd.f32 %v7107_v32, %v7001_v30  ;;  %v4879_v18 = vpop.f32.mrb[13].mxu0 }
 0x543   :  { %v9485_v41 = vadd.f32 %v4879_v18, %v4533_v24 }
 0x549   :  { %v7154_v44 = vpop.f32.mrb[14].mxu1  ;;  %v7142_v58 = vpop.f32.mrb[0].mxu0 }
 0x54a   :  { %v7694_v46 = vadd.f32 %v7693_v47, %v7154_v44  ;;  %v5039_v49 = vpop.f32.mrb[15].mxu1  ;;  %v7685_v22 = vadd.f32 %v7142_v58, %v6983_v10  ;;  %v4999_v52 = vpop.f32.mrb[1].mxu0 }
 0x54b   :  { %v7696_v39 = vadd.f32 %v7695_v35, %v5039_v49  ;;  %v7686_v38 = vadd.f32 %v4999_v52, %v4473_v14 }
 0x54c   :  { %v5098_v19 = vadd.f32 %v7694_v46, %v9490_v45  ;;  %v5090_v13 = vadd.f32 %v7685_v22, %v9490_v45 }
 0x54d   :  { %v5097_v33 = vadd.f32 %v7696_v39, %v9490_v45  ;;  %v7157_v63 = vpop.f32.mrb[16].mxu1  ;;  %v5089_v3 = vadd.f32 %v7686_v38, %v9490_v45  ;;  %v7145_v61 = vpop.f32.mrb[2].mxu0 }
 0x54e   :  { %v5112_v21 = vmax.f32 %v5098_v19, 0.0  ;;  %v7698_v20 = vadd.f32 %v7697_v15, %v7157_v63  ;;  %v5049_v60 = vpop.f32.mrb[17].mxu1  ;;  %v5104_v42 = vmax.f32 %v5090_v13, 0.0  ;;  %v9496_v62 = vadd.f32 %v7145_v61, %v6986_v56  ;;  %v9498_v0 = vpop.f32.mrb[3].mxu0 }
 0x54f   :  { %v5111_v29 = vmax.f32 %v5097_v33, 0.0  ;;  %v9500_v5 = vadd.f32 %v7699_v23, %v5049_v60  ;;  %v5103_v26 = vmax.f32 %v5089_v3, 0.0 }
 0x550   :  { %v5139_v54 = vcombine.high %v5112_v21, %v5112_v21  ;;  %v5282_v55 = vsel %vm184_vm0, %v5112_v21, -inf  ;;  %v5100_v43 = vadd.f32 %v7698_v20, %v9490_v45  ;;  %v5131_v6 = vcombine.high %v5104_v42, %v5104_v42 }
 0x551   :  { %v5170_v2 = vsel %vm184_vm0, %v5104_v42, -inf  ;;  %v5283_v12 = vrot.slane %v5282_v55, 4  ;;  %v5138_v31 = vcombine.high %v5111_v29, %v5111_v29  ;;  %v9505_v1 = vpop.f32.mrb[18].mxu1  ;;  %v5130_v7 = vcombine.high %v5103_v26, %v5103_v26  ;;  %v9509_v36 = vpop.f32.mrb[4].mxu0 }
 0x552   :  { %v5171_v53 = vrot.slane %v5170_v2, 4  ;;  %v5289_v9 = vsel %vm184_vm0, %v5139_v54, -inf  ;;  %v5156_v34 = vsel %vm184_vm0, %v5103_v26, -inf  ;;  %v9511_v37 = vpop.f32.mrb[19].mxu1  ;;  %v5177_v10 = vsel %vm184_vm0, %v5131_v6, -inf  ;;  %v9514_v4 = vpop.f32.mrb[5].mxu0 }
 0x553   :  { %v5284_v14 = vmax.f32 %v5282_v55, %v5283_v12  ;;  %v5290_v56 = vrot.slane %v5289_v9, 4  ;;  %v5157_v28 = vrot.slane %v5156_v34, 4  ;;  %v5178_v47 = vrot.slane %v5177_v10, 4 }
 0x554   :  { %v5172_v16 = vmax.f32 %v5170_v2, %v5171_v53  ;;  %v5163_v11 = vsel %vm184_vm0, %v5130_v7, -inf  ;;  %v5268_v35 = vsel %vm184_vm0, %v5111_v29, -inf  ;;  %v5275_v32 = vsel %vm184_vm0, %v5138_v31, -inf }
 0x555   :  { %v5285_v48 = vrot.slane %v5284_v14, 2  ;;  %v5291_v40 = vmax.f32 %v5289_v9, %v5290_v56  ;;  %v5158_v8 = vmax.f32 %v5156_v34, %v5157_v28  ;;  %v5164_v15 = vrot.slane %v5163_v11, 4  ;;  %v9519_v24 = vpop.f32.mrb[6].mxu0 }
 0x556   :  { %v5173_v17 = vrot.slane %v5172_v16, 2  ;;  %v5179_v23 = vmax.f32 %v5177_v10, %v5178_v47  ;;  %v5269_v30 = vrot.slane %v5268_v35, 4  ;;  %v9521_v49 = vpop.f32.mrb[7].mxu0  ;;  %v5276_v19 = vrot.slane %v5275_v32, 4 }
 0x557   :  { %v5286_v18 = vmax.f32 %v5284_v14, %v5285_v48  ;;  %v5292_v44 = vrot.slane %v5291_v40, 2  ;;  %v5159_v58 = vrot.slane %v5158_v8, 2  ;;  %v5165_v46 = vmax.f32 %v5163_v11, %v5164_v15 }
 0x558   :  { %v5174_v22 = vmax.f32 %v5172_v16, %v5173_v17  ;;  %v5180_v52 = vrot.slane %v5179_v23, 2  ;;  %v5270_v39 = vmax.f32 %v5268_v35, %v5269_v30  ;;  %v5277_v20 = vmax.f32 %v5275_v32, %v5276_v19 }
 0x559   :  { %v5287_v38 = vrot.slane %v5286_v18, 1  ;;  %v5293_v13 = vmax.f32 %v5291_v40, %v5292_v44  ;;  %v5160_v33 = vmax.f32 %v5158_v8, %v5159_v58  ;;  %v5166_v63 = vrot.slane %v5165_v46, 2 }
 0x55a   :  { %v5175_v21 = vrot.slane %v5174_v22, 1  ;;  %v5181_v3 = vmax.f32 %v5179_v23, %v5180_v52  ;;  %v5271_v61 = vrot.slane %v5270_v39, 2  ;;  %v5278_v2 = vrot.slane %v5277_v20, 2 }
 0x55b   :  { %v5288_v60 = vmax.f32 %v5286_v18, %v5287_v38  ;;  %v5294_v42 = vrot.slane %v5293_v13, 1  ;;  %v5161_v29 = vrot.slane %v5160_v33, 1  ;;  %v5167_v54 = vmax.f32 %v5165_v46, %v5166_v63 }
 0x55c   :  { %v5176_v55 = vmax.f32 %v5174_v22, %v5175_v21  ;;  %v5182_v26 = vrot.slane %v5181_v3, 1  ;;  %v5272_v6 = vmax.f32 %v5270_v39, %v5271_v61  ;;  %v5092_v9 = vadd.f32 %v9496_v62, %v9490_v45 }
 0x55d   :  { %v5295_v12 = vmax.f32 %v5293_v13, %v5294_v42  ;;  %v5162_v31 = vmax.f32 %v5160_v33, %v5161_v29  ;;  %v5168_v53 = vrot.slane %v5167_v54, 1  ;;  %v5279_v10 = vmax.f32 %v5277_v20, %v5278_v2 }
 0x55e   :  { %v5183_v7 = vmax.f32 %v5181_v3, %v5182_v26  ;;  %v5273_v34 = vrot.slane %v5272_v6, 1  ;;  %v5114_v14 = vmax.f32 %v5100_v43, 0.0  ;;  %v5106_v28 = vmax.f32 %v5092_v9, 0.0 }
 0x55f   :  { %v5169_v56 = vmax.f32 %v5167_v54, %v5168_v53  ;;  %v7688_v16 = vadd.f32 %v9498_v0, %v9473_v50  ;;  %v5099_v47 = vadd.f32 %v9500_v5, %v9490_v45  ;;  %v5280_v35 = vrot.slane %v5279_v10, 1 }
 0x560   :  { %v5274_v11 = vmax.f32 %v5272_v6, %v5273_v34  ;;  %v5141_v48 = vcombine.high %v5114_v14, %v5114_v14  ;;  %v5310_v40 = vsel %vm184_vm0, %v5114_v14, -inf  ;;  %v5133_v62 = vcombine.high %v5106_v28, %v5106_v28 }
 0x561   :  { %v5372_v8 = vsel %vm1667_vm2, %v5169_v56, %v5162_v31  ;;  %v5198_v15 = vsel %vm184_vm0, %v5106_v28, -inf  ;;  %v5311_v17 = vrot.slane %v5310_v40, 4  ;;  %v5281_v23 = vmax.f32 %v5279_v10, %v5280_v35 }
 0x562   :  { %v5373_v43 = vsel %vm1669_vm3, %v5176_v55, %v5372_v8  ;;  %v5199_v30 = vrot.slane %v5198_v15, 4  ;;  %v5317_v50 = vsel %vm184_vm0, %v5141_v48, -inf  ;;  %v5205_v0 = vsel %vm184_vm0, %v5133_v62, -inf }
 0x563   :  { %v5312_v5 = vmax.f32 %v5310_v40, %v5311_v17  ;;  %v5318_v32 = vrot.slane %v5317_v50, 4  ;;  %v5091_v18 = vadd.f32 %v7688_v16, %v9490_v45  ;;  %v5386_v44 = vsel %vm1667_vm2, %v5281_v23, %v5274_v11 }
 0x564   :  { %v5200_v58 = vmax.f32 %v5198_v15, %v5199_v30  ;;  %v5206_v46 = vrot.slane %v5205_v0, 4  ;;  %v5374_v22 = vsel %vm1671_vm4, %v5183_v7, %v5373_v43  ;;  %v5387_v52 = vsel %vm1669_vm3, %v5288_v60, %v5386_v44 }
 0x565   :  { %v5313_v39 = vrot.slane %v5312_v5, 2  ;;  %v5319_v19 = vmax.f32 %v5317_v50, %v5318_v32  ;;  %v5105_v38 = vmax.f32 %v5091_v18, 0.0  ;;  %v5113_v63 = vmax.f32 %v5099_v47, 0.0 }
 0x566   :  { %v5201_v13 = vrot.slane %v5200_v58, 2  ;;  %v5207_v33 = vmax.f32 %v5205_v0, %v5206_v46  ;;  %v9540_v21 = vsel %vm1671_vm4, %v5295_v12, %v5387_v52  ;;  %v7689_v40 = vadd.f32 %v9509_v36, %v9475_v59 }
 0x567   :  { %v5314_v3 = vmax.f32 %v5312_v5, %v5313_v39  ;;  %v5320_v61 = vrot.slane %v5319_v19, 2  ;;  %v5132_v20 = vcombine.high %v5105_v38, %v5105_v38  ;;  %v5184_v42 = vsel %vm184_vm0, %v5105_v38, -inf }
 0x568   :  { %v5202_v29 = vmax.f32 %v5200_v58, %v5201_v13  ;;  %v5208_v54 = vrot.slane %v5207_v33, 2  ;;  %v5185_v55 = vrot.slane %v5184_v42, 4  ;;  %v5140_v26 = vcombine.high %v5113_v63, %v5113_v63 }
 0x569   :  { %v5315_v6 = vrot.slane %v5314_v3, 1  ;;  %v5321_v60 = vmax.f32 %v5319_v19, %v5320_v61  ;;  %v5191_v2 = vsel %vm184_vm0, %v5132_v20, -inf  ;;  %v5296_v31 = vsel %vm184_vm0, %v5113_v63, -inf }
 0x56a   :  { %v5203_v53 = vrot.slane %v5202_v29, 1  ;;  %v5209_v9 = vmax.f32 %v5207_v33, %v5208_v54  ;;  %v5186_v7 = vmax.f32 %v5184_v42, %v5185_v55  ;;  %v5192_v12 = vrot.slane %v5191_v2, 4 }
 0x56b   :  { %v5316_v34 = vmax.f32 %v5314_v3, %v5315_v6  ;;  %v5297_v10 = vrot.slane %v5296_v31, 4  ;;  %v5303_v14 = vsel %vm184_vm0, %v5140_v26, -inf  ;;  %v5322_v28 = vrot.slane %v5321_v60, 1 }
 0x56c   :  { %v5210_v56 = vrot.slane %v5209_v9, 1  ;;  %v5187_v16 = vrot.slane %v5186_v7, 2  ;;  %v5193_v47 = vmax.f32 %v5191_v2, %v5192_v12  ;;  %v5204_v11 = vmax.f32 %v5202_v29, %v5203_v53 }
 0x56d   :  { %v5298_v35 = vmax.f32 %v5296_v31, %v5297_v10  ;;  %v5304_v48 = vrot.slane %v5303_v14, 4  ;;  %v7702_v17 = vadd.f32 %v9483_v57, %v9505_v1  ;;  %v5094_v30 = vadd.f32 %v7689_v40, %v9490_v45 }
 0x56e   :  { %v5211_v8 = vmax.f32 %v5209_v9, %v5210_v56  ;;  %v5188_v62 = vmax.f32 %v5186_v7, %v5187_v16  ;;  %v5194_v15 = vrot.slane %v5193_v47, 2  ;;  %v7690_v50 = vadd.f32 %v9514_v4, %v9477_v25 }
 0x56f   :  { %v5299_v43 = vrot.slane %v5298_v35, 2  ;;  %v5305_v23 = vmax.f32 %v5303_v14, %v5304_v48  ;;  %v5102_v32 = vadd.f32 %v7702_v17, %v9490_v45  ;;  %v7704_v59 = vadd.f32 %v9485_v41, %v9511_v37 }
 0x570   :  { %v5189_v0 = vrot.slane %v5188_v62, 1  ;;  %v5195_v5 = vmax.f32 %v5193_v47, %v5194_v15  ;;  %v5108_v44 = vmax.f32 %v5094_v30, 0.0  ;;  %v5093_v58 = vadd.f32 %v7690_v50, %v9490_v45 }
 0x571   :  { %v5300_v36 = vmax.f32 %v5298_v35, %v5299_v43  ;;  %v5306_v18 = vrot.slane %v5305_v23, 2  ;;  %v5116_v46 = vmax.f32 %v5102_v32, 0.0  ;;  %v5101_v52 = vadd.f32 %v7704_v59, %v9490_v45 }
 0x572   :  { %v5190_v57 = vmax.f32 %v5188_v62, %v5189_v0  ;;  %v5196_v1 = vrot.slane %v5195_v5, 1  ;;  %v5135_v25 = vcombine.high %v5108_v44, %v5108_v44  ;;  %v5226_v4 = vsel %vm184_vm0, %v5108_v44, -inf }
 0x573   :  { %v5301_v39 = vrot.slane %v5300_v36, 1  ;;  %v5307_v19 = vmax.f32 %v5305_v23, %v5306_v18  ;;  %v5227_v33 = vrot.slane %v5226_v4, 4  ;;  %v5338_v41 = vsel %vm184_vm0, %v5116_v46, -inf }
 0x574   :  { %v5197_v38 = vmax.f32 %v5195_v5, %v5196_v1  ;;  %v5375_v13 = vsel %vm1673_vm5, %v5190_v57, %v5374_v22  ;;  %v5233_v3 = vsel %vm184_vm0, %v5135_v25, -inf  ;;  %v5339_v61 = vrot.slane %v5338_v41, 4 }
 0x575   :  { %v5302_v37 = vmax.f32 %v5300_v36, %v5301_v39  ;;  %v5308_v63 = vrot.slane %v5307_v19, 1  ;;  %v5228_v42 = vmax.f32 %v5226_v4, %v5227_v33  ;;  %v5234_v29 = vrot.slane %v5233_v3, 4 }
 0x576   :  { %v5376_v20 = vsel %vm1675_vm6, %v5197_v38, %v5375_v13  ;;  %v5107_v54 = vmax.f32 %v5093_v58, 0.0  ;;  %v5340_v22 = vmax.f32 %v5338_v41, %v5339_v61  ;;  %v5323_v2 = vmax.f32 %v5321_v60, %v5322_v28 }
 0x577   :  { %v5377_v55 = vsel %vm1677_vm7, %v5204_v11, %v5376_v20  ;;  %v5309_v26 = vmax.f32 %v5307_v19, %v5308_v63  ;;  %v5389_v6 = vsel %vm1673_vm5, %v5302_v37, %v9540_v21  ;;  %v5235_v53 = vmax.f32 %v5233_v3, %v5234_v29 }
 0x578   :  { %v5378_v31 = vsel %vm1679_vm8, %v5211_v8, %v5377_v55  ;;  %v5134_v9 = vcombine.high %v5107_v54, %v5107_v54  ;;  %v5229_v12 = vrot.slane %v5228_v42, 2  ;;  %v5212_v10 = vsel %vm184_vm0, %v5107_v54, -inf }
 0x579   :  { %5399 = vst [vmem:[%s9611_s6 + $0x60] sm:$0xff] %v5378_v31  ;;  %v5390_v7 = vsel %vm1675_vm6, %v5309_v26, %v5389_v6  ;;  %v5115_v14 = vmax.f32 %v5101_v52, 0.0  ;;  %v5341_v16 = vrot.slane %v5340_v22, 2  ;;  %v5213_v21 = vrot.slane %v5212_v10, 4 }
 0x57a   :  { %v5391_v56 = vsel %vm1677_vm7, %v5316_v34, %v5390_v7  ;;  %v5219_v28 = vsel %vm184_vm0, %v5134_v9, -inf  ;;  %v5236_v11 = vrot.slane %v5235_v53, 2  ;;  %v5230_v40 = vmax.f32 %v5228_v42, %v5229_v12 }
 0x57b   :  { %v5392_v60 = vsel %vm1679_vm8, %v5323_v2, %v5391_v56  ;;  %v5142_v47 = vcombine.high %v5115_v14, %v5115_v14  ;;  %v5214_v35 = vmax.f32 %v5212_v10, %v5213_v21  ;;  %v5220_v48 = vrot.slane %v5219_v28, 4 }
 0x57c   :  { %5401 = vst [vmem:[%s9611_s6 + $0x70] sm:$0xff] %v5392_v60  ;;  %v5324_v8 = vsel %vm184_vm0, %v5115_v14, -inf  ;;  %v7691_v34 = vadd.f32 %v9519_v24, %v9479_v27  ;;  %v5342_v15 = vmax.f32 %v5340_v22, %v5341_v16  ;;  %v5237_v0 = vmax.f32 %v5235_v53, %v5236_v11 }
 0x57d   :  { %v5331_v62 = vsel %vm184_vm0, %v5142_v47, -inf  ;;  %v5215_v17 = vrot.slane %v5214_v35, 2  ;;  %v5221_v43 = vmax.f32 %v5219_v28, %v5220_v48  ;;  %v5325_v23 = vrot.slane %v5324_v8, 4 }
 0x57e   :  { %v5332_v30 = vrot.slane %v5331_v62, 4  ;;  %v5096_v50 = vadd.f32 %v7691_v34, %v9490_v45  ;;  %v7692_v59 = vadd.f32 %v9521_v49, %v9481_v51  ;;  %v5231_v36 = vrot.slane %v5230_v40, 1 }
 0x57f   :  { %v5216_v5 = vmax.f32 %v5214_v35, %v5215_v17  ;;  %v5222_v32 = vrot.slane %v5221_v43, 2  ;;  %v5326_v18 = vmax.f32 %v5324_v8, %v5325_v23  ;;  %v5343_v57 = vrot.slane %v5342_v15, 1 }
 0x580   :  { %v5333_v44 = vmax.f32 %v5331_v62, %v5332_v30  ;;  %v5110_v58 = vmax.f32 %v5096_v50, 0.0  ;;  %v5095_v24 = vadd.f32 %v7692_v59, %v9490_v45  ;;  %v5238_v25 = vrot.slane %v5237_v0, 1 }
 0x581   :  { %v5217_v1 = vrot.slane %v5216_v5, 1  ;;  %v5223_v27 = vmax.f32 %v5221_v43, %v5222_v32  ;;  %v5327_v46 = vrot.slane %v5326_v18, 2  ;;  %v5232_v20 = vmax.f32 %v5230_v40, %v5231_v36 }
 0x582   :  { %v5334_v52 = vrot.slane %v5333_v44, 2  ;;  %v5137_v39 = vcombine.high %v5110_v58, %v5110_v58  ;;  %v5254_v19 = vsel %vm184_vm0, %v5110_v58, -inf  ;;  %v5109_v13 = vmax.f32 %v5095_v24, 0.0 }
 0x583   :  { %v5224_v4 = vrot.slane %v5223_v27, 1  ;;  %v5255_v38 = vrot.slane %v5254_v19, 4  ;;  %v5218_v33 = vmax.f32 %v5216_v5, %v5217_v1  ;;  %v5328_v51 = vmax.f32 %v5326_v18, %v5327_v46 }
 0x584   :  { %v5335_v49 = vmax.f32 %v5333_v44, %v5334_v52  ;;  %v5261_v41 = vsel %vm184_vm0, %v5137_v39, -inf  ;;  %v5136_v61 = vcombine.high %v5109_v13, %v5109_v13  ;;  %v5240_v29 = vsel %vm184_vm0, %v5109_v13, -inf }
 0x585   :  { %v5225_v37 = vmax.f32 %v5223_v27, %v5224_v4  ;;  %v5256_v63 = vmax.f32 %v5254_v19, %v5255_v38  ;;  %v5262_v3 = vrot.slane %v5261_v41, 4  ;;  %v5329_v45 = vrot.slane %v5328_v51, 1 }
 0x586   :  { %v5336_v42 = vrot.slane %v5335_v49, 1  ;;  %v5239_v54 = vmax.f32 %v5237_v0, %v5238_v25  ;;  %v5241_v6 = vrot.slane %v5240_v29, 4  ;;  %v5247_v53 = vsel %vm184_vm0, %v5136_v61, -inf }
 0x587   :  { %v5379_v55 = vsel %vm1667_vm2, %v5225_v37, %v5218_v33  ;;  %v5263_v26 = vmax.f32 %v5261_v41, %v5262_v3  ;;  %v5330_v2 = vmax.f32 %v5328_v51, %v5329_v45  ;;  %v5344_v9 = vmax.f32 %v5342_v15, %v5343_v57 }
 0x588   :  { %v5380_v22 = vsel %vm1669_vm3, %v5232_v20, %v5379_v55  ;;  %v5337_v31 = vmax.f32 %v5335_v49, %v5336_v42  ;;  %v5257_v7 = vrot.slane %v5256_v63, 2  ;;  %v5242_v12 = vmax.f32 %v5240_v29, %v5241_v6 }
 0x589   :  { %v5248_v10 = vrot.slane %v5247_v53, 4  ;;  %v5264_v56 = vrot.slane %v5263_v26, 2  ;;  %v5381_v16 = vsel %vm1671_vm4, %v5239_v54, %v5380_v22 }
 0x58a   :  { %v5393_v14 = vsel %vm1667_vm2, %v5337_v31, %v5330_v2  ;;  %v5243_v60 = vrot.slane %v5242_v12, 2  ;;  %v5258_v47 = vmax.f32 %v5256_v63, %v5257_v7 }
 0x58b   :  { %v5394_v21 = vsel %vm1669_vm3, %v5344_v9, %v5393_v14  ;;  %v5249_v28 = vmax.f32 %v5247_v53, %v5248_v10  ;;  %v5265_v35 = vmax.f32 %v5263_v26, %v5264_v56 }
 0x58c   :  { %5402 = vst [vmem:[%s9611_s6 + $0x78] sm:$0x7] %v5394_v21  ;;  %v5244_v11 = vmax.f32 %v5242_v12, %v5243_v60  ;;  %v5259_v62 = vrot.slane %v5258_v47, 1 }
 0x58d   :  { %v5250_v48 = vrot.slane %v5249_v28, 2  ;;  %v5266_v15 = vrot.slane %v5265_v35, 1 }
 0x58e   :  { %v5245_v40 = vrot.slane %v5244_v11, 1  ;;  %v5260_v30 = vmax.f32 %v5258_v47, %v5259_v62 }
 0x58f   :  { %v5251_v8 = vmax.f32 %v5249_v28, %v5250_v48  ;;  %v5267_v50 = vmax.f32 %v5265_v35, %v5266_v15 }
 0x590   :  { %v5246_v34 = vmax.f32 %v5244_v11, %v5245_v40 }
 0x591   :  { %v5252_v17 = vrot.slane %v5251_v8, 1 }
 0x592   :  { %v5382_v43 = vsel %vm1673_vm5, %v5246_v34, %v5381_v16 }
 0x593   :  { %v5253_v23 = vmax.f32 %v5251_v8, %v5252_v17 }
 0x595   :  { %v5383_v0 = vsel %vm1675_vm6, %v5253_v23, %v5382_v43 }
 0x596   :  { %v5384_v5 = vsel %vm1677_vm7, %v5260_v30, %v5383_v0 }
 0x597   :  { %v5385_v32 = vsel %vm1679_vm8, %v5267_v50, %v5384_v5 }
 0x598   :  { %5400 = vst [vmem:[%s9611_s6 + $0x68] sm:$0xff] %v5385_v32 }

</bundles_post_ra>
